<compile_context>
chip_gen: v7x
topology: tpu7x:2x2x1
jax: 0.10.0
libtpu: 0.0.40
codegen_flags: <defaults>
</compile_context>

<pallas_src>
import jax
import jax.numpy as jnp
from jax.experimental import pallas as pl
from jax.experimental.pallas import tpu as pltpu


# -----------------------------------------------------------------------------
# Per-TPU-generation tuning
# -----------------------------------------------------------------------------
def _tpu_generation():
    try:
        kind = jax.devices()[0].device_kind.lower()
    except Exception:
        return "unknown"
    if "v5 lite" in kind or "v5e" in kind or "v5lite" in kind:
        return "v5e"
    if "v6" in kind:
        return "v6e"
    if "v7" in kind:
        return "v7x"
    return "unknown"


_GEN = _tpu_generation()
# vmem: scoped-VMEM budget; ce_tm/ce_tv: flash-CE row/vocab tile caps; mlp_tm/mlp_th:
# fused-MLP row/hidden tile caps; ea_tm/ea_tn: encoder+adaptor row/output tile caps;
# min_row_tiles=2 on v7x so the 'parallel' row axis feeds both TensorCores.
_TUNE = {
    "v5e":     dict(vmem=64 * 2**20, ce_tm=256, ce_tv=1024, mlp_tm=256, mlp_th=512,
                    ea_tm=256, ea_tn=512, min_row_tiles=1),
    "v6e":     dict(vmem=96 * 2**20, ce_tm=512, ce_tv=2048, mlp_tm=512, mlp_th=1024,
                    ea_tm=512, ea_tn=1024, min_row_tiles=1),
    "v7x":     dict(vmem=48 * 2**20, ce_tm=256, ce_tv=1024, mlp_tm=256, mlp_th=512,
                    ea_tm=256, ea_tn=512, min_row_tiles=2),
    "unknown": dict(vmem=32 * 2**20, ce_tm=256, ce_tv=1024, mlp_tm=256, mlp_th=512,
                    ea_tm=256, ea_tn=512, min_row_tiles=1),
}[_GEN]


def _round_up(x, m):
    return ((x + m - 1) // m) * m


def _cdiv(a, b):
    return (a + b - 1) // b


def _pad2(a, rows, cols, fill=0.0):
    pr, pc = rows - a.shape[0], cols - a.shape[1]
    if pr == 0 and pc == 0:
        return a
    return jnp.pad(a, ((0, pr), (0, pc)), constant_values=fill)


def _choose_tile(padded_dim, cap, quantum=128):
    """Largest multiple of `quantum` that divides `padded_dim` and is <= cap."""
    d = padded_dim // quantum
    best = 1
    for k in range(1, d + 1):
        if d % k == 0 and k * quantum <= cap:
            best = k
    return best * quantum


def _row_tile(m, cap, min_tiles=1):
    tm = min(cap, _round_up(m, 8))
    if min_tiles > 1 and m >= 8 * min_tiles:
        tm = min(tm, _round_up(_cdiv(m, min_tiles), 8))
    return max(tm, 8)


# -----------------------------------------------------------------------------
# Kernel 1: fused audio encoder + adaptor
#   out = relu(relu(x @ We + be) @ Wa + ba); the encoder activation never leaves VMEM,
#   the adaptor weight is streamed in (Ep, tn) tiles.
# -----------------------------------------------------------------------------
def _enc_ada_kernel(x_ref, we_ref, be_ref, wa_ref, ba_ref, o_ref, henc_ref):
    n = pl.program_id(1)

    @pl.when(n == 0)
    def _():
        h = jnp.dot(x_ref[...], we_ref[...], preferred_element_type=jnp.float32)
        henc_ref[...] = jnp.maximum(h + be_ref[...], 0.0).astype(jnp.bfloat16)

    out = jnp.dot(henc_ref[...], wa_ref[...], preferred_element_type=jnp.float32)
    o_ref[...] = jnp.maximum(out + ba_ref[...], 0.0).astype(o_ref.dtype)


def enc_ada_pallas(x, we_p, be_p, wa_p, ba_p, n_real, out_dtype=jnp.float32):
    """Weights/biases are pre-padded (lane dims multiples of 128) and pre-cast."""
    M, _ = x.shape
    Fp, Ep = we_p.shape
    _, Np = wa_p.shape
    tm = _row_tile(M, _TUNE["ea_tm"], _TUNE["min_row_tiles"])
    tn = _choose_tile(Np, _TUNE["ea_tn"])
    Mp = _round_up(M, tm)
    xp = _pad2(x, Mp, Fp).astype(jnp.bfloat16)

    out = pl.pallas_call(
        _enc_ada_kernel,
        out_shape=jax.ShapeDtypeStruct((Mp, Np), out_dtype),
        grid_spec=pltpu.PrefetchScalarGridSpec(
            num_scalar_prefetch=0,
            grid=(Mp // tm, Np // tn),
            in_specs=[
                pl.BlockSpec((tm, Fp), lambda i, n: (i, 0)),
                pl.BlockSpec((Fp, Ep), lambda i, n: (0, 0)),
                pl.BlockSpec((1, Ep), lambda i, n: (0, 0)),
                pl.BlockSpec((Ep, tn), lambda i, n: (0, n)),
                pl.BlockSpec((1, tn), lambda i, n: (0, n)),
            ],
            out_specs=pl.BlockSpec((tm, tn), lambda i, n: (i, n)),
            scratch_shapes=[pltpu.VMEM((tm, Ep), jnp.bfloat16)],
        ),
        compiler_params=pltpu.CompilerParams(
            dimension_semantics=("parallel", "arbitrary"),
            vmem_limit_bytes=_TUNE["vmem"]),
    )(xp, we_p, be_p, wa_p, ba_p)
    return out[:M, :n_real]


# -----------------------------------------------------------------------------
# Kernel 2: fused stand-in LLM block  out = x + (gelu(x @ w1 + b1) @ w2 + b2)
#   (row-tile, hidden-tile) grid with an f32 accumulator: w1/w2 are streamed in
#   hidden-dim tiles instead of being held (double-buffered) fully resident.
# -----------------------------------------------------------------------------
def _mlp_residual_kernel(x_ref, w1_ref, b1_ref, w2_ref, b2_ref, o_ref, acc_ref):
    h = pl.program_id(1)

    @pl.when(h == 0)
    def _():
        acc_ref[...] = jnp.zeros_like(acc_ref)

    x = x_ref[...]                                                       # (tm, Dp) bf16
    h1 = jnp.dot(x, w1_ref[...], preferred_element_type=jnp.float32) + b1_ref[...]
    h1 = jax.nn.gelu(h1)
    acc_ref[...] += jnp.dot(h1.astype(jnp.bfloat16), w2_ref[...],
                            preferred_element_type=jnp.float32)

    @pl.when(h == pl.num_programs(1) - 1)
    def _():
        o_ref[...] = (x.astype(jnp.float32) + acc_ref[...] + b2_ref[...]).astype(o_ref.dtype)


def mlp_residual_pallas(x, w1_p, b1_p, w2_p, b2_p, out_dtype=jnp.bfloat16):
    M, D = x.shape
    Dp, Hp = w1_p.shape
    tm = _row_tile(M, _TUNE["mlp_tm"], _TUNE["min_row_tiles"])
    th = _choose_tile(Hp, _TUNE["mlp_th"])
    Mp = _round_up(M, tm)
    xp = _pad2(x, Mp, Dp).astype(jnp.bfloat16)

    out = pl.pallas_call(
        _mlp_residual_kernel,
        out_shape=jax.ShapeDtypeStruct((Mp, Dp), out_dtype),
        grid_spec=pltpu.PrefetchScalarGridSpec(
            num_scalar_prefetch=0,
            grid=(Mp // tm, Hp // th),
            in_specs=[
                pl.BlockSpec((tm, Dp), lambda i, h: (i, 0)),
                pl.BlockSpec((Dp, th), lambda i, h: (0, h)),
                pl.BlockSpec((1, th), lambda i, h: (0, h)),
                pl.BlockSpec((th, Dp), lambda i, h: (h, 0)),
                pl.BlockSpec((1, Dp), lambda i, h: (0, 0)),
            ],
            out_specs=pl.BlockSpec((tm, Dp), lambda i, h: (i, 0)),
            scratch_shapes=[pltpu.VMEM((tm, Dp), jnp.float32)],
        ),
        compiler_params=pltpu.CompilerParams(
            dimension_semantics=("parallel", "arbitrary"),
            vmem_limit_bytes=_TUNE["vmem"]),
    )(xp, w1_p, b1_p, w2_p, b2_p)
    return out[:M, :D]


# -----------------------------------------------------------------------------
# Kernel 3: fused LM head + shifted cross-entropy + argmax ("flash CE")
#   Streams vocab tiles; online logsumexp / first-index-argmax / label-logit carries
#   live in VMEM; the (M, V) logits tensor never touches HBM.  Padded vocab columns
#   carry a pre-baked -1e30 bias, so no in-kernel padding mask and no -inf carries.
# -----------------------------------------------------------------------------
def _lmhead_ce_kernel(h_ref, w_ref, b_ref, lb_ref, out_ref, m_s, l_s, lbl_s, aidx_s):
    j = pl.program_id(1)
    tv = w_ref.shape[1]

    @pl.when(j == 0)
    def _():
        m_s[...] = jnp.full_like(m_s, -jnp.inf)
        l_s[...] = jnp.zeros_like(l_s)
        lbl_s[...] = jnp.zeros_like(lbl_s)
        aidx_s[...] = jnp.zeros_like(aidx_s)

    s = jnp.dot(h_ref[...], w_ref[...], preferred_element_type=jnp.float32) + b_ref[...]
    col = jax.lax.broadcasted_iota(jnp.int32, s.shape, 1) + j * tv        # global vocab idx

    lb = lb_ref[...]                                                      # (tm, 1) int32
    m_prev = m_s[...]
    tile_max = jnp.max(s, axis=-1, keepdims=True)
    m_new = jnp.maximum(m_prev, tile_max)

    # online logsumexp carry (padded columns are ~ -1e30 -> exp underflows to 0)
    l_s[...] = l_s[...] * jnp.exp(m_prev - m_new) + \
        jnp.sum(jnp.exp(s - m_new), axis=-1, keepdims=True)

    # first-occurrence argmax carry (strict '>' keeps earliest tile / earliest column)
    tile_arg = jnp.min(jnp.where(s == tile_max, col, jnp.int32(2 ** 30)),
                       axis=-1, keepdims=True)
    aidx_s[...] = jnp.where(tile_max > m_prev, tile_arg, aidx_s[...])
    m_s[...] = m_new

    # label logit (exactly one vocab tile matches per valid row; -100 never matches)
    lbl_s[...] += jnp.sum(jnp.where(col == lb, s, 0.0), axis=-1, keepdims=True)

    @pl.when(j == pl.num_programs(1) - 1)
    def _():
        valid = lb != -100                                                # ignore_index
        loss = jnp.where(valid, m_s[...] + jnp.log(l_s[...]) - lbl_s[...], 0.0)
        # Lane-dense packed output: full (tm, 128) unmasked store;
        # lane 0 = per-token loss, lane 1 = argmax pred, lane 2 = valid flag.
        lane = jax.lax.broadcasted_iota(jnp.int32, out_ref.shape, 1)
        packed = jnp.where(lane == 0, loss,
                 jnp.where(lane == 1, aidx_s[...].astype(jnp.float32),
                 jnp.where(lane == 2, valid.astype(jnp.float32), 0.0)))
        out_ref[...] = packed


def lmhead_ce_pallas(h, w_lm_p, b_lm_p, labels):
    """Per-token (loss, argmax-pred, valid) for the shifted CE, no logits materialized."""
    M, _ = h.shape
    Dp, Vp = w_lm_p.shape
    tm = _row_tile(M, _TUNE["ce_tm"], _TUNE["min_row_tiles"])
    tv = _choose_tile(Vp, _TUNE["ce_tv"])
    Mp = _round_up(M, tm)

    hp = _pad2(h, Mp, Dp).astype(jnp.bfloat16)
    lbl = jnp.full((Mp, 1), -100, jnp.int32).at[:M, 0].set(labels.astype(jnp.int32))

    cost = pl.CostEstimate(
        flops=2 * Mp * Dp * Vp + 8 * Mp * Vp,
        transcendentals=Mp * Vp,
        bytes_accessed=(hp.size * 2 + w_lm_p.size * 2 * (Mp // tm)
                        + b_lm_p.size * 4 + lbl.size * 4 + Mp * 128 * 4))

    packed = pl.pallas_call(
        _lmhead_ce_kernel,
        out_shape=jax.ShapeDtypeStruct((Mp, 128), jnp.float32),
        grid_spec=pltpu.PrefetchScalarGridSpec(
            num_scalar_prefetch=0,
            grid=(Mp // tm, Vp // tv),
            in_specs=[
                pl.BlockSpec((tm, Dp), lambda i, j: (i, 0)),
                pl.BlockSpec((Dp, tv), lambda i, j: (0, j)),
                pl.BlockSpec((1, tv), lambda i, j: (0, j)),
                pl.BlockSpec((tm, 1), lambda i, j: (i, 0)),
            ],
            out_specs=pl.BlockSpec((tm, 128), lambda i, j: (i, 0)),
            scratch_shapes=[
                pltpu.VMEM((tm, 1), jnp.float32),   # running max
                pltpu.VMEM((tm, 1), jnp.float32),   # running sum-exp
                pltpu.VMEM((tm, 1), jnp.float32),   # label logit
                pltpu.VMEM((tm, 1), jnp.int32),     # running argmax index
            ],
        ),
        compiler_params=pltpu.CompilerParams(
            dimension_semantics=("parallel", "arbitrary"),
            vmem_limit_bytes=_TUNE["vmem"]),
        cost_estimate=cost,
    )(hp, w_lm_p, b_lm_p, lbl)

    packed = packed[:M]
    loss = packed[:, 0]
    pred = packed[:, 1].astype(jnp.int32)   # exact for vocab < 2**24
    valid = packed[:, 2]
    return loss, pred, valid


# -----------------------------------------------------------------------------
# Synthetic LLMASR2 parameters + one-time pad/cast (hoisted out of the forward)
# -----------------------------------------------------------------------------
def make_llmasr2_params(key, input_size, enc_dim, llm_dim, hidden_dim, vocab):
    ks = jax.random.split(key, 8)
    s = 0.02

    def w(k, shape):
        return s * jax.random.normal(k, shape, jnp.float32)

    return {
        "w_enc": w(ks[0], (input_size, enc_dim)),
        "b_enc": jnp.zeros((enc_dim,), jnp.float32),
        "w_ada": w(ks[1], (enc_dim, llm_dim)),
        "b_ada": jnp.zeros((llm_dim,), jnp.float32),
        "emb": s * jax.random.normal(ks[2], (vocab, llm_dim), jnp.float32),
        "w1": w(ks[3], (llm_dim, hidden_dim)),
        "b1": jnp.zeros((hidden_dim,), jnp.float32),
        "w2": w(ks[4], (hidden_dim, llm_dim)),
        "b2": jnp.zeros((llm_dim,), jnp.float32),
        "w_lm": w(ks[5], (llm_dim, vocab)),
        "b_lm": jnp.zeros((vocab,), jnp.float32),
    }


def prepare_padded_params(params):
    """One-time pad (lane dims -> multiples of 128) + cast (bf16 MXU weights, f32 biases).

    Hoisted out of the jitted forward: padding/casting the LM-head weight per step was a
    full extra HBM read+write of the largest tensor.  Padded LM-head bias columns are
    pre-filled with -1e30 so the flash-CE kernel needs no in-kernel vocab-padding mask.
    """
    def padw(w):
        K, N = w.shape
        return _pad2(w, _round_up(K, 128), _round_up(N, 128)).astype(jnp.bfloat16)

    def padb(b, fill=0.0):
        N = b.shape[0]
        return _pad2(b.reshape(1, N).astype(jnp.float32), 1, _round_up(N, 128), fill=fill)

    return {
        "emb": params["emb"].astype(jnp.float32),   # gather stays in plain XLA
        "w_enc": padw(params["w_enc"]), "b_enc": padb(params["b_enc"]),
        "w_ada": padw(params["w_ada"]), "b_ada": padb(params["b_ada"]),
        "w1": padw(params["w1"]), "b1": padb(params["b1"]),
        "w2": padw(params["w2"]), "b2": padb(params["b2"]),
        "w_lm": padw(params["w_lm"]), "b_lm": padb(params["b_lm"], fill=-1e30),
    }


# -----------------------------------------------------------------------------
# LLMASR2.forward
# -----------------------------------------------------------------------------
def llmasr2_forward(pparams, speech, speech_lengths, input_ids, attention_mask,
                    labels_ids, fbank_beg, fbank_mask):
    if speech_lengths.ndim > 1:
        speech_lengths = speech_lengths[:, 0]
    B, frames, F = speech.shape
    _, llm_dim = pparams["emb"].shape

    # ---- encode() + audio_adaptor(): fused into one row-tiled kernel ----------------
    # (the module's NTC->NCT->NTC permute pair only adapts layout for its plug-in encoder
    #  and is a no-op for the synthetic encoder, so it is dropped)
    enc_in = speech.reshape(B * frames, F)
    ada_out2d = enc_ada_pallas(enc_in, pparams["w_enc"], pparams["b_enc"],
                               pparams["w_ada"], pparams["b_ada"], n_real=llm_dim)
    encoder_out = ada_out2d.reshape(B, frames, llm_dim)

    # ---- input_ids[input_ids < 0] = 0 ; embedding lookup -----------------------------
    input_ids = jnp.where(input_ids < 0, 0, input_ids)
    inputs_embeds = jnp.take(pparams["emb"], input_ids, axis=0)          # (B, T_tok, D)
    _, token_num, dims = inputs_embeds.shape

    # ---- fbank_mask clamp; splice adaptor output into inputs_embeds ------------------
    fbank_mask = jnp.where(fbank_mask < 0, 0.0, fbank_mask)
    fbank_fake_lens = jnp.sum(fbank_mask, axis=-1).astype(jnp.int32)

    def splice_one(embeds_b, enc_b, beg, fake_len):
        t_tok = embeds_b.shape[0]
        min_len = jnp.minimum(fake_len, t_tok - beg)
        pos = jnp.arange(t_tok, dtype=jnp.int32)
        mask = (pos >= beg) & (pos < beg + min_len)
        src = jnp.clip(pos - beg, 0, enc_b.shape[0] - 1)
        return jnp.where(mask[:, None], enc_b[src], embeds_b)

    inputs_embeds = jax.vmap(splice_one)(
        inputs_embeds, encoder_out, fbank_beg[:, 0].astype(jnp.int32), fbank_fake_lens)

    # ---- labels / attention_mask clamps (exact module semantics) ---------------------
    labels_ids = jnp.where(labels_ids == -1, -100, labels_ids)
    attention_mask = jnp.where(attention_mask < 0, 0, attention_mask)

    # ---- "LLM" forward -----------------------------------------------------------------
    # TODO(synk): the pretrained HF causal LM (multi-layer attention stack) has no clean
    # in-script equivalent; a position-wise residual MLP + LM head stands in, so
    # attention_mask only feeds the stats (loss positions are governed by labels == -100,
    # exactly as in the reference).
    h2d = inputs_embeds.reshape(B * token_num, dims)
    h2d = mlp_residual_pallas(h2d, pparams["w1"], pparams["b1"],
                              pparams["w2"], pparams["b2"], out_dtype=jnp.bfloat16)

    # HF CausalLM loss: shift logits/labels, mean CE over labels != -100.  Only the
    # B*(T-1) shifted rows reach the fused LM-head+CE kernel; logits never touch HBM.
    h_shift = h2d.reshape(B, token_num, dims)[:, :-1, :].reshape(
        B * (token_num - 1), dims)
    shift_labels = labels_ids[:, 1:].reshape(B * (token_num - 1))
    tok_loss, tok_pred, tok_valid = lmhead_ce_pallas(
        h_shift, pparams["w_lm"], pparams["b_lm"], shift_labels)
    n_valid = jnp.maximum(jnp.sum(tok_valid), 1.0)
    loss = jnp.sum(tok_loss) / n_valid

    # compute_accuracy(preds[:, :-1], labels[:, 1:], ignore_label=-100)
    correct = (tok_pred == shift_labels).astype(jnp.float32) * tok_valid
    acc_att = jnp.sum(correct) / n_valid

    stats = {}
    stats["acc"] = acc_att
    stats["loss"] = loss
    stats["batch_size"] = B
    stats["batch_size_x_frames"] = frames * B
    stats["batch_size_real_frames"] = jnp.sum(speech_lengths)
    stats["padding_frames"] = stats["batch_size_x_frames"] - stats["batch_size_real_frames"]
    stats["batch_size_x_tokens"] = token_num * B
    stats["batch_size_real_tokens"] = jnp.sum(attention_mask)
    stats["padding_tokens"] = stats["batch_size_x_tokens"] - stats["batch_size_real_tokens"]

    weight = jnp.asarray(B, jnp.int32)   # force_gatherable((loss, stats, batch_size), ...)
    return loss, stats, weight


# -----------------------------------------------------------------------------
# Driver
# -----------------------------------------------------------------------------
if __name__ == "__main__":
    B = 2
    T_SPEECH = 16      # fbank frames
    INPUT_SIZE = 80    # module default fbank dim (padded to 128 lanes at prep time)
    ENC_DIM = 128      # audio_encoder_output_size
    LLM_DIM = 128      # llm embedding dim
    HID_DIM = 256      # stand-in LLM MLP hidden
    VOCAB = 1000       # non-multiple of 128 → exercises the baked -1e30 vocab padding
    T_TOK = 24         # token_num

    key = jax.random.PRNGKey(0)
    kp, ks, ki, kl = jax.random.split(key, 4)
    raw_params = make_llmasr2_params(kp, INPUT_SIZE, ENC_DIM, LLM_DIM, HID_DIM, VOCAB)
    pparams = prepare_padded_params(raw_params)      # pad/cast once, outside the jit

    speech = jax.random.normal(ks, (B, T_SPEECH, INPUT_SIZE), jnp.float32)
    speech_lengths = jnp.array([16, 12], jnp.int32)

    input_ids = jax.random.randint(ki, (B, T_TOK), 0, VOCAB, jnp.int32)
    input_ids = input_ids.at[:, -2:].set(-1)            # padding → exercises the <0 clamp

    attention_mask = jnp.ones((B, T_TOK), jnp.int32)
    attention_mask = attention_mask.at[1, -3:].set(-1)  # exercises the <0 clamp

    labels_ids = jax.random.randint(kl, (B, T_TOK), 0, VOCAB, jnp.int32)
    labels_ids = labels_ids.at[:, :6].set(-100)         # prompt region ignored
    labels_ids = labels_ids.at[:, -2:].set(-1)          # exercises the == -1 -> -100 rewrite

    fbank_beg = jnp.array([[4], [6]], jnp.int32)
    fbank_mask = jnp.zeros((B, T_TOK), jnp.float32)
    fbank_mask = fbank_mask.at[0, 4:14].set(1.0)        # 10 audio tokens for sample 0
    fbank_mask = fbank_mask.at[1, 6:18].set(1.0)        # 12 audio tokens for sample 1
    fbank_mask = fbank_mask.at[0, 0].set(-1.0)          # exercises the <0 clamp

    fwd = jax.jit(llmasr2_forward)
    loss, stats, weight = fwd(pparams, speech, speech_lengths, input_ids,
                              attention_mask, labels_ids, fbank_beg, fbank_mask)
    jax.block_until_ready(loss)
    jax.block_until_ready(stats["acc"])
    jax.block_until_ready(weight)
    print("KERNEL_OK")
</pallas_src>

<mosaic_0001>
module attributes {stable_mosaic.version = 11 : i64} {
  func.func @_enc_ada_kernel(%arg0: i32, %arg1: i32, %arg2: memref<32x128xbf16, #tpu.memory_space<vmem>>, %arg3: memref<128x128xbf16, #tpu.memory_space<vmem>>, %arg4: memref<1x128xf32, #tpu.memory_space<vmem>>, %arg5: memref<128x128xbf16, #tpu.memory_space<vmem>>, %arg6: memref<1x128xf32, #tpu.memory_space<vmem>>, %arg7: memref<32x128xf32, #tpu.memory_space<vmem>>, %arg8: memref<32x128xbf16, #tpu.memory_space<vmem>>) attributes {dimension_semantics = [#tpu.dimension_semantics<parallel>, #tpu.dimension_semantics<arbitrary>], iteration_bounds = array<i64: 1, 1>, scalar_prefetch = 0 : i64, scratch_operands = 1 : i64, tpu.core_type = #tpu.core_type<tc>, window_params = [{transform_indices = @transform_0, window_bounds = array<i64: 32, 128>}, {pipeline_mode = #tpu.pipeline_mode<synchronous>, transform_indices = @transform_1, window_bounds = array<i64: 128, 128>}, {pipeline_mode = #tpu.pipeline_mode<synchronous>, transform_indices = @transform_2, window_bounds = array<i64: 1, 128>}, {transform_indices = @transform_3, window_bounds = array<i64: 128, 128>}, {transform_indices = @transform_4, window_bounds = array<i64: 1, 128>}, {transform_indices = @transform_5, window_bounds = array<i64: 32, 128>}]} {
    %c0_i32 = arith.constant 0 : i32
    %0 = arith.cmpi eq, %arg1, %c0_i32 : i32
    %1 = arith.extui %0 : i1 to i32
    %c0_i32_0 = arith.constant 0 : i32
    %2 = arith.cmpi ne, %1, %c0_i32_0 : i32
    scf.if %2 {
      %c0_9 = arith.constant 0 : index
      %c0_10 = arith.constant 0 : index
      %12 = vector.load %arg2[%c0_9, %c0_10] : memref<32x128xbf16, #tpu.memory_space<vmem>>, vector<32x128xbf16>
      %c0_11 = arith.constant 0 : index
      %c0_12 = arith.constant 0 : index
      %13 = vector.load %arg3[%c0_11, %c0_12] : memref<128x128xbf16, #tpu.memory_space<vmem>>, vector<128x128xbf16>
      %cst_13 = arith.constant dense<0.000000e+00> : vector<32x128xf32>
      %14 = tpu.matmul %12, %13, %cst_13 {dimension_numbers = #tpu.dot_dimension_numbers<[1], [0], [0], [1], [0, 0, 1, 1], [], []>} : vector<32x128xbf16>, vector<128x128xbf16>, vector<32x128xf32> -> vector<32x128xf32>
      %c0_14 = arith.constant 0 : index
      %c0_15 = arith.constant 0 : index
      %15 = vector.load %arg4[%c0_14, %c0_15] : memref<1x128xf32, #tpu.memory_space<vmem>>, vector<1x128xf32>
      %16 = vector.broadcast %15 : vector<1x128xf32> to vector<32x128xf32>
      %17 = arith.addf %14, %16 : vector<32x128xf32>
      %cst_16 = arith.constant 0.000000e+00 : f32
      %18 = vector.broadcast %cst_16 : f32 to vector<32x128xf32>
      %19 = arith.maximumf %17, %18 : vector<32x128xf32>
      %20 = arith.truncf %19 : vector<32x128xf32> to vector<32x128xbf16>
      %c0_17 = arith.constant 0 : index
      %c0_18 = arith.constant 0 : index
      %21 = vector.load %arg8[%c0_17, %c0_18] : memref<32x128xbf16, #tpu.memory_space<vmem>>, vector<32x128xbf16>
      tpu.vector_store %arg8[%c0_17, %c0_18], %20 {strides = array<i32>} : memref<32x128xbf16, #tpu.memory_space<vmem>>, vector<32x128xbf16>,
    } else {
    }
    %c0 = arith.constant 0 : index
    %c0_1 = arith.constant 0 : index
    %3 = vector.load %arg8[%c0, %c0_1] : memref<32x128xbf16, #tpu.memory_space<vmem>>, vector<32x128xbf16>
    %c0_2 = arith.constant 0 : index
    %c0_3 = arith.constant 0 : index
    %4 = vector.load %arg5[%c0_2, %c0_3] : memref<128x128xbf16, #tpu.memory_space<vmem>>, vector<128x128xbf16>
    %cst = arith.constant dense<0.000000e+00> : vector<32x128xf32>
    %5 = tpu.matmul %3, %4, %cst {dimension_numbers = #tpu.dot_dimension_numbers<[1], [0], [0], [1], [0, 0, 1, 1], [], []>} : vector<32x128xbf16>, vector<128x128xbf16>, vector<32x128xf32> -> vector<32x128xf32>
    %c0_4 = arith.constant 0 : index
    %c0_5 = arith.constant 0 : index
    %6 = vector.load %arg6[%c0_4, %c0_5] : memref<1x128xf32, #tpu.memory_space<vmem>>, vector<1x128xf32>
    %7 = vector.broadcast %6 : vector<1x128xf32> to vector<32x128xf32>
    %8 = arith.addf %5, %7 : vector<32x128xf32>
    %cst_6 = arith.constant 0.000000e+00 : f32
    %9 = vector.broadcast %cst_6 : f32 to vector<32x128xf32>
    %10 = arith.maximumf %8, %9 : vector<32x128xf32>
    %c0_7 = arith.constant 0 : index
    %c0_8 = arith.constant 0 : index
    %11 = vector.load %arg7[%c0_7, %c0_8] : memref<32x128xf32, #tpu.memory_space<vmem>>, vector<32x128xf32>
    tpu.vector_store %arg7[%c0_7, %c0_8], %10 {strides = array<i32>} : memref<32x128xf32, #tpu.memory_space<vmem>>, vector<32x128xf32>,
    return
  }
  func.func @transform_0(%arg0: i32, %arg1: i32) -> (i32, i32) {
    %c0_i32 = arith.constant 0 : i32
    %c0_i32_0 = arith.constant 0 : i32
    return %arg0, %c0_i32 : i32, i32
  }
  func.func @transform_1(%arg0: i32, %arg1: i32) -> (i32, i32) {
    %c0_i32 = arith.constant 0 : i32
    %c0_i32_0 = arith.constant 0 : i32
    %c0_i32_1 = arith.constant 0 : i32
    return %c0_i32, %c0_i32_0 : i32, i32
  }
  func.func @transform_2(%arg0: i32, %arg1: i32) -> (i32, i32) {
    %c0_i32 = arith.constant 0 : i32
    %c0_i32_0 = arith.constant 0 : i32
    %c0_i32_1 = arith.constant 0 : i32
    return %c0_i32, %c0_i32_0 : i32, i32
  }
  func.func @transform_3(%arg0: i32, %arg1: i32) -> (i32, i32) {
    %c0_i32 = arith.constant 0 : i32
    %c0_i32_0 = arith.constant 0 : i32
    return %c0_i32, %arg1 : i32, i32
  }
  func.func @transform_4(%arg0: i32, %arg1: i32) -> (i32, i32) {
    %c0_i32 = arith.constant 0 : i32
    %c0_i32_0 = arith.constant 0 : i32
    return %c0_i32, %arg1 : i32, i32
  }
  func.func @transform_5(%arg0: i32, %arg1: i32) -> (i32, i32) {
    %c0_i32 = arith.constant 0 : i32
    return %arg0, %arg1 : i32, i32
  }
}

module attributes {stable_mosaic.version = 11 : i64} {
  func.func @_mlp_residual_kernel(%arg0: i32, %arg1: i32, %arg2: memref<48x128xbf16, #tpu.memory_space<vmem>>, %arg3: memref<128x256xbf16, #tpu.memory_space<vmem>>, %arg4: memref<1x256xf32, #tpu.memory_space<vmem>>, %arg5: memref<256x128xbf16, #tpu.memory_space<vmem>>, %arg6: memref<1x128xf32, #tpu.memory_space<vmem>>, %arg7: memref<48x128xbf16, #tpu.memory_space<vmem>>, %arg8: memref<48x128xf32, #tpu.memory_space<vmem>>) attributes {dimension_semantics = [#tpu.dimension_semantics<parallel>, #tpu.dimension_semantics<arbitrary>], iteration_bounds = array<i64: 1, 1>, scalar_prefetch = 0 : i64, scratch_operands = 1 : i64, tpu.core_type = #tpu.core_type<tc>, window_params = [{transform_indices = @transform_0, window_bounds = array<i64: 48, 128>}, {transform_indices = @transform_1, window_bounds = array<i64: 128, 256>}, {transform_indices = @transform_2, window_bounds = array<i64: 1, 256>}, {transform_indices = @transform_3, window_bounds = array<i64: 256, 128>}, {pipeline_mode = #tpu.pipeline_mode<synchronous>, transform_indices = @transform_4, window_bounds = array<i64: 1, 128>}, {transform_indices = @transform_5, window_bounds = array<i64: 48, 128>}]} {
    %c0_i32 = arith.constant 0 : i32
    %0 = arith.cmpi eq, %arg1, %c0_i32 : i32
    %1 = arith.extui %0 : i1 to i32
    %c0_i32_0 = arith.constant 0 : i32
    %2 = arith.cmpi ne, %1, %c0_i32_0 : i32
    scf.if %2 {
      %cst_19 = arith.constant 0.000000e+00 : f32
      %31 = vector.broadcast %cst_19 : f32 to vector<48x128xf32>
      %c0_20 = arith.constant 0 : index
      %c0_21 = arith.constant 0 : index
      %32 = vector.load %arg8[%c0_20, %c0_21] : memref<48x128xf32, #tpu.memory_space<vmem>>, vector<48x128xf32>
      tpu.vector_store %arg8[%c0_20, %c0_21], %31 {strides = array<i32>} : memref<48x128xf32, #tpu.memory_space<vmem>>, vector<48x128xf32>,
    } else {
    }
    %c0 = arith.constant 0 : index
    %c0_1 = arith.constant 0 : index
    %3 = vector.load %arg2[%c0, %c0_1] : memref<48x128xbf16, #tpu.memory_space<vmem>>, vector<48x128xbf16>
    %c0_2 = arith.constant 0 : index
    %c0_3 = arith.constant 0 : index
    %4 = vector.load %arg3[%c0_2, %c0_3] : memref<128x256xbf16, #tpu.memory_space<vmem>>, vector<128x256xbf16>
    %cst = arith.constant dense<0.000000e+00> : vector<48x256xf32>
    %5 = tpu.matmul %3, %4, %cst {dimension_numbers = #tpu.dot_dimension_numbers<[1], [0], [0], [1], [0, 0, 1, 1], [], []>} : vector<48x128xbf16>, vector<128x256xbf16>, vector<48x256xf32> -> vector<48x256xf32>
    %c0_4 = arith.constant 0 : index
    %c0_5 = arith.constant 0 : index
    %6 = vector.load %arg4[%c0_4, %c0_5] : memref<1x256xf32, #tpu.memory_space<vmem>>, vector<1x256xf32>
    %7 = vector.broadcast %6 : vector<1x256xf32> to vector<48x256xf32>
    %8 = arith.addf %5, %7 : vector<48x256xf32>
    %9 = arith.mulf %8, %8 : vector<48x256xf32>
    %10 = arith.mulf %8, %9 : vector<48x256xf32>
    %cst_6 = arith.constant 4.471500e-02 : f32
    %11 = vector.broadcast %cst_6 : f32 to vector<48x256xf32>
    %12 = arith.mulf %11, %10 : vector<48x256xf32>
    %13 = arith.addf %8, %12 : vector<48x256xf32>
    %cst_7 = arith.constant 0.797884583 : f32
    %14 = vector.broadcast %cst_7 : f32 to vector<48x256xf32>
    %15 = arith.mulf %14, %13 : vector<48x256xf32>
    %16 = math.tanh %15 : vector<48x256xf32>
    %cst_8 = arith.constant 1.000000e+00 : f32
    %17 = vector.broadcast %cst_8 : f32 to vector<48x256xf32>
    %18 = arith.addf %17, %16 : vector<48x256xf32>
    %cst_9 = arith.constant 5.000000e-01 : f32
    %19 = vector.broadcast %cst_9 : f32 to vector<48x256xf32>
    %20 = arith.mulf %19, %18 : vector<48x256xf32>
    %21 = arith.mulf %8, %20 : vector<48x256xf32>
    %c0_10 = arith.constant 0 : index
    %c0_11 = arith.constant 0 : index
    %22 = vector.load %arg8[%c0_10, %c0_11] : memref<48x128xf32, #tpu.memory_space<vmem>>, vector<48x128xf32>
    %23 = arith.truncf %21 : vector<48x256xf32> to vector<48x256xbf16>
    %c0_12 = arith.constant 0 : index
    %c0_13 = arith.constant 0 : index
    %24 = vector.load %arg5[%c0_12, %c0_13] : memref<256x128xbf16, #tpu.memory_space<vmem>>, vector<256x128xbf16>
    %cst_14 = arith.constant dense<0.000000e+00> : vector<48x128xf32>
    %25 = tpu.matmul %23, %24, %cst_14 {dimension_numbers = #tpu.dot_dimension_numbers<[1], [0], [0], [1], [0, 0, 1, 1], [], []>} : vector<48x256xbf16>, vector<256x128xbf16>, vector<48x128xf32> -> vector<48x128xf32>
    %26 = arith.addf %22, %25 : vector<48x128xf32>
    %c0_15 = arith.constant 0 : index
    %c0_16 = arith.constant 0 : index
    %27 = vector.load %arg8[%c0_15, %c0_16] : memref<48x128xf32, #tpu.memory_space<vmem>>, vector<48x128xf32>
    tpu.vector_store %arg8[%c0_15, %c0_16], %26 {strides = array<i32>} : memref<48x128xf32, #tpu.memory_space<vmem>>, vector<48x128xf32>,
    %c0_i32_17 = arith.constant 0 : i32
    %28 = arith.cmpi eq, %arg1, %c0_i32_17 : i32
    %29 = arith.extui %28 : i1 to i32
    %c0_i32_18 = arith.constant 0 : i32
    %30 = arith.cmpi ne, %29, %c0_i32_18 : i32
    scf.if %30 {
      %31 = arith.extf %3 : vector<48x128xbf16> to vector<48x128xf32>
      %c0_19 = arith.constant 0 : index
      %c0_20 = arith.constant 0 : index
      %32 = vector.load %arg8[%c0_19, %c0_20] : memref<48x128xf32, #tpu.memory_space<vmem>>, vector<48x128xf32>
      %33 = arith.addf %31, %32 : vector<48x128xf32>
      %c0_21 = arith.constant 0 : index
      %c0_22 = arith.constant 0 : index
      %34 = vector.load %arg6[%c0_21, %c0_22] : memref<1x128xf32, #tpu.memory_space<vmem>>, vector<1x128xf32>
      %35 = vector.broadcast %34 : vector<1x128xf32> to vector<48x128xf32>
      %36 = arith.addf %33, %35 : vector<48x128xf32>
      %37 = arith.truncf %36 : vector<48x128xf32> to vector<48x128xbf16>
      %c0_23 = arith.constant 0 : index
      %c0_24 = arith.constant 0 : index
      %38 = vector.load %arg7[%c0_23, %c0_24] : memref<48x128xbf16, #tpu.memory_space<vmem>>, vector<48x128xbf16>
      tpu.vector_store %arg7[%c0_23, %c0_24], %37 {strides = array<i32>} : memref<48x128xbf16, #tpu.memory_space<vmem>>, vector<48x128xbf16>,
    } else {
    }
    return
  }
  func.func @transform_0(%arg0: i32, %arg1: i32) -> (i32, i32) {
    %c0_i32 = arith.constant 0 : i32
    %c0_i32_0 = arith.constant 0 : i32
    return %arg0, %c0_i32 : i32, i32
  }
  func.func @transform_1(%arg0: i32, %arg1: i32) -> (i32, i32) {
    %c0_i32 = arith.constant 0 : i32
    %c0_i32_0 = arith.constant 0 : i32
    return %c0_i32, %arg1 : i32, i32
  }
  func.func @transform_2(%arg0: i32, %arg1: i32) -> (i32, i32) {
    %c0_i32 = arith.constant 0 : i32
    %c0_i32_0 = arith.constant 0 : i32
    return %c0_i32, %arg1 : i32, i32
  }
  func.func @transform_3(%arg0: i32, %arg1: i32) -> (i32, i32) {
    %c0_i32 = arith.constant 0 : i32
    %c0_i32_0 = arith.constant 0 : i32
    return %arg1, %c0_i32 : i32, i32
  }
  func.func @transform_4(%arg0: i32, %arg1: i32) -> (i32, i32) {
    %c0_i32 = arith.constant 0 : i32
    %c0_i32_0 = arith.constant 0 : i32
    %c0_i32_1 = arith.constant 0 : i32
    return %c0_i32, %c0_i32_0 : i32, i32
  }
  func.func @transform_5(%arg0: i32, %arg1: i32) -> (i32, i32) {
    %c0_i32 = arith.constant 0 : i32
    %c0_i32_0 = arith.constant 0 : i32
    return %arg0, %c0_i32 : i32, i32
  }
}

module attributes {stable_mosaic.version = 11 : i64} {
  func.func @_lmhead_ce_kernel(%arg0: i32, %arg1: i32, %arg2: memref<48x128xbf16, #tpu.memory_space<vmem>>, %arg3: memref<128x1024xbf16, #tpu.memory_space<vmem>>, %arg4: memref<1x1024xf32, #tpu.memory_space<vmem>>, %arg5: memref<48x1xi32, #tpu.memory_space<vmem>>, %arg6: memref<48x128xf32, #tpu.memory_space<vmem>>, %arg7: memref<48x1xf32, #tpu.memory_space<vmem>>, %arg8: memref<48x1xf32, #tpu.memory_space<vmem>>, %arg9: memref<48x1xf32, #tpu.memory_space<vmem>>, %arg10: memref<48x1xi32, #tpu.memory_space<vmem>>) attributes {dimension_semantics = [#tpu.dimension_semantics<parallel>, #tpu.dimension_semantics<arbitrary>], iteration_bounds = array<i64: 1, 1>, scalar_prefetch = 0 : i64, scratch_operands = 4 : i64, tpu.core_type = #tpu.core_type<tc>, window_params = [{transform_indices = @transform_0, window_bounds = array<i64: 48, 128>}, {transform_indices = @transform_1, window_bounds = array<i64: 128, 1024>}, {transform_indices = @transform_2, window_bounds = array<i64: 1, 1024>}, {transform_indices = @transform_3, window_bounds = array<i64: 48, 1>}, {transform_indices = @transform_4, window_bounds = array<i64: 48, 128>}]} {
    %c0_i32 = arith.constant 0 : i32
    %0 = arith.cmpi eq, %arg1, %c0_i32 : i32
    %1 = arith.extui %0 : i1 to i32
    %c0_i32_0 = arith.constant 0 : i32
    %2 = arith.cmpi ne, %1, %c0_i32_0 : i32
    scf.if %2 {
      %cst_31 = arith.constant 0xFF800000 : f32
      %52 = vector.broadcast %cst_31 : f32 to vector<48x1xf32>
      %c0_32 = arith.constant 0 : index
      %c0_33 = arith.constant 0 : index
      %53 = vector.load %arg7[%c0_32, %c0_33] : memref<48x1xf32, #tpu.memory_space<vmem>>, vector<48x1xf32>
      tpu.vector_store %arg7[%c0_32, %c0_33], %52 {strides = array<i32>} : memref<48x1xf32, #tpu.memory_space<vmem>>, vector<48x1xf32>,
      %cst_34 = arith.constant 0.000000e+00 : f32
      %54 = vector.broadcast %cst_34 : f32 to vector<48x1xf32>
      %c0_35 = arith.constant 0 : index
      %c0_36 = arith.constant 0 : index
      %55 = vector.load %arg8[%c0_35, %c0_36] : memref<48x1xf32, #tpu.memory_space<vmem>>, vector<48x1xf32>
      tpu.vector_store %arg8[%c0_35, %c0_36], %54 {strides = array<i32>} : memref<48x1xf32, #tpu.memory_space<vmem>>, vector<48x1xf32>,
      %cst_37 = arith.constant 0.000000e+00 : f32
      %56 = vector.broadcast %cst_37 : f32 to vector<48x1xf32>
      %c0_38 = arith.constant 0 : index
      %c0_39 = arith.constant 0 : index
      %57 = vector.load %arg9[%c0_38, %c0_39] : memref<48x1xf32, #tpu.memory_space<vmem>>, vector<48x1xf32>
      tpu.vector_store %arg9[%c0_38, %c0_39], %56 {strides = array<i32>} : memref<48x1xf32, #tpu.memory_space<vmem>>, vector<48x1xf32>,
      %c0_i32_40 = arith.constant 0 : i32
      %58 = vector.broadcast %c0_i32_40 : i32 to vector<48x1xi32>
      %c0_41 = arith.constant 0 : index
      %c0_42 = arith.constant 0 : index
      %59 = vector.load %arg10[%c0_41, %c0_42] : memref<48x1xi32, #tpu.memory_space<vmem>>, vector<48x1xi32>
      tpu.vector_store %arg10[%c0_41, %c0_42], %58 {strides = array<i32>} : memref<48x1xi32, #tpu.memory_space<vmem>>, vector<48x1xi32>,
    } else {
    }
    %c0 = arith.constant 0 : index
    %c0_1 = arith.constant 0 : index
    %3 = vector.load %arg2[%c0, %c0_1] : memref<48x128xbf16, #tpu.memory_space<vmem>>, vector<48x128xbf16>
    %c0_2 = arith.constant 0 : index
    %c0_3 = arith.constant 0 : index
    %4 = vector.load %arg3[%c0_2, %c0_3] : memref<128x1024xbf16, #tpu.memory_space<vmem>>, vector<128x1024xbf16>
    %cst = arith.constant dense<0.000000e+00> : vector<48x1024xf32>
    %5 = tpu.matmul %3, %4, %cst {dimension_numbers = #tpu.dot_dimension_numbers<[1], [0], [0], [1], [0, 0, 1, 1], [], []>} : vector<48x128xbf16>, vector<128x1024xbf16>, vector<48x1024xf32> -> vector<48x1024xf32>
    %c0_4 = arith.constant 0 : index
    %c0_5 = arith.constant 0 : index
    %6 = vector.load %arg4[%c0_4, %c0_5] : memref<1x1024xf32, #tpu.memory_space<vmem>>, vector<1x1024xf32>
    %7 = vector.broadcast %6 : vector<1x1024xf32> to vector<48x1024xf32>
    %8 = arith.addf %5, %7 : vector<48x1024xf32>
    %9 = tpu.iota {dimensions = array<i32: 1>} : vector<48x1024xi32>
    %c1024_i32 = arith.constant 1024 : i32
    %10 = arith.muli %arg1, %c1024_i32 : i32
    %11 = vector.broadcast %10 : i32 to vector<48x1024xi32>
    %12 = arith.addi %9, %11 : vector<48x1024xi32>
    %c0_6 = arith.constant 0 : index
    %c0_7 = arith.constant 0 : index
    %13 = vector.load %arg5[%c0_6, %c0_7] : memref<48x1xi32, #tpu.memory_space<vmem>>, vector<48x1xi32>
    %c0_8 = arith.constant 0 : index
    %c0_9 = arith.constant 0 : index
    %14 = vector.load %arg7[%c0_8, %c0_9] : memref<48x1xf32, #tpu.memory_space<vmem>>, vector<48x1xf32>
    %cst_10 = arith.constant dense<0xFF800000> : vector<48xf32>
    %15 = vector.multi_reduction <maximumf>, %8, %cst_10 [1] : vector<48x1024xf32> to vector<48xf32>
    %16 = vector.shape_cast %15 : vector<48xf32> to vector<48x1xf32>
    %17 = arith.maximumf %14, %16 : vector<48x1xf32>
    %c0_11 = arith.constant 0 : index
    %c0_12 = arith.constant 0 : index
    %18 = vector.load %arg8[%c0_11, %c0_12] : memref<48x1xf32, #tpu.memory_space<vmem>>, vector<48x1xf32>
    %19 = arith.subf %14, %17 : vector<48x1xf32>
    %20 = math.exp %19 : vector<48x1xf32>
    %21 = arith.mulf %18, %20 : vector<48x1xf32>
    %22 = vector.broadcast %17 : vector<48x1xf32> to vector<48x1024xf32>
    %23 = arith.subf %8, %22 : vector<48x1024xf32>
    %24 = math.exp %23 : vector<48x1024xf32>
    %cst_13 = arith.constant dense<0.000000e+00> : vector<48xf32>
    %25 = vector.multi_reduction <add>, %24, %cst_13 [1] : vector<48x1024xf32> to vector<48xf32>
    %26 = vector.shape_cast %25 : vector<48xf32> to vector<48x1xf32>
    %27 = arith.addf %21, %26 : vector<48x1xf32>
    %c0_14 = arith.constant 0 : index
    %c0_15 = arith.constant 0 : index
    %28 = vector.load %arg8[%c0_14, %c0_15] : memref<48x1xf32, #tpu.memory_space<vmem>>, vector<48x1xf32>
    tpu.vector_store %arg8[%c0_14, %c0_15], %27 {strides = array<i32>} : memref<48x1xf32, #tpu.memory_space<vmem>>, vector<48x1xf32>,
    %29 = vector.broadcast %16 : vector<48x1xf32> to vector<48x1024xf32>
    %30 = arith.cmpf oeq, %8, %29 : vector<48x1024xf32>
    %c1073741824_i32 = arith.constant 1073741824 : i32
    %31 = vector.broadcast %c1073741824_i32 : i32 to vector<48x1024xi32>
    %32 = arith.select %30, %12, %31 : vector<48x1024xi1>, vector<48x1024xi32>
    %cst_16 = arith.constant dense<2147483647> : vector<48xi32>
    %33 = vector.multi_reduction <minsi>, %32, %cst_16 [1] : vector<48x1024xi32> to vector<48xi32>
    %34 = vector.shape_cast %33 : vector<48xi32> to vector<48x1xi32>
    %35 = arith.cmpf ogt, %16, %14 : vector<48x1xf32>
    %c0_17 = arith.constant 0 : index
    %c0_18 = arith.constant 0 : index
    %36 = vector.load %arg10[%c0_17, %c0_18] : memref<48x1xi32, #tpu.memory_space<vmem>>, vector<48x1xi32>
    %37 = arith.select %35, %34, %36 : vector<48x1xi1>, vector<48x1xi32>
    %c0_19 = arith.constant 0 : index
    %c0_20 = arith.constant 0 : index
    %38 = vector.load %arg10[%c0_19, %c0_20] : memref<48x1xi32, #tpu.memory_space<vmem>>, vector<48x1xi32>
    tpu.vector_store %arg10[%c0_19, %c0_20], %37 {strides = array<i32>} : memref<48x1xi32, #tpu.memory_space<vmem>>, vector<48x1xi32>,
    %c0_21 = arith.constant 0 : index
    %c0_22 = arith.constant 0 : index
    %39 = vector.load %arg7[%c0_21, %c0_22] : memref<48x1xf32, #tpu.memory_space<vmem>>, vector<48x1xf32>
    tpu.vector_store %arg7[%c0_21, %c0_22], %17 {strides = array<i32>} : memref<48x1xf32, #tpu.memory_space<vmem>>, vector<48x1xf32>,
    %c0_23 = arith.constant 0 : index
    %c0_24 = arith.constant 0 : index
    %40 = vector.load %arg9[%c0_23, %c0_24] : memref<48x1xf32, #tpu.memory_space<vmem>>, vector<48x1xf32>
    %41 = vector.broadcast %13 : vector<48x1xi32> to vector<48x1024xi32>
    %42 = arith.cmpi eq, %12, %41 : vector<48x1024xi32>
    %cst_25 = arith.constant 0.000000e+00 : f32
    %43 = vector.broadcast %cst_25 : f32 to vector<48x1024xf32>
    %44 = arith.select %42, %8, %43 : vector<48x1024xi1>, vector<48x1024xf32>
    %cst_26 = arith.constant dense<0.000000e+00> : vector<48xf32>
    %45 = vector.multi_reduction <add>, %44, %cst_26 [1] : vector<48x1024xf32> to vector<48xf32>
    %46 = vector.shape_cast %45 : vector<48xf32> to vector<48x1xf32>
    %47 = arith.addf %40, %46 : vector<48x1xf32>
    %c0_27 = arith.constant 0 : index
    %c0_28 = arith.constant 0 : index
    %48 = vector.load %arg9[%c0_27, %c0_28] : memref<48x1xf32, #tpu.memory_space<vmem>>, vector<48x1xf32>
    tpu.vector_store %arg9[%c0_27, %c0_28], %47 {strides = array<i32>} : memref<48x1xf32, #tpu.memory_space<vmem>>, vector<48x1xf32>,
    %c0_i32_29 = arith.constant 0 : i32
    %49 = arith.cmpi eq, %arg1, %c0_i32_29 : i32
    %50 = arith.extui %49 : i1 to i32
    %c0_i32_30 = arith.constant 0 : i32
    %51 = arith.cmpi ne, %50, %c0_i32_30 : i32
    scf.if %51 {
      %c-100_i32 = arith.constant -100 : i32
      %52 = vector.broadcast %c-100_i32 : i32 to vector<48x1xi32>
      %53 = arith.cmpi ne, %13, %52 : vector<48x1xi32>
      %c0_31 = arith.constant 0 : index
      %c0_32 = arith.constant 0 : index
      %54 = vector.load %arg7[%c0_31, %c0_32] : memref<48x1xf32, #tpu.memory_space<vmem>>, vector<48x1xf32>
      %c0_33 = arith.constant 0 : index
      %c0_34 = arith.constant 0 : index
      %55 = vector.load %arg8[%c0_33, %c0_34] : memref<48x1xf32, #tpu.memory_space<vmem>>, vector<48x1xf32>
      %56 = math.log %55 : vector<48x1xf32>
      %57 = arith.addf %54, %56 : vector<48x1xf32>
      %c0_35 = arith.constant 0 : index
      %c0_36 = arith.constant 0 : index
      %58 = vector.load %arg9[%c0_35, %c0_36] : memref<48x1xf32, #tpu.memory_space<vmem>>, vector<48x1xf32>
      %59 = arith.subf %57, %58 : vector<48x1xf32>
      %cst_37 = arith.constant 0.000000e+00 : f32
      %60 = vector.broadcast %cst_37 : f32 to vector<48x1xf32>
      %61 = arith.select %53, %59, %60 : vector<48x1xi1>, vector<48x1xf32>
      %62 = tpu.iota {dimensions = array<i32: 1>} : vector<48x128xi32>
      %c0_i32_38 = arith.constant 0 : i32
      %63 = vector.broadcast %c0_i32_38 : i32 to vector<48x128xi32>
      %64 = arith.cmpi eq, %62, %63 : vector<48x128xi32>
      %c1_i32 = arith.constant 1 : i32
      %65 = vector.broadcast %c1_i32 : i32 to vector<48x128xi32>
      %66 = arith.cmpi eq, %62, %65 : vector<48x128xi32>
      %c0_39 = arith.constant 0 : index
      %c0_40 = arith.constant 0 : index
      %67 = vector.load %arg10[%c0_39, %c0_40] : memref<48x1xi32, #tpu.memory_space<vmem>>, vector<48x1xi32>
      %68 = arith.sitofp %67 : vector<48x1xi32> to vector<48x1xf32>
      %c2_i32 = arith.constant 2 : i32
      %69 = vector.broadcast %c2_i32 : i32 to vector<48x128xi32>
      %70 = arith.cmpi eq, %62, %69 : vector<48x128xi32>
      %71 = arith.extui %53 : vector<48x1xi1> to vector<48x1xi32>
      %72 = arith.sitofp %71 : vector<48x1xi32> to vector<48x1xf32>
      %cst_41 = arith.constant 0.000000e+00 : f32
      %73 = vector.shape_cast %72 : vector<48x1xf32> to vector<48x1xf32>
      %74 = vector.broadcast %73 : vector<48x1xf32> to vector<48x128xf32>
      %75 = vector.broadcast %cst_41 : f32 to vector<48x128xf32>
      %76 = arith.select %70, %74, %75 : vector<48x128xi1>, vector<48x128xf32>
      %77 = vector.shape_cast %68 : vector<48x1xf32> to vector<48x1xf32>
      %78 = vector.broadcast %77 : vector<48x1xf32> to vector<48x128xf32>
      %79 = arith.select %66, %78, %76 : vector<48x128xi1>, vector<48x128xf32>
      %80 = vector.shape_cast %61 : vector<48x1xf32> to vector<48x1xf32>
      %81 = vector.broadcast %80 : vector<48x1xf32> to vector<48x128xf32>
      %82 = arith.select %64, %81, %79 : vector<48x128xi1>, vector<48x128xf32>
      %c0_42 = arith.constant 0 : index
      %c0_43 = arith.constant 0 : index
      %83 = vector.load %arg6[%c0_42, %c0_43] : memref<48x128xf32, #tpu.memory_space<vmem>>, vector<48x128xf32>
      tpu.vector_store %arg6[%c0_42, %c0_43], %82 {strides = array<i32>} : memref<48x128xf32, #tpu.memory_space<vmem>>, vector<48x128xf32>,
    } else {
    }
    return
  }
  func.func @transform_0(%arg0: i32, %arg1: i32) -> (i32, i32) {
    %c0_i32 = arith.constant 0 : i32
    %c0_i32_0 = arith.constant 0 : i32
    return %arg0, %c0_i32 : i32, i32
  }
  func.func @transform_1(%arg0: i32, %arg1: i32) -> (i32, i32) {
    %c0_i32 = arith.constant 0 : i32
    %c0_i32_0 = arith.constant 0 : i32
    return %c0_i32, %arg1 : i32, i32
  }
  func.func @transform_2(%arg0: i32, %arg1: i32) -> (i32, i32) {
    %c0_i32 = arith.constant 0 : i32
    %c0_i32_0 = arith.constant 0 : i32
    return %c0_i32, %arg1 : i32, i32
  }
  func.func @transform_3(%arg0: i32, %arg1: i32) -> (i32, i32) {
    %c0_i32 = arith.constant 0 : i32
    %c0_i32_0 = arith.constant 0 : i32
    return %arg0, %c0_i32 : i32, i32
  }
  func.func @transform_4(%arg0: i32, %arg1: i32) -> (i32, i32) {
    %c0_i32 = arith.constant 0 : i32
    %c0_i32_0 = arith.constant 0 : i32
    return %arg0, %c0_i32 : i32, i32
  }
}

</mosaic_0001>

<bundles_post_ra>
// kernel: llmasr2_forward.3
= control target key start
LH: loop header
LB: loop body
LE: loop exit
PB: predicated region body
PF: predicated region fallthrough
CT: control target
= control target key end

     0   :  { %s503_s1 = inlined_call_operand.vmem [shape: bf16[128,128], index: 1, kind: input, shape index: {}]   ;;  %s504_s0 = inlined_call_operand.vmem [shape: bf16[32,128], index: 0, kind: input, shape index: {}]   ;;  %s505_s3 = inlined_call_operand.vmem [shape: bf16[128,128], index: 3, kind: input, shape index: {}]   ;;  %s506_s2 = inlined_call_operand.vmem [shape: f32[1,128], index: 2, kind: input, shape index: {}]   ;;  %s507_s4 = inlined_call_operand.vmem [shape: f32[1,128], index: 4, kind: input, shape index: {}]   ;;  %s508_s5 = inlined_call_operand.vmem [shape: f32[32,128], index: 5, kind: output, shape index: {}]  }
   0x1   :  { %v383_v0 = vld [vmem:[%s503_s1] sm:$0xff]   ;;  %v384_v1 = vld [vmem:[%s503_s1 + $0x8] sm:$0xff]   ;;  %v385_v2 = vld [vmem:[%s503_s1 + $0x10] sm:$0xff]  }
   0x2   :  { %343 = vmatprep.subr.bf16.mxu0 %v383_v0  ;;  %v386_v3 = vld [vmem:[%s503_s1 + $0x18] sm:$0xff]   ;;  %v391_v4 = vld [vmem:[%s504_s0] sm:$0xff]   ;;  %v394_v6 = vld [vmem:[%s505_s3 + $0x8] sm:$0xff]  }
   0x3   :  { %344 = vmatpush3.bf16.msra.mxu0 %v383_v0  ;;  %359 = vmatprep.mubr.bf16.mxu0 %v391_v4  ;;  %v393_v5 = vld [vmem:[%s505_s3] sm:$0xff]   ;;  %v395_v8 = vld [vmem:[%s505_s3 + $0x10] sm:$0xff]   ;;  %v388_v9 = vld [vmem:[%s503_s1 + $0x28] sm:$0xff]  }
   0x4   :  { %345 = vmatprep.subr.bf16.mxu0 %v384_v1  ;;  %v387_v7 = vld [vmem:[%s503_s1 + $0x20] sm:$0xff]   ;;  %363 = vmatprep.subr.bf16.mxu1 %v393_v5  ;;  %v396_v10 = vld [vmem:[%s505_s3 + $0x18] sm:$0xff]   ;;  %v389_v11 = vld [vmem:[%s503_s1 + $0x30] sm:$0xff]  }
   0x5   :  { %364 = vmatpush3.bf16.msra.mxu1 %v393_v5  ;;  %v397_v12 = vld [vmem:[%s505_s3 + $0x20] sm:$0xff]   ;;  %v390_v13 = vld [vmem:[%s503_s1 + $0x38] sm:$0xff]   ;;  %v398_v14 = vld [vmem:[%s505_s3 + $0x28] sm:$0xff]  }
   0x6   :  { %365 = vmatprep.subr.bf16.mxu1 %v394_v6  ;;  %v392_v15 = vld [vmem:[%s504_s0 + $0x8] sm:$0xff]   ;;  %v399_v16 = vld [vmem:[%s505_s3 + $0x30] sm:$0xff]   ;;  %v400_v17 = vld [vmem:[%s505_s3 + $0x38] sm:$0xff]  }
   0x7   :  { %346 = vmatpush3.bf16.msra.mxu0 %v384_v1  ;;  %v303_v18 = vld [vmem:[%s506_s2] ss:$0 sm:$0xff] }
   0x8   :  { %347 = vmatprep.subr.bf16.mxu0 %v385_v2  ;;  %v314_v33 = vld [vmem:[%s507_s4] ss:$0 sm:$0xff] }
   0x9   :  { %366 = vmatpush3.bf16.msra.mxu1 %v394_v6 }
   0xa   :  { %367 = vmatprep.subr.bf16.mxu1 %v395_v8 }
   0xb   :  { %348 = vmatpush3.bf16.msra.mxu0 %v385_v2 }
   0xc   :  { %349 = vmatprep.subr.bf16.mxu0 %v386_v3 }
   0xd   :  { %368 = vmatpush3.bf16.msra.mxu1 %v395_v8 }
   0xe   :  { %369 = vmatprep.subr.bf16.mxu1 %v396_v10 }
   0xf   :  { %350 = vmatpush3.bf16.msra.mxu0 %v386_v3 }
  0x10   :  { %351 = vmatprep.subr.bf16.mxu0 %v387_v7 }
  0x11   :  { %370 = vmatpush3.bf16.msra.mxu1 %v396_v10 }
  0x12   :  { %371 = vmatprep.subr.bf16.mxu1 %v397_v12 }
  0x13   :  { %352 = vmatpush3.bf16.msra.mxu0 %v387_v7 }
  0x14   :  { %353 = vmatprep.subr.bf16.mxu0 %v388_v9 }
  0x15   :  { %372 = vmatpush3.bf16.msra.mxu1 %v397_v12 }
  0x16   :  { %373 = vmatprep.subr.bf16.mxu1 %v398_v14 }
  0x17   :  { %354 = vmatpush3.bf16.msra.mxu0 %v388_v9 }
  0x18   :  { %355 = vmatprep.subr.bf16.mxu0 %v389_v11 }
  0x19   :  { %374 = vmatpush3.bf16.msra.mxu1 %v398_v14 }
  0x1a   :  { %375 = vmatprep.subr.bf16.mxu1 %v399_v16 }
  0x1b   :  { %356 = vmatpush3.bf16.msra.mxu0 %v389_v11 }
  0x1c   :  { %357 = vmatprep.subr.bf16.mxu0 %v390_v13 }
  0x1d   :  { %376 = vmatpush3.bf16.msra.mxu1 %v399_v16 }
  0x1e   :  { %377 = vmatprep.subr.bf16.mxu1 %v400_v17 }
  0x1f   :  { %358 = vmatpush3.bf16.msra.mxu0 %v390_v13 }
  0x21   :  { %378 = vmatpush3.bf16.msra.mxu1 %v400_v17 }
  0x22   :  { %360 = vmatmul.mubr.bf16.vlgmr.msra.gmra.mrb[0].mxu0 %v392_v15 }
  0xf5   :  { %v361_v19 = vpop.f32.mrb[0].mxu0 }
  0xf6   :  { %v155_v20 = vadd.f32 %v361_v19, %v303_v18  ;;  %v146_v21 = vpop.f32.mrb[1].mxu0 }
  0xf7   :  { %v147_v22 = vadd.f32 %v303_v18, %v146_v21  ;;  %v362_v23 = vpop.f32.mrb[2].mxu0 }
  0xf8   :  { %v158_v24 = vadd.f32 %v362_v23, %v303_v18  ;;  %v149_v25 = vpop.f32.mrb[3].mxu0  ;;  %v163_v27 = vmax.f32 %v155_v20, 0.0 }
  0xf9   :  { %v150_v26 = vadd.f32 %v303_v18, %v149_v25  ;;  %v161_v29 = vmax.f32 %v147_v22, 0.0 }
  0xfa   :  { %v164_v28 = vmax.f32 %v158_v24, 0.0 }
  0xfb   :  { %v162_v30 = vmax.f32 %v150_v26, 0.0 }
  0xfc   :  { %v166_v31 = vpack.c.bf16 %v164_v28, %v163_v27 }
  0xfd   :  { %v165_v32 = vpack.c.bf16 %v162_v30, %v161_v29 }
  0xff   :  { %379 = vmatprep.mubr.bf16.mxu1 %v165_v32 }
 0x100   :  { %380 = vmatmul.mubr.bf16.vlgmr.msra.gmra.mrb[0].mxu1 %v166_v31 }
 0x1d3   :  { %v381_v34 = vpop.f32.mrb[0].mxu1 }
 0x1d4   :  { %v285_v35 = vadd.f32 %v381_v34, %v314_v33  ;;  %v276_v36 = vpop.f32.mrb[1].mxu1 }
 0x1d5   :  { %v277_v37 = vadd.f32 %v314_v33, %v276_v36  ;;  %v382_v38 = vpop.f32.mrb[2].mxu1 }
 0x1d6   :  { %v293_v39 = vmax.f32 %v285_v35, 0.0  ;;  %v288_v40 = vadd.f32 %v382_v38, %v314_v33  ;;  %v279_v41 = vpop.f32.mrb[3].mxu1 }
 0x1d7   :  { %v291_v42 = vmax.f32 %v277_v37, 0.0  ;;  %v280_v43 = vadd.f32 %v314_v33, %v279_v41 }
 0x1d8   :  { %297 = vst [vmem:[%s508_s5 + $0x10] sm:$0xff] %v293_v39  ;;  %v294_v44 = vmax.f32 %v288_v40, 0.0 }
 0x1d9   :  { %295 = vst [vmem:[%s508_s5] sm:$0xff] %v291_v42  ;;  %v292_v45 = vmax.f32 %v280_v43, 0.0 }
 0x1da   :  { %298 = vst [vmem:[%s508_s5 + $0x18] sm:$0xff] %v294_v44 }
 0x1db   :  { %296 = vst [vmem:[%s508_s5 + $0x8] sm:$0xff] %v292_v45 }

// kernel: llmasr2_forward.4
= control target key start
LH: loop header
LB: loop body
LE: loop exit
PB: predicated region body
PF: predicated region fallthrough
CT: control target
= control target key end

     0   :  { %v781_v1 = vmov 0   ;;  %v55_v36 = vlaneseq  ;;  %s1047_s1 = inlined_call_operand.vmem [shape: bf16[128,256], index: 1, kind: input, shape index: {}]   ;;  %s1048_s0 = inlined_call_operand.vmem [shape: bf16[48,128], index: 0, kind: input, shape index: {}]   ;;  %s1049_s3 = inlined_call_operand.vmem [shape: bf16[256,128], index: 3, kind: input, shape index: {}]   ;;  %s1050_s2 = inlined_call_operand.vmem [shape: f32[1,256], index: 2, kind: input, shape index: {}]   ;;  %s1051_s4 = inlined_call_operand.vmem [shape: f32[1,128], index: 4, kind: input, shape index: {}]   ;;  %s1052_s5 = inlined_call_operand.vmem [shape: bf16[48,128], index: 5, kind: output, shape index: {}]  }
   0x1   :  { %v711_v0 = vld [vmem:[%s1047_s1 + $0x4] ss:$8 sps:$4 sm:$0xff]   ;;  %195 = vmatprep.mubr.bf16.mxu0 %v781_v1  ;;  %v713_v2 = vld [vmem:[%s1047_s1] ss:$8 sps:$4 sm:$0xff]   ;;  %v714_v3 = vld [vmem:[%s1047_s1 + $0x14] ss:$8 sps:$4 sm:$0xff]  }
   0x2   :  { %163 = vmatprep.subr.bf16.mxu0 %v711_v0  ;;  %v716_v4 = vld [vmem:[%s1047_s1 + $0x10] ss:$8 sps:$4 sm:$0xff]   ;;  %v717_v5 = vld [vmem:[%s1047_s1 + $0x24] ss:$8 sps:$4 sm:$0xff]   ;;  %v719_v6 = vld [vmem:[%s1047_s1 + $0x20] ss:$8 sps:$4 sm:$0xff]  }
   0x3   :  { %164 = vmatpush1.bf16.msra.mxu0 %v713_v2  ;;  %v720_v7 = vld [vmem:[%s1047_s1 + $0x34] ss:$8 sps:$4 sm:$0xff]   ;;  %v722_v8 = vld [vmem:[%s1047_s1 + $0x30] ss:$8 sps:$4 sm:$0xff]   ;;  %v723_v9 = vld [vmem:[%s1047_s1 + $0x44] ss:$8 sps:$4 sm:$0xff]  }
   0x4   :  { %165 = vmatprep.subr.bf16.mxu0 %v714_v3  ;;  %v725_v10 = vld [vmem:[%s1047_s1 + $0x40] ss:$8 sps:$4 sm:$0xff]   ;;  %v726_v11 = vld [vmem:[%s1047_s1 + $0x54] ss:$8 sps:$4 sm:$0xff]   ;;  %v728_v12 = vld [vmem:[%s1047_s1 + $0x50] ss:$8 sps:$4 sm:$0xff]  }
   0x5   :  { %v729_v13 = vld [vmem:[%s1047_s1 + $0x64] ss:$8 sps:$4 sm:$0xff]   ;;  %v731_v14 = vld [vmem:[%s1047_s1 + $0x60] ss:$8 sps:$4 sm:$0xff]   ;;  %v732_v15 = vld [vmem:[%s1047_s1 + $0x74] ss:$8 sps:$4 sm:$0xff]  }
   0x6   :  { %v734_v16 = vld [vmem:[%s1047_s1 + $0x70] ss:$8 sps:$4 sm:$0xff]   ;;  %v863_v17 = vld [vmem:[%s1048_s0] sm:$0xff]   ;;  %v869_v18 = vld [vmem:[%s1048_s0 + $0x8] sm:$0xff]   ;;  %v56_v37 = vshrl.u32 %v55_v36, 7 }
   0x7   :  { %166 = vmatpush1.bf16.msra.mxu0 %v716_v4  ;;  %v875_v19 = vld [vmem:[%s1048_s0 + $0x10] sm:$0xff]   ;;  %v738_v20 = vld [vmem:[%s1049_s3 + $0x40] sm:$0xff]   ;;  %v740_v22 = vld [vmem:[%s1049_s3 + $0x48] sm:$0xff]  }
   0x8   :  { %167 = vmatprep.subr.bf16.mxu0 %v717_v5  ;;  %v739_v21 = vld [vmem:[%s1049_s3] sm:$0xff]   ;;  %676 = vmatprep.subr.bf16.mxu1 %v738_v20  ;;  %v741_v23 = vld [vmem:[%s1049_s3 + $0x8] sm:$0xff]   ;;  %v742_v24 = vld [vmem:[%s1049_s3 + $0x50] sm:$0xff]   ;;  %v57_v38 = vsub.s32 0, %v56_v37  ;;  %v61_v40 = vsub.s32 1, %v56_v37 }
   0x9   :  { %677 = vmatpush3.bf16.msra.mxu1 %v739_v21  ;;  %v743_v25 = vld [vmem:[%s1049_s3 + $0x10] sm:$0xff]   ;;  %v744_v26 = vld [vmem:[%s1049_s3 + $0x58] sm:$0xff]   ;;  %v746_v28 = vld [vmem:[%s1049_s3 + $0x60] sm:$0xff]  }
   0xa   :  { %678 = vmatprep.subr.bf16.mxu1 %v740_v22  ;;  %v745_v27 = vld [vmem:[%s1049_s3 + $0x18] sm:$0xff]   ;;  %v747_v29 = vld [vmem:[%s1049_s3 + $0x20] sm:$0xff]   ;;  %v748_v30 = vld [vmem:[%s1049_s3 + $0x68] sm:$0xff]  }
   0xb   :  { %168 = vmatpush1.bf16.msra.mxu0 %v719_v6  ;;  %v749_v31 = vld [vmem:[%s1049_s3 + $0x28] sm:$0xff]   ;;  %v750_v32 = vld [vmem:[%s1049_s3 + $0x70] sm:$0xff]   ;;  %v752_v34 = vld [vmem:[%s1049_s3 + $0x78] sm:$0xff]  }
   0xc   :  { %169 = vmatprep.subr.bf16.mxu0 %v720_v7  ;;  %v751_v33 = vld [vmem:[%s1049_s3 + $0x30] sm:$0xff]   ;;  %v753_v35 = vld [vmem:[%s1049_s3 + $0x38] sm:$0xff]   ;;  %v53_v39 = vld [vmem:[%s1050_s2] sm:$0x3] }
   0xd   :  { %679 = vmatpush3.bf16.msra.mxu1 %v741_v23  ;;  %v929_v41 = vrot.slane %v53_v39, %v57_v38  ;;  %v931_v42 = vrot.slane %v53_v39, %v61_v40 }
   0xe   :  { %680 = vmatprep.subr.bf16.mxu1 %v742_v24 }
   0xf   :  { %170 = vmatpush1.bf16.msra.mxu0 %v722_v8 }
  0x10   :  { %171 = vmatprep.subr.bf16.mxu0 %v723_v9 }
  0x11   :  { %681 = vmatpush3.bf16.msra.mxu1 %v743_v25 }
  0x12   :  { %682 = vmatprep.subr.bf16.mxu1 %v744_v26 }
  0x13   :  { %172 = vmatpush1.bf16.msra.mxu0 %v725_v10 }
  0x14   :  { %173 = vmatprep.subr.bf16.mxu0 %v726_v11 }
  0x15   :  { %683 = vmatpush3.bf16.msra.mxu1 %v745_v27 }
  0x16   :  { %684 = vmatprep.subr.bf16.mxu1 %v746_v28 }
  0x17   :  { %174 = vmatpush1.bf16.msra.mxu0 %v728_v12 }
  0x18   :  { %175 = vmatprep.subr.bf16.mxu0 %v729_v13 }
  0x19   :  { %685 = vmatpush3.bf16.msra.mxu1 %v747_v29 }
  0x1a   :  { %686 = vmatprep.subr.bf16.mxu1 %v748_v30 }
  0x1b   :  { %176 = vmatpush1.bf16.msra.mxu0 %v731_v14 }
  0x1c   :  { %177 = vmatprep.subr.bf16.mxu0 %v732_v15 }
  0x1d   :  { %687 = vmatpush3.bf16.msra.mxu1 %v749_v31 }
  0x1e   :  { %688 = vmatprep.subr.bf16.mxu1 %v750_v32 }
  0x1f   :  { %178 = vmatpush1.bf16.msra.mxu0 %v734_v16 }
  0x21   :  { %689 = vmatpush3.bf16.msra.mxu1 %v751_v33 }
  0x22   :  { %196 = vmatmul.mubr.bf16.vlgmr.msra.gmra.mrb[0].mxu0 %v863_v17  ;;  %690 = vmatprep.subr.bf16.mxu1 %v752_v34 }
  0x23   :  { %205 = vmatprep.mubr.bf16.mxu0 %v781_v1 }
  0x25   :  { %691 = vmatpush3.bf16.msra.mxu1 %v753_v35 }
  0x2a   :  { %206 = vmatmul.mubr.bf16.gmra.mrb[4].mxu0 %v869_v18 }
  0x2b   :  { %215 = vmatprep.mubr.bf16.mxu0 %v781_v1 }
  0x32   :  { %216 = vmatmul.mubr.bf16.gmra.mrb[8].mxu0 %v875_v19 }
  0xf5   :  { %v197_v43 = vpop.f32.mrb[0].mxu0 }
  0xf6   :  { %v934_v44 = vadd.f32 %v197_v43, %v929_v41  ;;  %v199_v45 = vpop.f32.mrb[1].mxu0 }
  0xf7   :  { %v937_v46 = vadd.f32 %v199_v45, %v931_v42  ;;  %v201_v47 = vpop.f32.mrb[2].mxu0 }
  0xf8   :  { %v226_v48 = vmul.f32 %v934_v44, %v934_v44  ;;  %v942_v49 = vadd.f32 %v201_v47, %v929_v41  ;;  %v203_v50 = vpop.f32.mrb[3].mxu0 }
  0xf9   :  { %v227_v51 = vmul.f32 %v937_v46, %v937_v46  ;;  %v947_v52 = vadd.f32 %v203_v50, %v931_v42 }
  0xfa   :  { %v238_v53 = vmul.f32 %v226_v48, %v934_v44  ;;  %v228_v54 = vmul.f32 %v942_v49, %v942_v49 }
  0xfb   :  { %v239_v55 = vmul.f32 %v227_v51, %v937_v46  ;;  %v229_v56 = vmul.f32 %v947_v52, %v947_v52 }
  0xfc   :  { %v250_v57 = vmul.f32 0.044715, %v238_v53  ;;  %v240_v58 = vmul.f32 %v228_v54, %v942_v49 }
  0xfd   :  { %v251_v59 = vmul.f32 0.044715, %v239_v55  ;;  %v241_v60 = vmul.f32 %v229_v56, %v947_v52  ;;  %v207_v61 = vpop.f32.mrb[4].mxu0 }
  0xfe   :  { %v262_v62 = vadd.f32 %v250_v57, %v934_v44  ;;  %v252_v63 = vmul.f32 0.044715, %v240_v58  ;;  %v959_v0 = vadd.f32 %v207_v61, %v929_v41  ;;  %v209_v1 = vpop.f32.mrb[5].mxu0 }
  0xff   :  { %v253_v2 = vmul.f32 0.044715, %v241_v60  ;;  %v962_v3 = vadd.f32 %v209_v1, %v931_v42  ;;  %v211_v4 = vpop.f32.mrb[6].mxu0  ;;  %v263_v5 = vadd.f32 %v251_v59, %v937_v46 }
 0x100   :  { %v274_v6 = vmul.f32 0.7978846, %v262_v62  ;;  %v264_v7 = vadd.f32 %v252_v63, %v942_v49  ;;  %v230_v8 = vmul.f32 %v959_v0, %v959_v0  ;;  %v969_v9 = vadd.f32 %v211_v4, %v929_v41  ;;  %v213_v10 = vpop.f32.mrb[7].mxu0 }
 0x101   :  { %v231_v11 = vmul.f32 %v962_v3, %v962_v3  ;;  %v974_v12 = vadd.f32 %v213_v10, %v931_v42  ;;  %v265_v13 = vadd.f32 %v253_v2, %v947_v52  ;;  %v275_v14 = vmul.f32 0.7978846, %v263_v5 }
 0x102   :  { %757 = vtanh.f32 %v274_v6  ;;  %v276_v15 = vmul.f32 0.7978846, %v264_v7  ;;  %v242_v16 = vmul.f32 %v230_v8, %v959_v0  ;;  %v232_v20 = vmul.f32 %v969_v9, %v969_v9 }
 0x103   :  { %v243_v21 = vmul.f32 %v231_v11, %v962_v3  ;;  %v233_v22 = vmul.f32 %v974_v12, %v974_v12  ;;  %v277_v23 = vmul.f32 0.7978846, %v265_v13  ;;  %759 = vtanh.f32 %v275_v14 }
 0x104   :  { %761 = vtanh.f32 %v276_v15  ;;  %v254_v24 = vmul.f32 0.044715, %v242_v16  ;;  %v244_v25 = vmul.f32 %v232_v20, %v969_v9 }
 0x105   :  { %v255_v26 = vmul.f32 0.044715, %v243_v21  ;;  %v245_v27 = vmul.f32 %v233_v22, %v974_v12  ;;  %v217_v28 = vpop.f32.mrb[8].mxu0  ;;  %763 = vtanh.f32 %v277_v23 }
 0x106   :  { %v266_v29 = vadd.f32 %v254_v24, %v959_v0  ;;  %v256_v30 = vmul.f32 0.044715, %v244_v25  ;;  %v987_v31 = vadd.f32 %v217_v28, %v929_v41  ;;  %v219_v32 = vpop.f32.mrb[9].mxu0 }
 0x107   :  { %v267_v33 = vadd.f32 %v255_v26, %v962_v3  ;;  %v257_v34 = vmul.f32 0.044715, %v245_v27  ;;  %v991_v35 = vadd.f32 %v219_v32, %v931_v42  ;;  %v221_v36 = vpop.f32.mrb[10].mxu0 }
 0x108   :  { %v278_v37 = vmul.f32 0.7978846, %v266_v29  ;;  %v268_v38 = vadd.f32 %v256_v30, %v969_v9  ;;  %v234_v39 = vmul.f32 %v987_v31, %v987_v31  ;;  %v997_v40 = vadd.f32 %v221_v36, %v929_v41  ;;  %v223_v43 = vpop.f32.mrb[11].mxu0 }
 0x109   :  { %v279_v45 = vmul.f32 0.7978846, %v267_v33  ;;  %v269_v47 = vadd.f32 %v257_v34, %v974_v12  ;;  %v235_v48 = vmul.f32 %v991_v35, %v991_v35  ;;  %v1003_v50 = vadd.f32 %v223_v43, %v931_v42 }
 0x10a   :  { %765 = vtanh.f32 %v278_v37  ;;  %v280_v51 = vmul.f32 0.7978846, %v268_v38  ;;  %v246_v53 = vmul.f32 %v234_v39, %v987_v31  ;;  %v236_v54 = vmul.f32 %v997_v40, %v997_v40 }
 0x10b   :  { %767 = vtanh.f32 %v279_v45  ;;  %v281_v41 = vmul.f32 0.7978846, %v269_v47  ;;  %v247_v55 = vmul.f32 %v235_v48, %v991_v35  ;;  %v237_v56 = vmul.f32 %v1003_v50, %v1003_v50 }
 0x10c   :  { %v758_v57 = vpop.eup %757  ;;  %769 = vtanh.f32 %v280_v51  ;;  %v258_v58 = vmul.f32 0.044715, %v246_v53  ;;  %v248_v42 = vmul.f32 %v236_v54, %v997_v40 }
 0x10d   :  { %v760_v59 = vpop.eup %759  ;;  %771 = vtanh.f32 %v281_v41  ;;  %v259_v60 = vmul.f32 0.044715, %v247_v55  ;;  %v249_v61 = vmul.f32 %v237_v56, %v1003_v50  ;;  %v298_v62 = vadd.f32 1.0, %v758_v57 }
 0x10e   :  { %v762_v63 = vpop.eup %761  ;;  %v270_v1 = vadd.f32 %v258_v58, %v987_v31  ;;  %v260_v2 = vmul.f32 0.044715, %v248_v42  ;;  %v299_v4 = vadd.f32 1.0, %v760_v59 }
 0x10f   :  { %v764_v5 = vpop.eup %763  ;;  %v271_v6 = vadd.f32 %v259_v60, %v991_v35  ;;  %v261_v7 = vmul.f32 0.044715, %v249_v61  ;;  %v300_v8 = vadd.f32 1.0, %v762_v63  ;;  %v310_v10 = vmul.f32 0.5, %v298_v62 }
 0x110   :  { %v282_v11 = vmul.f32 0.7978846, %v270_v1  ;;  %v272_v13 = vadd.f32 %v260_v2, %v997_v40  ;;  %v301_v14 = vadd.f32 1.0, %v764_v5  ;;  %v311_v15 = vmul.f32 0.5, %v299_v4 }
 0x111   :  { %v283_v16 = vmul.f32 0.7978846, %v271_v6  ;;  %v273_v20 = vadd.f32 %v261_v7, %v1003_v50  ;;  %v312_v21 = vmul.f32 0.5, %v300_v8  ;;  %v322_v25 = vmul.f32 %v310_v10, %v934_v44 }
 0x112   :  { %773 = vtanh.f32 %v282_v11  ;;  %v284_v22 = vmul.f32 0.7978846, %v272_v13  ;;  %v313_v23 = vmul.f32 0.5, %v301_v14  ;;  %v323_v28 = vmul.f32 %v311_v15, %v937_v46 }
 0x113   :  { %775 = vtanh.f32 %v283_v16  ;;  %v285_v24 = vmul.f32 0.7978846, %v273_v20  ;;  %v324_v26 = vmul.f32 %v312_v21, %v942_v49  ;;  %v546_v6 = vunpack.c.l.bf16 %v863_v17 }
 0x114   :  { %v766_v27 = vpop.eup %765  ;;  %777 = vtanh.f32 %v284_v22  ;;  %v325_v29 = vmul.f32 %v313_v23, %v947_v52  ;;  %v547_v11 = vunpack.c.h.bf16 %v863_v17  ;;  %v548_v20 = vunpack.c.l.bf16 %v869_v18 }
 0x115   :  { %v768_v30 = vpop.eup %767  ;;  %779 = vtanh.f32 %v285_v24  ;;  %v340_v32 = vpack.c.bf16 %v324_v26, %v322_v25  ;;  %v302_v33 = vadd.f32 1.0, %v766_v27  ;;  %v549_v25 = vunpack.c.h.bf16 %v869_v18 }
 0x116   :  { %v770_v34 = vpop.eup %769  ;;  %v341_v36 = vpack.c.bf16 %v325_v29, %v323_v28  ;;  %v303_v37 = vadd.f32 1.0, %v768_v30 }
 0x117   :  { %v772_v38 = vpop.eup %771  ;;  %v304_v39 = vadd.f32 1.0, %v770_v34  ;;  %v314_v43 = vmul.f32 0.5, %v302_v33  ;;  %v550_v33 = vunpack.c.l.bf16 %v875_v19 }
 0x118   :  { %506 = vmatprep.mubr.bf16.mxu1 %v341_v36  ;;  %v305_v44 = vadd.f32 1.0, %v772_v38  ;;  %v315_v45 = vmul.f32 0.5, %v303_v37 }
 0x119   :  { %507 = vmatmul.mubr.bf16.vlgmr.msra.gmra.mrb[0].mxu1 %v340_v32  ;;  %v316_v49 = vmul.f32 0.5, %v304_v39  ;;  %v326_v46 = vmul.f32 %v314_v43, %v959_v0  ;;  %v551_v39 = vunpack.c.h.bf16 %v875_v19 }
 0x11a   :  { %v317_v47 = vmul.f32 0.5, %v305_v44  ;;  %v327_v51 = vmul.f32 %v315_v45, %v962_v3 }
 0x11b   :  { %v328_v52 = vmul.f32 %v316_v49, %v969_v9 }
 0x11c   :  { %v774_v48 = vpop.eup %773  ;;  %v329_v53 = vmul.f32 %v317_v47, %v974_v12 }
 0x11d   :  { %v776_v54 = vpop.eup %775  ;;  %v342_v41 = vpack.c.bf16 %v328_v52, %v326_v46  ;;  %v306_v55 = vadd.f32 1.0, %v774_v48 }
 0x11e   :  { %v778_v56 = vpop.eup %777  ;;  %v343_v57 = vpack.c.bf16 %v329_v53, %v327_v51  ;;  %v307_v58 = vadd.f32 1.0, %v776_v54 }
 0x11f   :  { %v780_v42 = vpop.eup %779  ;;  %v308_v59 = vadd.f32 1.0, %v778_v56  ;;  %v318_v60 = vmul.f32 0.5, %v306_v55 }
 0x120   :  { %514 = vmatprep.mubr.bf16.mxu1 %v343_v57  ;;  %v309_v61 = vadd.f32 1.0, %v780_v42  ;;  %v319_v62 = vmul.f32 0.5, %v307_v58 }
 0x121   :  { %515 = vmatmul.mubr.bf16.gmra.mrb[4].mxu1 %v342_v41  ;;  %v320_v0 = vmul.f32 0.5, %v308_v59  ;;  %v330_v63 = vmul.f32 %v318_v60, %v987_v31 }
 0x122   :  { %v321_v9 = vmul.f32 0.5, %v309_v61  ;;  %v331_v12 = vmul.f32 %v319_v62, %v991_v35  ;;  %v646_v35 = vld [vmem:[%s1051_s4] ss:$0 sm:$0xff] }
 0x123   :  { %v332_v3 = vmul.f32 %v320_v0, %v997_v40 }
 0x124   :  { %v333_v1 = vmul.f32 %v321_v9, %v1003_v50 }
 0x125   :  { %v344_v2 = vpack.c.bf16 %v332_v3, %v330_v63 }
 0x126   :  { %v345_v4 = vpack.c.bf16 %v333_v1, %v331_v12 }
 0x128   :  { %522 = vmatprep.mubr.bf16.mxu1 %v345_v4 }
 0x129   :  { %523 = vmatmul.mubr.bf16.gmra.mrb[8].mxu1 %v344_v2 }
 0x1ec   :  { %v692_v5 = vpop.f32.mrb[0].mxu1 }
 0x1ed   :  { %v693_v7 = vpop.f32.mrb[1].mxu1 }
 0x1ee   :  { %v694_v8 = vadd.f32 %v693_v7, %v692_v5  ;;  %v695_v10 = vpop.f32.mrb[2].mxu1 }
 0x1ef   :  { %v696_v13 = vpop.f32.mrb[3].mxu1 }
 0x1f0   :  { %v558_v31 = vadd.f32 %v694_v8, %v546_v6  ;;  %v697_v14 = vadd.f32 %v696_v13, %v695_v10 }
 0x1f2   :  { %v559_v40 = vadd.f32 %v697_v14, %v547_v11  ;;  %v571_v50 = vadd.f32 %v646_v35, %v558_v31 }
 0x1f4   :  { %v572_v15 = vadd.f32 %v646_v35, %v559_v40  ;;  %v698_v16 = vpop.f32.mrb[4].mxu1 }
 0x1f5   :  { %v699_v21 = vpop.f32.mrb[5].mxu1 }
 0x1f6   :  { %v662_v22 = vpack.c.bf16 %v572_v15, %v571_v50  ;;  %v700_v23 = vadd.f32 %v699_v21, %v698_v16  ;;  %v701_v24 = vpop.f32.mrb[6].mxu1 }
 0x1f7   :  { %v702_v17 = vpop.f32.mrb[7].mxu1 }
 0x1f8   :  { %663 = vst [vmem:[%s1052_s5] sm:$0xff] %v662_v22   ;;  %v560_v26 = vadd.f32 %v700_v23, %v548_v20  ;;  %v703_v27 = vadd.f32 %v702_v17, %v701_v24 }
 0x1fa   :  { %v561_v28 = vadd.f32 %v703_v27, %v549_v25  ;;  %v573_v29 = vadd.f32 %v646_v35, %v560_v26 }
 0x1fc   :  { %v574_v30 = vadd.f32 %v646_v35, %v561_v28  ;;  %v704_v32 = vpop.f32.mrb[8].mxu1 }
 0x1fd   :  { %v705_v34 = vpop.f32.mrb[9].mxu1 }
 0x1fe   :  { %v667_v36 = vpack.c.bf16 %v574_v30, %v573_v29  ;;  %v706_v37 = vadd.f32 %v705_v34, %v704_v32  ;;  %v707_v38 = vpop.f32.mrb[10].mxu1 }
 0x1ff   :  { %v708_v18 = vpop.f32.mrb[11].mxu1 }
 0x200   :  { %674 = vst [vmem:[%s1052_s5 + $0x8] sm:$0xff] %v667_v36   ;;  %v562_v43 = vadd.f32 %v706_v37, %v550_v33  ;;  %v709_v44 = vadd.f32 %v708_v18, %v707_v38 }
 0x202   :  { %v563_v45 = vadd.f32 %v709_v44, %v551_v39  ;;  %v575_v49 = vadd.f32 %v646_v35, %v562_v43 }
 0x204   :  { %v576_v47 = vadd.f32 %v646_v35, %v563_v45 }
 0x206   :  { %v672_v46 = vpack.c.bf16 %v576_v47, %v575_v49 }
 0x208   :  { %675 = vst [vmem:[%s1052_s5 + $0x10] sm:$0xff] %v672_v46  }

// kernel: llmasr2_forward.5
= control target key start
LH: loop header
LB: loop body
LE: loop exit
PB: predicated region body
PF: predicated region fallthrough
CT: control target
= control target key end

     0   :  { %v2015_v3 = vmov 0   ;;  %vm22_vm0 = vcmask 7168   ;;  %s3480_s1 = inlined_call_operand.vmem [shape: bf16[128,1024], index: 1, kind: input, shape index: {}]   ;;  %s3481_s0 = inlined_call_operand.vmem [shape: bf16[48,128], index: 0, kind: input, shape index: {}]   ;;  %s3482_s2 = inlined_call_operand.vmem [shape: f32[1,1024], index: 2, kind: input, shape index: {}]   ;;  %s3483_s3 = inlined_call_operand.vmem [shape: s32[48,1], index: 3, kind: input, shape index: {}]   ;;  %s3484_s4 = inlined_call_operand.vmem [shape: f32[48,128], index: 4, kind: output, shape index: {}]  }
   0x1   :  { %v53_v0 = vld [vmem:[%s3480_s1] sm:$0xff]  ;;  %v54_v2 = vld [vmem:[%s3480_s1 + $0x8] sm:$0xff]  ;;  %529 = vmatprep.mubr.bf16.mxu0 %v2015_v3  ;;  %592 = vmatprep.mubr.bf16.mxu1 %v2015_v3  ;;  %v55_v63 = vld [vmem:[%s3480_s1 + $0x10] sm:$0xff]  ;;  %41 = vst.msk [vmem:[#allocation5] sm:$0xff] %vm22_vm0, %v2015_v3 }
   0x2   :  { %v57_v1 = vld [vmem:[%s3480_s1 + $0x20] sm:$0xff]  ;;  %v58_v6 = vld [vmem:[%s3480_s1 + $0x28] sm:$0xff]  ;;  %1869 = vset.pattern.permute.xlu1 %v2015_v3  ;;  %1870 = vset.pattern.permute.xlu0 %v2015_v3  ;;  %42 = vst.msk [vmem:[#allocation5 + $0x8] sm:$0xff] %vm22_vm0, %v2015_v3  ;;  %43 = vst.msk [vmem:[#allocation5 + $0x10] sm:$0xff] %vm22_vm0, %v2015_v3 }
   0x3   :  { %v1797_v4 = vcombine.high %v53_v0, %v57_v1  ;;  %v1796_v5 = vcombine.low %v53_v0, %v57_v1  ;;  %v61_v7 = vld [vmem:[%s3480_s1 + $0x40] sm:$0xff]  ;;  %v1799_v9 = vcombine.high %v54_v2, %v58_v6  ;;  %v1798_v10 = vcombine.low %v54_v2, %v58_v6  ;;  %v62_v12 = vld [vmem:[%s3480_s1 + $0x48] sm:$0xff]  ;;  %v59_v0 = vld [vmem:[%s3480_s1 + $0x30] sm:$0xff]  ;;  %44 = vst.msk [vmem:[#allocation5 + $0x18] sm:$0xff] %vm22_vm0, %v2015_v3 }
   0x4   :  { %v65_v8 = vld [vmem:[%s3480_s1 + $0x60] sm:$0xff]  ;;  %v66_v13 = vld [vmem:[%s3480_s1 + $0x68] sm:$0xff]  ;;  %v56_v1 = vld [vmem:[%s3480_s1 + $0x18] sm:$0xff]  ;;  %v1801_v6 = vcombine.high %v55_v63, %v59_v0  ;;  %45 = vst.msk [vmem:[#allocation5 + $0x20] sm:$0xff] %vm22_vm0, %v2015_v3 }
   0x5   :  { %v1805_v11 = vcombine.high %v61_v7, %v65_v8  ;;  %v69_v14 = vld [vmem:[%s3480_s1 + $0x80] sm:$0xff]  ;;  %497 = vmatprep.subr.bf16.mxu0 %v1797_v4  ;;  %v1807_v15 = vcombine.high %v62_v12, %v66_v13  ;;  %v70_v17 = vld [vmem:[%s3480_s1 + $0x88] sm:$0xff]  ;;  %560 = vmatprep.subr.bf16.mxu1 %v1799_v9  ;;  %v1804_v19 = vcombine.low %v61_v7, %v65_v8  ;;  %v60_v2 = vld [vmem:[%s3480_s1 + $0x38] sm:$0xff] }
   0x6   :  { %v73_v16 = vld [vmem:[%s3480_s1 + $0xa0] sm:$0xff]  ;;  %v74_v18 = vld [vmem:[%s3480_s1 + $0xa8] sm:$0xff]  ;;  %498 = vmatpush1.bf16.msra.mxu0 %v1796_v5  ;;  %561 = vmatpush1.bf16.msra.mxu1 %v1798_v10  ;;  %v1806_v20 = vcombine.low %v62_v12, %v66_v13  ;;  %v1803_v7 = vcombine.high %v56_v1, %v60_v2  ;;  %v63_v8 = vld [vmem:[%s3480_s1 + $0x50] sm:$0xff]  ;;  %v1800_v13 = vcombine.low %v55_v63, %v59_v0 }
   0x7   :  { %499 = vmatprep.subr.bf16.mxu0 %v1805_v11  ;;  %v1813_v21 = vcombine.high %v69_v14, %v73_v16  ;;  %562 = vmatprep.subr.bf16.mxu1 %v1807_v15  ;;  %v1815_v22 = vcombine.high %v70_v17, %v74_v18  ;;  %v77_v23 = vld [vmem:[%s3480_s1 + $0xc0] sm:$0xff]  ;;  %v78_v25 = vld [vmem:[%s3480_s1 + $0xc8] sm:$0xff]  ;;  %v1812_v27 = vcombine.low %v69_v14, %v73_v16  ;;  %v67_v9 = vld [vmem:[%s3480_s1 + $0x70] sm:$0xff] }
   0x8   :  { %v81_v24 = vld [vmem:[%s3480_s1 + $0xe0] sm:$0xff]  ;;  %v82_v26 = vld [vmem:[%s3480_s1 + $0xe8] sm:$0xff]  ;;  %v1814_v28 = vcombine.low %v70_v17, %v74_v18  ;;  %v64_v11 = vld [vmem:[%s3480_s1 + $0x58] sm:$0xff]  ;;  %v1802_v14 = vcombine.low %v56_v1, %v60_v2  ;;  %v1809_v15 = vcombine.high %v63_v8, %v67_v9  ;;  %46 = vst.msk [vmem:[#allocation5 + $0x28] sm:$0xff] %vm22_vm0, %v2015_v3 }
   0x9   :  { %v1821_v29 = vcombine.high %v77_v23, %v81_v24  ;;  %v1823_v30 = vcombine.high %v78_v25, %v82_v26  ;;  %v85_v31 = vld [vmem:[%s3480_s1 + $0x100] sm:$0xff]  ;;  %v86_v33 = vld [vmem:[%s3480_s1 + $0x108] sm:$0xff]  ;;  %v1820_v35 = vcombine.low %v77_v23, %v81_v24  ;;  %v1822_v36 = vcombine.low %v78_v25, %v82_v26  ;;  %v68_v12 = vld [vmem:[%s3480_s1 + $0x78] sm:$0xff] }
   0xa   :  { %500 = vmatpush1.bf16.msra.mxu0 %v1804_v19  ;;  %563 = vmatpush1.bf16.msra.mxu1 %v1806_v20  ;;  %v89_v32 = vld [vmem:[%s3480_s1 + $0x120] sm:$0xff]  ;;  %v90_v34 = vld [vmem:[%s3480_s1 + $0x128] sm:$0xff]  ;;  %v1811_v16 = vcombine.high %v64_v11, %v68_v12  ;;  %v71_v17 = vld [vmem:[%s3480_s1 + $0x90] sm:$0xff] }
   0xb   :  { %501 = vmatprep.subr.bf16.mxu0 %v1813_v21  ;;  %564 = vmatprep.subr.bf16.mxu1 %v1815_v22  ;;  %v1829_v37 = vcombine.high %v85_v31, %v89_v32  ;;  %v1831_v38 = vcombine.high %v86_v33, %v90_v34  ;;  %v93_v39 = vld [vmem:[%s3480_s1 + $0x140] sm:$0xff]  ;;  %v94_v41 = vld [vmem:[%s3480_s1 + $0x148] sm:$0xff]  ;;  %v1828_v43 = vcombine.low %v85_v31, %v89_v32  ;;  %v75_v18 = vld [vmem:[%s3480_s1 + $0xb0] sm:$0xff] }
   0xc   :  { %v97_v40 = vld [vmem:[%s3480_s1 + $0x160] sm:$0xff]  ;;  %v98_v42 = vld [vmem:[%s3480_s1 + $0x168] sm:$0xff]  ;;  %v1830_v44 = vcombine.low %v86_v33, %v90_v34  ;;  %v72_v19 = vld [vmem:[%s3480_s1 + $0x98] sm:$0xff]  ;;  %v1808_v21 = vcombine.low %v63_v8, %v67_v9  ;;  %v1810_v22 = vcombine.low %v64_v11, %v68_v12  ;;  %v1817_v23 = vcombine.high %v71_v17, %v75_v18 }
   0xd   :  { %v1837_v45 = vcombine.high %v93_v39, %v97_v40  ;;  %v1839_v46 = vcombine.high %v94_v41, %v98_v42  ;;  %v101_v47 = vld [vmem:[%s3480_s1 + $0x180] sm:$0xff]  ;;  %v102_v49 = vld [vmem:[%s3480_s1 + $0x188] sm:$0xff]  ;;  %v1836_v51 = vcombine.low %v93_v39, %v97_v40  ;;  %v1838_v52 = vcombine.low %v94_v41, %v98_v42  ;;  %v76_v20 = vld [vmem:[%s3480_s1 + $0xb8] sm:$0xff] }
   0xe   :  { %502 = vmatpush1.bf16.msra.mxu0 %v1812_v27  ;;  %565 = vmatpush1.bf16.msra.mxu1 %v1814_v28  ;;  %v105_v48 = vld [vmem:[%s3480_s1 + $0x1a0] sm:$0xff]  ;;  %v106_v50 = vld [vmem:[%s3480_s1 + $0x1a8] sm:$0xff]  ;;  %v1819_v24 = vcombine.high %v72_v19, %v76_v20  ;;  %v79_v25 = vld [vmem:[%s3480_s1 + $0xd0] sm:$0xff]  ;;  %v1818_v31 = vcombine.low %v72_v19, %v76_v20 }
   0xf   :  { %503 = vmatprep.subr.bf16.mxu0 %v1821_v29  ;;  %566 = vmatprep.subr.bf16.mxu1 %v1823_v30  ;;  %v1845_v53 = vcombine.high %v101_v47, %v105_v48  ;;  %v1847_v54 = vcombine.high %v102_v49, %v106_v50  ;;  %v109_v55 = vld [vmem:[%s3480_s1 + $0x1c0] sm:$0xff]  ;;  %v110_v57 = vld [vmem:[%s3480_s1 + $0x1c8] sm:$0xff]  ;;  %v1844_v59 = vcombine.low %v101_v47, %v105_v48  ;;  %v83_v26 = vld [vmem:[%s3480_s1 + $0xf0] sm:$0xff] }
  0x10   :  { %v113_v56 = vld [vmem:[%s3480_s1 + $0x1e0] sm:$0xff]  ;;  %v114_v58 = vld [vmem:[%s3480_s1 + $0x1e8] sm:$0xff]  ;;  %v1846_v60 = vcombine.low %v102_v49, %v106_v50  ;;  %v80_v28 = vld [vmem:[%s3480_s1 + $0xd8] sm:$0xff]  ;;  %v1816_v30 = vcombine.low %v71_v17, %v75_v18  ;;  %v1825_v32 = vcombine.high %v79_v25, %v83_v26 }
  0x11   :  { %v1853_v61 = vcombine.high %v109_v55, %v113_v56  ;;  %v1855_v62 = vcombine.high %v110_v57, %v114_v58  ;;  %v1852_v4 = vcombine.low %v109_v55, %v113_v56  ;;  %v1854_v5 = vcombine.low %v110_v57, %v114_v58  ;;  %v2164_v10 = vld [vmem:[%s3481_s0] sm:$0xff]   ;;  %v2196_v27 = vld [vmem:[%s3481_s0 + $0x8] sm:$0xff]   ;;  %v84_v29 = vld [vmem:[%s3480_s1 + $0xf8] sm:$0xff] }
  0x12   :  { %504 = vmatpush1.bf16.msra.mxu0 %v1820_v35  ;;  %567 = vmatpush1.bf16.msra.mxu1 %v1822_v36  ;;  %v1827_v33 = vcombine.high %v80_v28, %v84_v29  ;;  %v87_v34 = vld [vmem:[%s3480_s1 + $0x110] sm:$0xff]  ;;  %v88_v36 = vld [vmem:[%s3480_s1 + $0x118] sm:$0xff]  ;;  %v1826_v39 = vcombine.low %v80_v28, %v84_v29 }
  0x13   :  { %505 = vmatprep.subr.bf16.mxu0 %v1829_v37  ;;  %568 = vmatprep.subr.bf16.mxu1 %v1831_v38  ;;  %v91_v35 = vld [vmem:[%s3480_s1 + $0x130] sm:$0xff]  ;;  %v92_v37 = vld [vmem:[%s3480_s1 + $0x138] sm:$0xff]  ;;  %v1824_v38 = vcombine.low %v79_v25, %v83_v26  ;;  %v117_v26 = vld [vmem:[%s3482_s2] sm:$0xff] }
  0x14   :  { %v1833_v40 = vcombine.high %v87_v34, %v91_v35  ;;  %v1835_v41 = vcombine.high %v88_v36, %v92_v37  ;;  %v95_v42 = vld [vmem:[%s3480_s1 + $0x150] sm:$0xff]  ;;  %v1832_v47 = vcombine.low %v87_v34, %v91_v35  ;;  %v1834_v48 = vcombine.low %v88_v36, %v92_v37 }
  0x16   :  { %506 = vmatpush1.bf16.msra.mxu0 %v1828_v43  ;;  %569 = vmatpush1.bf16.msra.mxu1 %v1830_v44  ;;  %v99_v43 = vld [vmem:[%s3480_s1 + $0x170] sm:$0xff] }
  0x17   :  { %507 = vmatprep.subr.bf16.mxu0 %v1837_v45  ;;  %570 = vmatprep.subr.bf16.mxu1 %v1839_v46  ;;  %v1888_v44 = vld [vmem:[%s3481_s0 + $0x10] sm:$0xff]   ;;  %v96_v45 = vld [vmem:[%s3480_s1 + $0x158] sm:$0xff]  ;;  %v1841_v49 = vcombine.high %v95_v42, %v99_v43  ;;  %v1840_v55 = vcombine.low %v95_v42, %v99_v43 }
  0x18   :  { %v100_v46 = vld [vmem:[%s3480_s1 + $0x178] sm:$0xff] }
  0x19   :  { %v1843_v50 = vcombine.high %v96_v45, %v100_v46  ;;  %v1842_v56 = vcombine.low %v96_v45, %v100_v46 }
  0x1a   :  { %508 = vmatpush1.bf16.msra.mxu0 %v1836_v51  ;;  %571 = vmatpush1.bf16.msra.mxu1 %v1838_v52  ;;  %v103_v51 = vld [vmem:[%s3480_s1 + $0x190] sm:$0xff] }
  0x1b   :  { %509 = vmatprep.subr.bf16.mxu0 %v1845_v53  ;;  %572 = vmatprep.subr.bf16.mxu1 %v1847_v54  ;;  %v107_v52 = vld [vmem:[%s3480_s1 + $0x1b0] sm:$0xff]  ;;  %v104_v53 = vld [vmem:[%s3480_s1 + $0x198] sm:$0xff] }
  0x1c   :  { %v108_v54 = vld [vmem:[%s3480_s1 + $0x1b8] sm:$0xff]  ;;  %v1849_v57 = vcombine.high %v103_v51, %v107_v52  ;;  %v1848_v63 = vcombine.low %v103_v51, %v107_v52 }
  0x1d   :  { %v1851_v58 = vcombine.high %v104_v53, %v108_v54  ;;  %v1850_v0 = vcombine.low %v104_v53, %v108_v54 }
  0x1e   :  { %510 = vmatpush1.bf16.msra.mxu0 %v1844_v59  ;;  %573 = vmatpush1.bf16.msra.mxu1 %v1846_v60  ;;  %v111_v59 = vld [vmem:[%s3480_s1 + $0x1d0] sm:$0xff] }
  0x1f   :  { %511 = vmatprep.subr.bf16.mxu0 %v1853_v61  ;;  %574 = vmatprep.subr.bf16.mxu1 %v1855_v62  ;;  %v115_v60 = vld [vmem:[%s3480_s1 + $0x1f0] sm:$0xff]  ;;  %v112_v61 = vld [vmem:[%s3480_s1 + $0x1d8] sm:$0xff] }
  0x20   :  { %v116_v62 = vld [vmem:[%s3480_s1 + $0x1f8] sm:$0xff]  ;;  %v1857_v1 = vcombine.high %v111_v59, %v115_v60 }
  0x21   :  { %v1859_v2 = vcombine.high %v112_v61, %v116_v62 }
  0x22   :  { %512 = vmatpush1.bf16.msra.mxu0 %v1852_v4  ;;  %575 = vmatpush1.bf16.msra.mxu1 %v1854_v5  ;;  %v1856_v4 = vcombine.low %v111_v59, %v115_v60  ;;  %v1858_v5 = vcombine.low %v112_v61, %v116_v62 }
  0x23   :  { %623 = vmatprep.subr.bf16.mxu0 %v1801_v6  ;;  %686 = vmatprep.subr.bf16.mxu1 %v1803_v7 }
  0x25   :  { %530 = vmatmul.mubr.bf16.vlgmr.msra.gmra.mrb[0].mxu0 %v2164_v10  ;;  %593 = vmatmul.mubr.bf16.vlgmr.msra.gmra.mrb[0].mxu1 %v2164_v10 }
  0x26   :  { %624 = vmatpush1.bf16.msra.mxu0 %v1800_v13  ;;  %687 = vmatpush1.bf16.msra.mxu1 %v1802_v14  ;;  %v119_v14 = vlaneseq }
  0x27   :  { %625 = vmatprep.subr.bf16.mxu0 %v1809_v15  ;;  %688 = vmatprep.subr.bf16.mxu1 %v1811_v16 }
  0x28   :  { %539 = vmatprep.mubr.bf16.mxu0 %v2015_v3  ;;  %602 = vmatprep.mubr.bf16.mxu1 %v2015_v3  ;;  %v120_v16 = vshrl.u32 %v119_v14, 7 }
  0x2a   :  { %626 = vmatpush1.bf16.msra.mxu0 %v1808_v21  ;;  %689 = vmatpush1.bf16.msra.mxu1 %v1810_v22  ;;  %v125_v25 = vsub.s32 1, %v120_v16  ;;  %v145_v51 = vsub.s32 6, %v120_v16  ;;  %v149_v60 = vsub.s32 7, %v120_v16 }
  0x2b   :  { %627 = vmatprep.subr.bf16.mxu0 %v1817_v23  ;;  %690 = vmatprep.subr.bf16.mxu1 %v1819_v24  ;;  %v121_v24 = vsub.s32 0, %v120_v16 }
  0x2c   :  { %v2280_v29 = vrot.slane %v117_v26, %v125_v25  ;;  %v2337_v62 = vrot.slane %v117_v26, %v145_v51 }
  0x2d   :  { %540 = vmatmul.mubr.bf16.gmra.mrb[4].mxu0 %v2196_v27  ;;  %603 = vmatmul.mubr.bf16.gmra.mrb[4].mxu1 %v2196_v27  ;;  %v2278_v28 = vrot.slane %v117_v26, %v121_v24 }
  0x2e   :  { %628 = vmatpush1.bf16.msra.mxu0 %v1816_v30  ;;  %691 = vmatpush1.bf16.msra.mxu1 %v1818_v31  ;;  %v129_v30 = vsub.s32 2, %v120_v16 }
  0x2f   :  { %629 = vmatprep.subr.bf16.mxu0 %v1825_v32  ;;  %692 = vmatprep.subr.bf16.mxu1 %v1827_v33 }
  0x30   :  { %549 = vmatprep.mubr.bf16.mxu0 %v2015_v3  ;;  %612 = vmatprep.mubr.bf16.mxu1 %v2015_v3 }
  0x32   :  { %630 = vmatpush1.bf16.msra.mxu0 %v1824_v38  ;;  %693 = vmatpush1.bf16.msra.mxu1 %v1826_v39 }
  0x33   :  { %631 = vmatprep.subr.bf16.mxu0 %v1833_v40  ;;  %694 = vmatprep.subr.bf16.mxu1 %v1835_v41  ;;  %v2296_v40 = vrot.slane %v117_v26, %v129_v30  ;;  %v133_v41 = vsub.s32 3, %v120_v16 }
  0x35   :  { %550 = vmatmul.mubr.bf16.gmra.mrb[8].mxu0 %v1888_v44  ;;  %613 = vmatmul.mubr.bf16.gmra.mrb[8].mxu1 %v1888_v44  ;;  %v2309_v46 = vrot.slane %v117_v26, %v133_v41 }
  0x36   :  { %632 = vmatpush1.bf16.msra.mxu0 %v1832_v47  ;;  %695 = vmatpush1.bf16.msra.mxu1 %v1834_v48  ;;  %v137_v47 = vsub.s32 4, %v120_v16  ;;  %v141_v48 = vsub.s32 5, %v120_v16 }
  0x37   :  { %633 = vmatprep.subr.bf16.mxu0 %v1841_v49  ;;  %696 = vmatprep.subr.bf16.mxu1 %v1843_v50 }
  0x38   :  { %655 = vmatprep.mubr.bf16.mxu0 %v2015_v3  ;;  %718 = vmatprep.mubr.bf16.mxu1 %v2015_v3  ;;  %v2334_v59 = vrot.slane %v117_v26, %v141_v48 }
  0x3a   :  { %634 = vmatpush1.bf16.msra.mxu0 %v1840_v55  ;;  %697 = vmatpush1.bf16.msra.mxu1 %v1842_v56  ;;  %v2326_v56 = vrot.slane %v117_v26, %v137_v47 }
  0x3b   :  { %635 = vmatprep.subr.bf16.mxu0 %v1849_v57  ;;  %698 = vmatprep.subr.bf16.mxu1 %v1851_v58 }
  0x3e   :  { %636 = vmatpush1.bf16.msra.mxu0 %v1848_v63  ;;  %699 = vmatpush1.bf16.msra.mxu1 %v1850_v0 }
  0x3f   :  { %637 = vmatprep.subr.bf16.mxu0 %v1857_v1  ;;  %700 = vmatprep.subr.bf16.mxu1 %v1859_v2 }
  0x42   :  { %638 = vmatpush1.bf16.msra.mxu0 %v1856_v4  ;;  %701 = vmatpush1.bf16.msra.mxu1 %v1858_v5 }
  0x45   :  { %656 = vmatmul.mubr.bf16.vlgmr.msra.gmra.mrb[12].mxu0 %v2164_v10  ;;  %719 = vmatmul.mubr.bf16.vlgmr.msra.gmra.mrb[12].mxu1 %v2164_v10 }
  0x46   :  { %665 = vmatprep.mubr.bf16.mxu0 %v2015_v3  ;;  %728 = vmatprep.mubr.bf16.mxu1 %v2015_v3 }
  0x4d   :  { %666 = vmatmul.mubr.bf16.gmra.mrb[16].mxu0 %v2196_v27  ;;  %729 = vmatmul.mubr.bf16.gmra.mrb[16].mxu1 %v2196_v27 }
  0x4e   :  { %675 = vmatprep.mubr.bf16.mxu0 %v2015_v3  ;;  %738 = vmatprep.mubr.bf16.mxu1 %v2015_v3 }
  0x55   :  { %676 = vmatmul.mubr.bf16.gmra.mrb[20].mxu0 %v1888_v44  ;;  %739 = vmatmul.mubr.bf16.gmra.mrb[20].mxu1 %v1888_v44 }
  0xf8   :  { %v531_v6 = vpop.f32.mrb[0].mxu0  ;;  %v594_v8 = vpop.f32.mrb[0].mxu1 }
  0xf9   :  { %v533_v7 = vpop.f32.mrb[1].mxu0  ;;  %v596_v11 = vpop.f32.mrb[1].mxu1  ;;  %v2291_v38 = vadd.f32 %v531_v6, %v2278_v28  ;;  %v2307_v45 = vadd.f32 %v594_v8, %v2296_v40 }
  0xfa   :  { %v535_v9 = vpop.f32.mrb[2].mxu0  ;;  %v598_v12 = vpop.f32.mrb[2].mxu1  ;;  %v2294_v39 = vadd.f32 %v533_v7, %v2280_v29  ;;  %v2324_v55 = vadd.f32 %v596_v11, %v2309_v46 }
  0xfb   :  { %v537_v10 = vpop.f32.mrb[3].mxu0  ;;  %v600_v13 = vpop.f32.mrb[3].mxu1  ;;  %v2299_v42 = vadd.f32 %v535_v9, %v2278_v28  ;;  %v2314_v50 = vadd.f32 %v598_v12, %v2296_v40  ;;  %v2359_v12 = vrot.slane %v117_v26, %v149_v60 }
  0xfc   :  { %v2302_v43 = vadd.f32 %v537_v10, %v2280_v29  ;;  %v780_v44 = vmax.f32 %v2291_v38, %v2294_v39  ;;  %v2345_v2 = vadd.f32 %v600_v13, %v2309_v46 }
  0xfd   :  { %3574 = vst [vmem:[#allocation6_spill] sm:$0xff] %v2299_v42  ;;  %3576 = vst [vmem:[#allocation8_spill] sm:$0xff] %v2314_v50 }
  0xfe   :  { %3575 = vst [vmem:[#allocation7_spill] sm:$0xff] %v2302_v43  ;;  %v789_v49 = vmax.f32 %v2299_v42, %v2302_v43  ;;  %v781_v54 = vmax.f32 %v780_v44, %v2307_v45  ;;  %3581 = vst [vmem:[#allocation13_spill] sm:$0xff] %v2345_v2 }
 0x100   :  { %v541_v15 = vpop.f32.mrb[4].mxu0  ;;  %v604_v18 = vpop.f32.mrb[4].mxu1  ;;  %v790_v61 = vmax.f32 %v789_v49, %v2314_v50  ;;  %v782_v7 = vmax.f32 %v781_v54, %v2324_v55 }
 0x101   :  { %v543_v17 = vpop.f32.mrb[5].mxu0  ;;  %v2271_v20 = vpop.f32.mrb[5].mxu1  ;;  %v2317_v52 = vadd.f32 %v541_v15, %v2278_v28  ;;  %v2342_v0 = vadd.f32 %v604_v18, %v2296_v40 }
 0x102   :  { %v545_v19 = vpop.f32.mrb[6].mxu0  ;;  %v608_v22 = vpop.f32.mrb[6].mxu1  ;;  %v2320_v53 = vadd.f32 %v543_v17, %v2280_v29  ;;  %v791_v15 = vmax.f32 %v790_v61, %v2345_v2  ;;  %v2372_v24 = vadd.f32 %v2271_v20, %v2309_v46 }
 0x103   :  { %v547_v21 = vpop.f32.mrb[7].mxu0  ;;  %v2273_v23 = vpop.f32.mrb[7].mxu1  ;;  %3577 = vst [vmem:[#allocation9_spill] sm:$0xff] %v2317_v52  ;;  %v2329_v57 = vadd.f32 %v545_v19, %v2278_v28  ;;  %3580 = vst [vmem:[#allocation12_spill] sm:$0xff] %v2342_v0  ;;  %v2354_v9 = vadd.f32 %v608_v22, %v2296_v40 }
 0x104   :  { %3578 = vst [vmem:[#allocation10_spill] sm:$0xff] %v2320_v53  ;;  %v2332_v58 = vadd.f32 %v547_v21, %v2280_v29  ;;  %v798_v63 = vmax.f32 %v2317_v52, %v2320_v53  ;;  %3585 = vst [vmem:[#allocation17_spill] sm:$0xff] %v2372_v24  ;;  %v2388_v20 = vadd.f32 %v2273_v23, %v2309_v46 }
 0x105   :  { %3579 = vst [vmem:[#allocation11_spill] sm:$0xff] %v2329_v57 }
 0x106   :  { %v807_v8 = vmax.f32 %v2329_v57, %v2332_v58  ;;  %v799_v22 = vmax.f32 %v798_v63, %v2342_v0 }
 0x108   :  { %v551_v27 = vpop.f32.mrb[8].mxu0  ;;  %v2282_v32 = vpop.f32.mrb[8].mxu1  ;;  %v808_v48 = vmax.f32 %v807_v8, %v2354_v9 }
 0x109   :  { %v553_v31 = vpop.f32.mrb[9].mxu0  ;;  %v2284_v34 = vpop.f32.mrb[9].mxu1  ;;  %v2378_v30 = vadd.f32 %v551_v27, %v2278_v28  ;;  %v2406_v23 = vadd.f32 %v2282_v32, %v2296_v40 }
 0x10a   :  { %v555_v33 = vpop.f32.mrb[10].mxu0  ;;  %v2286_v36 = vpop.f32.mrb[10].mxu1  ;;  %v2381_v41 = vadd.f32 %v553_v31, %v2280_v29 }
 0x10b   :  { %v557_v35 = vpop.f32.mrb[11].mxu0  ;;  %v2288_v37 = vpop.f32.mrb[11].mxu1  ;;  %3587 = vst [vmem:[#allocation19_spill] sm:$0xff] %v2378_v30  ;;  %v2391_v49 = vadd.f32 %v555_v33, %v2278_v28  ;;  %3590 = vst [vmem:[#allocation22_spill] sm:$0xff] %v2406_v23  ;;  %v800_v28 = vmax.f32 %v799_v22, %v2372_v24 }
 0x10c   :  { %3588 = vst [vmem:[#allocation20_spill] sm:$0xff] %v2381_v41  ;;  %v2394_v51 = vadd.f32 %v557_v35, %v2280_v29  ;;  %v816_v29 = vmax.f32 %v2378_v30, %v2381_v41 }
 0x10e   :  { %v825_v32 = vmax.f32 %v2391_v49, %v2394_v51 }
 0x118   :  { %v657_v1 = vpop.f32.mrb[12].mxu0  ;;  %v720_v6 = vpop.f32.mrb[12].mxu1 }
 0x119   :  { %v2348_v4 = vadd.f32 %v657_v1, %v2326_v56  ;;  %v659_v5 = vpop.f32.mrb[13].mxu0  ;;  %v722_v13 = vpop.f32.mrb[13].mxu1  ;;  %v2363_v16 = vadd.f32 %v720_v6, %v2337_v62  ;;  %v809_v6 = vmax.f32 %v808_v48, %v2388_v20 }
 0x11a   :  { %v2357_v11 = vadd.f32 %v659_v5, %v2334_v59  ;;  %v661_v10 = vpop.f32.mrb[14].mxu0  ;;  %v724_v19 = vpop.f32.mrb[14].mxu1  ;;  %v2397_v27 = vadd.f32 %v722_v13, %v2359_v12 }
 0x11b   :  { %3583 = vst [vmem:[#allocation15_spill] sm:$0xff] %v2363_v16  ;;  %v2366_v17 = vadd.f32 %v661_v10, %v2326_v56  ;;  %v663_v18 = vpop.f32.mrb[15].mxu0  ;;  %v783_v21 = vmax.f32 %v782_v7, %v2348_v4  ;;  %v726_v26 = vpop.f32.mrb[15].mxu1  ;;  %v2400_v31 = vadd.f32 %v724_v19, %v2337_v62  ;;  %v2421_v7 = vadd.f32 %v2286_v36, %v2296_v40 }
 0x11c   :  { %3582 = vst [vmem:[#allocation14_spill] sm:$0xff] %v2357_v11  ;;  %v2375_v25 = vadd.f32 %v663_v18, %v2334_v59  ;;  %3589 = vst [vmem:[#allocation21_spill] sm:$0xff] %v2397_v27  ;;  %v2438_v40 = vadd.f32 %v2284_v34, %v2309_v46 }
 0x11d   :  { %3584 = vst [vmem:[#allocation16_spill] sm:$0xff] %v2366_v17  ;;  %v784_v44 = vmax.f32 %v783_v21, %v2357_v11  ;;  %v792_v47 = vmax.f32 %v791_v15, %v2366_v17  ;;  %v2427_v15 = vadd.f32 %v726_v26, %v2359_v12 }
 0x11e   :  { %3586 = vst [vmem:[#allocation18_spill] sm:$0xff] %v2375_v25  ;;  %3594 = vst [vmem:[#allocation26_spill] sm:$0xff] %v2438_v40 }
 0x11f   :  { %v785_v54 = vmax.f32 %v784_v44, %v2363_v16  ;;  %v793_v60 = vmax.f32 %v792_v47, %v2375_v25  ;;  %v817_v47 = vmax.f32 %v816_v29, %v2406_v23 }
 0x120   :  { %v667_v61 = vpop.f32.mrb[16].mxu0  ;;  %v730_v63 = vpop.f32.mrb[16].mxu1 }
 0x121   :  { %v2412_v33 = vadd.f32 %v667_v61, %v2326_v56  ;;  %v669_v35 = vpop.f32.mrb[17].mxu0  ;;  %v786_v1 = vmax.f32 %v785_v54, %v2397_v27  ;;  %v794_v5 = vmax.f32 %v793_v60, %v2400_v31  ;;  %v732_v13 = vpop.f32.mrb[17].mxu1  ;;  %v2430_v18 = vadd.f32 %v730_v63, %v2337_v62 }
 0x122   :  { %v2424_v8 = vadd.f32 %v669_v35, %v2334_v59  ;;  %v671_v10 = vpop.f32.mrb[18].mxu0  ;;  %v734_v22 = vpop.f32.mrb[18].mxu1  ;;  %v826_v61 = vmax.f32 %v825_v32, %v2421_v7  ;;  %v2453_v34 = vadd.f32 %v732_v13, %v2359_v12  ;;  %v2016_v13 = vmov -inf  }
 0x123   :  { %3591 = vst [vmem:[#allocation23_spill] sm:$0xff] %v2412_v33  ;;  %3593 = vst [vmem:[#allocation25_spill] sm:$0xff] %v2430_v18  ;;  %v2433_v19 = vadd.f32 %v671_v10, %v2326_v56  ;;  %v673_v21 = vpop.f32.mrb[19].mxu0  ;;  %787 = vmax.xlane.f32.xlu0 %v786_v1  ;;  %v801_v36 = vmax.f32 %v800_v28, %v2412_v33  ;;  %v736_v26 = vpop.f32.mrb[19].mxu1  ;;  %v795_v48 = vmax.f32 %v794_v5, %v2427_v15 }
 0x124   :  { %3592 = vst [vmem:[#allocation24_spill] sm:$0xff] %v2424_v8  ;;  %v2441_v44 = vadd.f32 %v673_v21, %v2334_v59  ;;  %v2450_v28 = vadd.f32 %v2288_v37, %v2309_v46  ;;  %3596 = vst [vmem:[#allocation28_spill] sm:$0xff] %v2453_v34  ;;  %v2456_v35 = vadd.f32 %v734_v22, %v2337_v62  ;;  %v3485_v21 = vmov 0.0  }
 0x125   :  { %v802_v54 = vmax.f32 %v801_v36, %v2424_v8  ;;  %v810_v60 = vmax.f32 %v809_v6, %v2433_v19  ;;  %v818_v5 = vmax.f32 %v817_v47, %v2438_v40  ;;  %23 = vst.msk [vmem:[#allocation2] sm:$0xff] %vm22_vm0, %v2016_v13  ;;  %24 = vst.msk [vmem:[#allocation2 + $0x8] sm:$0xff] %vm22_vm0, %v2016_v13 }
 0x126   :  { %3595 = vst [vmem:[#allocation27_spill] sm:$0xff] %v2441_v44  ;;  %3597 = vst [vmem:[#allocation29_spill] sm:$0xff] %v2456_v35  ;;  %v827_v22 = vmax.f32 %v826_v61, %v2450_v28 }
 0x127   :  { %796 = vmax.xlane.f32.xlu0 %v795_v48  ;;  %v803_v29 = vmax.f32 %v802_v54, %v2430_v18  ;;  %v811_v63 = vmax.f32 %v810_v60, %v2441_v44  ;;  %25 = vst.msk [vmem:[#allocation2 + $0x10] sm:$0xff] %vm22_vm0, %v2016_v13  ;;  %26 = vst.msk [vmem:[#allocation2 + $0x18] sm:$0xff] %vm22_vm0, %v2016_v13  ;;  %v2513_v54 = vadd.f32 %v736_v26, %v2359_v12 }
 0x128   :  { %v677_v1 = vpop.f32.mrb[20].mxu0  ;;  %v740_v46 = vpop.f32.mrb[20].mxu1  ;;  %27 = vst.msk [vmem:[#allocation2 + $0x20] sm:$0xff] %vm22_vm0, %v2016_v13  ;;  %28 = vst.msk [vmem:[#allocation2 + $0x28] sm:$0xff] %vm22_vm0, %v2016_v13 }
 0x129   :  { %v2462_v6 = vadd.f32 %v677_v1, %v2326_v56  ;;  %v679_v37 = vpop.f32.mrb[21].mxu0  ;;  %v804_v32 = vmax.f32 %v803_v29, %v2453_v34  ;;  %v812_v10 = vmax.f32 %v811_v63, %v2456_v35  ;;  %29 = vst.msk [vmem:[#allocation3] sm:$0xff] %vm22_vm0, %v3485_v21  ;;  %30 = vst.msk [vmem:[#allocation3 + $0x8] sm:$0xff] %vm22_vm0, %v3485_v21  ;;  %v742_v48 = vpop.f32.mrb[21].mxu1 }
 0x12a   :  { %31 = vst.msk [vmem:[#allocation3 + $0x10] sm:$0xff] %vm22_vm0, %v3485_v21  ;;  %32 = vst.msk [vmem:[#allocation3 + $0x18] sm:$0xff] %vm22_vm0, %v3485_v21  ;;  %v2510_v36 = vadd.f32 %v679_v37, %v2334_v59  ;;  %v681_v47 = vpop.f32.mrb[22].mxu0  ;;  %v2516_v60 = vadd.f32 %v740_v46, %v2337_v62  ;;  %v744_v1 = vpop.f32.mrb[22].mxu1  ;;  %v2529_v46 = vadd.f32 %v742_v48, %v2359_v12 }
 0x12b   :  { %3598 = vst [vmem:[#allocation30_spill] sm:$0xff] %v2462_v6  ;;  %33 = vst.msk [vmem:[#allocation3 + $0x20] sm:$0xff] %vm22_vm0, %v3485_v21  ;;  %v2519_v29 = vadd.f32 %v681_v47, %v2326_v56  ;;  %v683_v63 = vpop.f32.mrb[23].mxu0  ;;  %805 = vmax.xlane.f32.xlu1 %v804_v32  ;;  %v819_v3 = vmax.f32 %v818_v5, %v2462_v6  ;;  %v746_v37 = vpop.f32.mrb[23].mxu1  ;;  %v813_v13 = vmax.f32 %v812_v10, %v2513_v54 }
 0x12c   :  { %34 = vst.msk [vmem:[#allocation3 + $0x28] sm:$0xff] %vm22_vm0, %v3485_v21  ;;  %35 = vst.msk [vmem:[#allocation4] sm:$0xff] %vm22_vm0, %v3485_v21  ;;  %v2523_v61 = vadd.f32 %v683_v63, %v2334_v59  ;;  %v2532_v56 = vadd.f32 %v744_v1, %v2337_v62  ;;  %v2537_v59 = vadd.f32 %v746_v37, %v2359_v12  ;;  %v768_v62 = vld [vmem:[%s3483_s3] sm:$0xff]  ;;  %v2557_v1 = vand.u32 127, %v119_v14 }
 0x12d   :  { %36 = vst.msk [vmem:[#allocation4 + $0x8] sm:$0xff] %vm22_vm0, %v3485_v21  ;;  %37 = vst.msk [vmem:[#allocation4 + $0x10] sm:$0xff] %vm22_vm0, %v3485_v21  ;;  %v820_v26 = vmax.f32 %v819_v3, %v2510_v36  ;;  %v2548_v12 = vld [vmem:[#allocation2] sm:$0xff]  ;;  %v2559_v3 = vld [vmem:[#allocation2 + $0x8] sm:$0xff] }
 0x12e   :  { %38 = vst.msk [vmem:[#allocation4 + $0x18] sm:$0xff] %vm22_vm0, %v3485_v21  ;;  %39 = vst.msk [vmem:[#allocation4 + $0x20] sm:$0xff] %vm22_vm0, %v3485_v21  ;;  %v2577_v14 = vld [vmem:[#allocation2 + $0x10] sm:$0xff] }
 0x12f   :  { %40 = vst.msk [vmem:[#allocation4 + $0x28] sm:$0xff] %vm22_vm0, %v3485_v21  ;;  %3599 = vst [vmem:[#allocation31_spill] sm:$0xff] %v2510_v36  ;;  %v828_v21 = vmax.f32 %v827_v22, %v2519_v29  ;;  %814 = vmax.xlane.f32.xlu1 %v813_v13  ;;  %v821_v32 = vmax.f32 %v820_v26, %v2516_v60  ;;  %v771_v13 = vld [vmem:[%s3483_s3 + $0x18] sm:$0xff] }
 0x130   :  { %3600 = vst [vmem:[#allocation32_spill] sm:$0xff] %v2513_v54  ;;  %3601 = vst [vmem:[#allocation33_spill] sm:$0xff] %v2516_v60 }
 0x131   :  { %3602 = vst [vmem:[#allocation34_spill] sm:$0xff] %v2529_v46  ;;  %3603 = vst [vmem:[#allocation35_spill] sm:$0xff] %v2532_v56  ;;  %v829_v5 = vmax.f32 %v828_v21, %v2523_v61  ;;  %v822_v10 = vmax.f32 %v821_v32, %v2529_v46  ;;  %v769_v21 = vld [vmem:[%s3483_s3 + $0x8] sm:$0xff]  ;;  %v2580_v32 = vadd.s32 128, %v2557_v1 }
 0x132   :  { %3604 = vst [vmem:[#allocation36_spill] sm:$0xff] %v2537_v59  ;;  %3605 = vst [vmem:[#allocation37_spill] sm:$0xff] %v2548_v12 }
 0x133   :  { %v830_v47 = vmax.f32 %v829_v5, %v2532_v56  ;;  %823 = vmax.xlane.f32.xlu0 %v822_v10  ;;  %3608 = vst [vmem:[#allocation40_spill] sm:$0xff] %v2559_v3  ;;  %3611 = vst [vmem:[#allocation43_spill] sm:$0xff] %v2577_v14  ;;  %v2603_v5 = vld [vmem:[#allocation2 + $0x18] sm:$0xff] }
 0x134   :  { %3614 = vst [vmem:[#allocation46_spill] sm:$0xff] %v2603_v5 }
 0x135   :  { %v831_v22 = vmax.f32 %v830_v47, %v2537_v59  ;;  %v773_v47 = vld [vmem:[%s3483_s3 + $0x28] sm:$0xff] }
 0x136   :  { %v2658_v59 = vld [vmem:[#allocation2 + $0x28] sm:$0xff] }
 0x137   :  { %832 = vmax.xlane.f32.xlu1 %v831_v22  ;;  %3619 = vst [vmem:[#allocation51_spill] sm:$0xff] %v2658_v59 }
 0x148   :  { %1412 = vperm.xlu1 %1869, %v768_v62  }
 0x14c   :  { %1415 = vperm.xlu1 %1869, %v769_v21  }
 0x1b0   :  { %v2550_v48 = vpop.xlane.xlu0 %787 }
 0x1b1   :  { %3606 = vst [vmem:[#allocation38_spill] sm:$0xff] %v2550_v48  ;;  %v2554_v63 = vmax.f32 %v2548_v12, %v2550_v48  ;;  %v2609_v12 = vadd.s32 512, %v2557_v1  ;;  %vm1111_vm13 = vcmp.eq.f32.partialorder %v2291_v38, %v2550_v48  ;;  %vm1112_vm14 = vcmp.eq.f32.partialorder %v2294_v39, %v2550_v48 }
 0x1b2   :  { %vm1113_vm15 = vcmp.eq.f32.partialorder %v2307_v45, %v2550_v48 }
 0x1b3   :  { %3607 = vst [vmem:[#allocation39_spill] sm:$0xff] %v2554_v63  ;;  %872 = vperm.xlu0 %1870, %v2554_v63   ;;  %1399 = vst.msk [vmem:[#allocation2] sm:$0xff] %vm22_vm0, %v2554_v63  ;;  %v2635_v63 = vadd.s32 768, %v2557_v1 }
 0x1b4   :  { %v2564_v37 = vpop.xlane.xlu0 %796 }
 0x1b5   :  { %3609 = vst [vmem:[#allocation41_spill] sm:$0xff] %v2564_v37  ;;  %v2571_v26 = vmax.f32 %v2559_v3, %v2564_v37  ;;  %vm1119_vm1 = vcmp.eq.f32.partialorder %v2299_v42, %v2564_v37  ;;  %vm1120_vm2 = vcmp.eq.f32.partialorder %v2302_v43, %v2564_v37  ;;  %vm1121_vm3 = vcmp.eq.f32.partialorder %v2314_v50, %v2564_v37 }
 0x1b6   :  { %v1167_v22 = vsel %vm1119_vm1, %v2557_v1, 1073741824  ;;  %v1168_v62 = vsel %vm1120_vm2, %v2580_v32, 1073741824  ;;  %vm1122_vm4 = vcmp.eq.f32.partialorder %v2345_v2, %v2564_v37  ;;  %vm1123_vm6 = vcmp.eq.f32.partialorder %v2366_v17, %v2564_v37 }
 0x1b7   :  { %3610 = vst [vmem:[#allocation42_spill] sm:$0xff] %v2571_v26  ;;  %1421 = vperm.xlu0 %1870, %v771_v13   ;;  %877 = vperm.xlu1 %1869, %v2571_v26   ;;  %1400 = vst.msk [vmem:[#allocation2 + $0x8] sm:$0xff] %vm22_vm0, %v2571_v26  ;;  %v2601_v13 = vadd.s32 256, %v2557_v1  ;;  %v2606_v26 = vadd.s32 384, %v2557_v1  ;;  %vm1235_vm5 = vcmp.lt.s32.totalorder %v1167_v22, %v1168_v62  ;;  %v2624_v3 = vadd.s32 640, %v2557_v1 }
 0x1b8   :  { %v2587_v10 = vpop.xlane.xlu1 %805  ;;  %v1236_v43 = vsel %vm1235_vm5, %v1167_v22, %v1168_v62  ;;  %vm1124_vm10 = vcmp.eq.f32.partialorder %v2375_v25, %v2564_v37  ;;  %vm1125_vm2 = vcmp.eq.f32.partialorder %v2400_v31, %v2564_v37  ;;  %vm1114_vm5 = vcmp.eq.f32.partialorder %v2324_v55, %v2550_v48 }
 0x1b9   :  { %3612 = vst [vmem:[#allocation44_spill] sm:$0xff] %v2587_v10  ;;  %v2598_v21 = vmax.f32 %v2577_v14, %v2587_v10  ;;  %v1169_v50 = vsel %vm1121_vm3, %v2601_v13, 1073741824  ;;  %vm1127_vm8 = vcmp.eq.f32.partialorder %v2317_v52, %v2587_v10  ;;  %vm1128_vm9 = vcmp.eq.f32.partialorder %v2320_v53, %v2587_v10 }
 0x1ba   :  { %vm1237_vm7 = vcmp.lt.s32.totalorder %v1236_v43, %v1169_v50  ;;  %v1170_v22 = vsel %vm1122_vm4, %v2606_v26, 1073741824  ;;  %v2644_v52 = vadd.s32 896, %v2557_v1  ;;  %v1171_v53 = vsel %vm1123_vm6, %v2609_v12, 1073741824 }
 0x1bb   :  { %3613 = vst [vmem:[#allocation45_spill] sm:$0xff] %v2598_v21  ;;  %1427 = vperm.xlu0 %1870, %v773_v47   ;;  %1401 = vst.msk [vmem:[#allocation2 + $0x10] sm:$0xff] %vm22_vm0, %v2598_v21  ;;  %882 = vperm.xlu1 %1869, %v2598_v21   ;;  %v1238_v62 = vsel %vm1237_vm7, %v1236_v43, %v1169_v50  ;;  %v2641_v21 = vld [vmem:[#allocation2 + $0x20] sm:$0xff]  ;;  %v1175_v50 = vsel %vm1127_vm8, %v2557_v1, 1073741824  ;;  %v1176_v2 = vsel %vm1128_vm9, %v2580_v32, 1073741824  ;;  %v1159_v25 = vsel %vm1111_vm13, %v2557_v1, 1073741824 }
 0x1bc   :  { %v2621_v42 = vpop.xlane.xlu1 %814  ;;  %3617 = vst [vmem:[#allocation49_spill] sm:$0xff] %v2641_v21  ;;  %vm1239_vm11 = vcmp.lt.s32.totalorder %v1238_v62, %v1170_v22  ;;  %vm1129_vm1 = vcmp.eq.f32.partialorder %v2342_v0, %v2587_v10  ;;  %vm1263_vm4 = vcmp.lt.s32.totalorder %v1175_v50, %v1176_v2  ;;  %vm1130_vm6 = vcmp.eq.f32.partialorder %v2372_v24, %v2587_v10 }
 0x1bd   :  { %3615 = vst [vmem:[#allocation47_spill] sm:$0xff] %v2621_v42  ;;  %v2632_v47 = vmax.f32 %v2603_v5, %v2621_v42  ;;  %v1240_v43 = vsel %vm1239_vm11, %v1238_v62, %v1170_v22  ;;  %v1172_v62 = vsel %vm1124_vm10, %v2624_v3, 1073741824  ;;  %v1177_v0 = vsel %vm1129_vm1, %v2601_v13, 1073741824 }
 0x1be   :  { %vm1241_vm12 = vcmp.lt.s32.totalorder %v1240_v43, %v1171_v53  ;;  %v1264_v5 = vsel %vm1263_vm4, %v1175_v50, %v1176_v2  ;;  %vm1115_vm7 = vcmp.eq.f32.partialorder %v2348_v4, %v2550_v48  ;;  %vm1131_vm8 = vcmp.eq.f32.partialorder %v2412_v33, %v2587_v10 }
 0x1bf   :  { %3616 = vst [vmem:[#allocation48_spill] sm:$0xff] %v2632_v47  ;;  %1402 = vst.msk [vmem:[#allocation2 + $0x18] sm:$0xff] %vm22_vm0, %v2632_v47  ;;  %887 = vperm.xlu1 %1869, %v2632_v47   ;;  %v1242_v17 = vsel %vm1241_vm12, %v1240_v43, %v1171_v53  ;;  %vm1265_vm9 = vcmp.lt.s32.totalorder %v1264_v5, %v1177_v0  ;;  %v1178_v2 = vsel %vm1130_vm6, %v2606_v26, 1073741824 }
 0x1c0   :  { %v2656_v14 = vpop.xlane.xlu0 %823  ;;  %vm1243_vm3 = vcmp.lt.s32.totalorder %v1242_v17, %v1172_v62  ;;  %v1266_v50 = vsel %vm1265_vm9, %v1264_v5, %v1177_v0  ;;  %vm1132_vm11 = vcmp.eq.f32.partialorder %v2424_v8, %v2587_v10  ;;  %v770_v0 = vld [vmem:[%s3483_s3 + $0x10] sm:$0xff]  ;;  %v1179_v5 = vsel %vm1131_vm8, %v2609_v12, 1073741824 }
 0x1c1   :  { %3618 = vst [vmem:[#allocation50_spill] sm:$0xff] %v2656_v14  ;;  %v2668_v22 = vmax.f32 %v2641_v21, %v2656_v14  ;;  %v1244_v43 = vsel %vm1243_vm3, %v1242_v17, %v1172_v62  ;;  %v1173_v17 = vsel %vm1125_vm2, %v2635_v63, 1073741824  ;;  %v1160_v62 = vsel %vm1112_vm14, %v2580_v32, 1073741824 }
 0x1c2   :  { %vm1245_vm10 = vcmp.lt.s32.totalorder %v1244_v43, %v1173_v17  ;;  %vm1267_vm12 = vcmp.lt.s32.totalorder %v1266_v50, %v1178_v2  ;;  %vm1143_vm13 = vcmp.eq.f32.partialorder %v2378_v30, %v2656_v14  ;;  %vm1144_vm1 = vcmp.eq.f32.partialorder %v2381_v41, %v2656_v14 }
 0x1c3   :  { %3620 = vst [vmem:[#allocation52_spill] sm:$0xff] %v2668_v22  ;;  %892 = vperm.xlu1 %1869, %v2668_v22   ;;  %1403 = vst.msk [vmem:[#allocation2 + $0x20] sm:$0xff] %vm22_vm0, %v2668_v22  ;;  %vm1126_vm2 = vcmp.eq.f32.partialorder %v2427_v15, %v2564_v37  ;;  %v1268_v22 = vsel %vm1267_vm12, %v1266_v50, %v1178_v2  ;;  %v1161_v21 = vsel %vm1113_vm15, %v2601_v13, 1073741824  ;;  %v1162_v8 = vsel %vm1114_vm5, %v2606_v26, 1073741824 }
 0x1c4   :  { %v2676_v47 = vpop.xlane.xlu1 %832  ;;  %vm1133_vm14 = vcmp.eq.f32.partialorder %v2430_v18, %v2587_v10  ;;  %vm1269_vm3 = vcmp.lt.s32.totalorder %v1268_v22, %v1179_v5  ;;  %v1180_v33 = vsel %vm1132_vm11, %v2624_v3, 1073741824  ;;  %v1191_v2 = vsel %vm1143_vm13, %v2557_v1, 1073741824 }
 0x1c5   :  { %3621 = vst [vmem:[#allocation53_spill] sm:$0xff] %v2676_v47  ;;  %v2689_v53 = vmax.f32 %v2658_v59, %v2676_v47  ;;  %v1270_v24 = vsel %vm1269_vm3, %v1268_v22, %v1179_v5  ;;  %v1192_v50 = vsel %vm1144_vm1, %v2580_v32, 1073741824  ;;  %v1174_v41 = vsel %vm1126_vm2, %v2644_v52, 1073741824  ;;  %v772_v22 = vld [vmem:[%s3483_s3 + $0x20] sm:$0xff] }
 0x1c6   :  { %vm1271_vm15 = vcmp.lt.s32.totalorder %v1270_v24, %v1180_v33  ;;  %vm1145_vm4 = vcmp.eq.f32.partialorder %v2406_v23, %v2656_v14  ;;  %vm1134_vm6 = vcmp.eq.f32.partialorder %v2453_v34, %v2587_v10  ;;  %vm1146_vm9 = vcmp.eq.f32.partialorder %v2438_v40, %v2656_v14 }
 0x1c7   :  { %3622 = vst [vmem:[#allocation54_spill] sm:$0xff] %v2689_v53  ;;  %1404 = vst.msk [vmem:[#allocation2 + $0x28] sm:$0xff] %vm22_vm0, %v2689_v53  ;;  %897 = vperm.xlu1 %1869, %v2689_v53   ;;  %v1246_v53 = vsel %vm1245_vm10, %v1244_v43, %v1173_v17  ;;  %v1163_v43 = vsel %vm1115_vm7, %v2609_v12, 1073741824  ;;  %v1181_v17 = vsel %vm1133_vm14, %v2635_v63, 1073741824  ;;  %vm1147_vm10 = vcmp.eq.f32.partialorder %v2462_v6, %v2656_v14 }
 0x1c8   :  { %vm1247_vm5 = vcmp.lt.s32.totalorder %v1246_v53, %v1174_v41  ;;  %vm1319_vm11 = vcmp.lt.s32.totalorder %v1191_v2, %v1192_v50  ;;  %v1193_v18 = vsel %vm1145_vm4, %v2601_v13, 1073741824  ;;  %vm1207_vm7 = vcmp.lt.s32.totalorder %v1159_v25, %v1160_v62 }
 0x1c9   :  { %v1320_v23 = vsel %vm1319_vm11, %v1191_v2, %v1192_v50  ;;  %v2759_v30 = vsel %vm1247_vm5, %v1246_v53, %v1174_v41  ;;  %v1182_v34 = vsel %vm1134_vm6, %v2644_v52, 1073741824  ;;  %vm1148_vm13 = vcmp.eq.f32.partialorder %v2510_v36, %v2656_v14 }
 0x1ca   :  { %vm1321_vm12 = vcmp.lt.s32.totalorder %v1320_v23, %v1193_v18  ;;  %v1195_v2 = vsel %vm1147_vm10, %v2609_v12, 1073741824  ;;  %vm1136_vm4 = vcmp.eq.f32.partialorder %v2332_v58, %v2621_v42  ;;  %vm1149_vm5 = vcmp.eq.f32.partialorder %v2516_v60, %v2656_v14 }
 0x1cb   :  { %1418 = vperm.xlu1 %1869, %v770_v0   ;;  %v1272_v0 = vsel %vm1271_vm15, %v1270_v24, %v1180_v33  ;;  %v1208_v24 = vsel %vm1207_vm7, %v1159_v25, %v1160_v62  ;;  %v1194_v33 = vsel %vm1146_vm9, %v2606_v26, 1073741824  ;;  %v1322_v40 = vsel %vm1321_vm12, %v1320_v23, %v1193_v18 }
 0x1cc   :  { %vm1273_vm8 = vcmp.lt.s32.totalorder %v1272_v0, %v1181_v17  ;;  %vm1209_vm1 = vcmp.lt.s32.totalorder %v1208_v24, %v1161_v21  ;;  %vm1323_vm14 = vcmp.lt.s32.totalorder %v1322_v40, %v1194_v33  ;;  %vm1135_vm15 = vcmp.eq.f32.partialorder %v2329_v57, %v2621_v42 }
 0x1cd   :  { %v1274_v5 = vsel %vm1273_vm8, %v1272_v0, %v1181_v17  ;;  %v1210_v41 = vsel %vm1209_vm1, %v1208_v24, %v1161_v21  ;;  %v1324_v53 = vsel %vm1323_vm14, %v1322_v40, %v1194_v33  ;;  %v1250_v25 = vshra.s32 %v2759_v30, 16 }
 0x1ce   :  { %vm1275_vm2 = vcmp.lt.s32.totalorder %v1274_v5, %v1182_v34  ;;  %vm1211_vm3 = vcmp.lt.s32.totalorder %v1210_v41, %v1162_v8  ;;  %vm1325_vm6 = vcmp.lt.s32.totalorder %v1324_v53, %v1195_v2  ;;  %vm1150_vm8 = vcmp.eq.f32.partialorder %v2529_v46, %v2656_v14 }
 0x1cf   :  { %1424 = vperm.xlu1 %1869, %v772_v22   ;;  %v1212_v23 = vsel %vm1211_vm3, %v1210_v41, %v1162_v8  ;;  %v2776_v18 = vsel %vm1275_vm2, %v1274_v5, %v1182_v34  ;;  %v1196_v40 = vsel %vm1148_vm13, %v2624_v3, 1073741824  ;;  %v1326_v21 = vsel %vm1325_vm6, %v1324_v53, %v1195_v2 }
 0x1d0   :  { %vm1327_vm9 = vcmp.lt.s32.totalorder %v1326_v21, %v1196_v40  ;;  %vm1213_vm10 = vcmp.lt.s32.totalorder %v1212_v23, %v1163_v43  ;;  %v1183_v62 = vsel %vm1135_vm15, %v2557_v1, 1073741824  ;;  %v1184_v50 = vsel %vm1136_vm4, %v2580_v32, 1073741824 }
 0x1d1   :  { %v1197_v22 = vsel %vm1149_vm5, %v2635_v63, 1073741824  ;;  %v1328_v8 = vsel %vm1327_vm9, %v1326_v21, %v1196_v40  ;;  %vm1116_vm11 = vcmp.eq.f32.partialorder %v2357_v11, %v2550_v48  ;;  %vm1137_vm7 = vcmp.eq.f32.partialorder %v2354_v9, %v2621_v42 }
 0x1d2   :  { %v2791_v34 = vcvt.s32.f32 %v1250_v25  ;;  %v1278_v17 = vshra.s32 %v2776_v18, 16  ;;  %v1198_v0 = vsel %vm1150_vm8, %v2644_v52, 1073741824  ;;  %vm1329_vm12 = vcmp.lt.s32.totalorder %v1328_v8, %v1197_v22 }
 0x1d3   :  { %v1330_v5 = vsel %vm1329_vm12, %v1328_v8, %v1197_v22  ;;  %v1214_v24 = vsel %vm1213_vm10, %v1212_v23, %v1163_v43  ;;  %vm1138_vm13 = vcmp.eq.f32.partialorder %v2388_v20, %v2621_v42  ;;  %vm1291_vm1 = vcmp.lt.s32.totalorder %v1183_v62, %v1184_v50 }
 0x1d4   :  { %vm1331_vm2 = vcmp.lt.s32.totalorder %v1330_v5, %v1198_v0  ;;  %v1164_v33 = vsel %vm1116_vm11, %v2624_v3, 1073741824  ;;  %v1185_v2 = vsel %vm1137_vm7, %v2601_v13, 1073741824  ;;  %v1292_v41 = vsel %vm1291_vm1, %v1183_v62, %v1184_v50 }
 0x1d5   :  { %v2800_v53 = vsel %vm1331_vm2, %v1330_v5, %v1198_v0  ;;  %vm1139_vm14 = vcmp.eq.f32.partialorder %v2433_v19, %v2621_v42  ;;  %vm1140_vm3 = vcmp.eq.f32.partialorder %v2441_v44, %v2621_v42  ;;  %vm1293_vm15 = vcmp.lt.s32.totalorder %v1292_v41, %v1185_v2 }
 0x1d6   :  { %3623 = vst [vmem:[#allocation55_spill] sm:$0xff] %v2800_v53  ;;  %vm1215_vm4 = vcmp.lt.s32.totalorder %v1214_v24, %v1164_v33  ;;  %v1186_v43 = vsel %vm1138_vm13, %v2606_v26, 1073741824  ;;  %v1294_v25 = vsel %vm1293_vm15, %v1292_v41, %v1185_v2  ;;  %vm1151_vm5 = vcmp.eq.f32.partialorder %v2391_v49, %v2676_v47 }
 0x1d7   :  { %v2809_v23 = vcvt.s32.f32 %v1278_v17  ;;  %v1334_v40 = vshra.s32 %v2800_v53, 16  ;;  %vm1295_vm6 = vcmp.lt.s32.totalorder %v1294_v25, %v1186_v43  ;;  %vm1152_vm8 = vcmp.eq.f32.partialorder %v2394_v51, %v2676_v47  ;;  %v3634_v53 = vld [vmem:[#allocation6_spill] sm:$0xff] }
 0x1d8   :  { %vm1117_vm9 = vcmp.eq.f32.partialorder %v2363_v16, %v2550_v48  ;;  %v1187_v21 = vsel %vm1139_vm14, %v2609_v12, 1073741824  ;;  %v1296_v62 = vsel %vm1295_vm6, %v1294_v25, %v1186_v43  ;;  %v1216_v50 = vsel %vm1215_vm4, %v1214_v24, %v1164_v33 }
 0x1d9   :  { %3624 = vst [vmem:[#allocation56_spill] sm:$0xff] %v2809_v23  ;;  %vm1297_vm10 = vcmp.lt.s32.totalorder %v1296_v62, %v1187_v21  ;;  %v1199_v22 = vsel %vm1151_vm5, %v2557_v1, 1073741824  ;;  %v1188_v8 = vsel %vm1140_vm3, %v2624_v3, 1073741824  ;;  %vm1153_vm11 = vcmp.eq.f32.partialorder %v2421_v7, %v2676_v47 }
 0x1da   :  { %1253 = vmin.xlane.f32.xlu0 %v2791_v34  ;;  %v1298_v17 = vsel %vm1297_vm10, %v1296_v62, %v1187_v21  ;;  %v1200_v0 = vsel %vm1152_vm8, %v2580_v32, 1073741824  ;;  %v2826_v5 = vcvt.s32.f32 %v1334_v40  ;;  %v1165_v2 = vsel %vm1117_vm9, %v2635_v63, 1073741824 }
 0x1db   :  { %vm1299_vm7 = vcmp.lt.s32.totalorder %v1298_v17, %v1188_v8  ;;  %vm1217_vm12 = vcmp.lt.s32.totalorder %v1216_v50, %v1165_v2  ;;  %vm1141_vm13 = vcmp.eq.f32.partialorder %v2456_v35, %v2621_v42  ;;  %vm1154_vm1 = vcmp.eq.f32.partialorder %v2450_v28, %v2676_v47 }
 0x1dc   :  { %3625 = vst [vmem:[#allocation57_spill] sm:$0xff] %v2826_v5  ;;  %vm1347_vm2 = vcmp.lt.s32.totalorder %v1199_v22, %v1200_v0  ;;  %v1300_v24 = vsel %vm1299_vm7, %v1298_v17, %v1188_v8  ;;  %v1201_v33 = vsel %vm1153_vm11, %v2601_v13, 1073741824  ;;  %vm1118_vm14 = vcmp.eq.f32.partialorder %v2397_v27, %v2550_v48 }
 0x1dd   :  { %v1348_v41 = vsel %vm1347_vm2, %v1199_v22, %v1200_v0  ;;  %vm1155_vm3 = vcmp.eq.f32.partialorder %v2519_v29, %v2676_v47  ;;  %v1218_v43 = vsel %vm1217_vm12, %v1216_v50, %v1165_v2  ;;  %v1189_v25 = vsel %vm1141_vm13, %v2635_v63, 1073741824 }
 0x1de   :  { %1281 = vmin.xlane.f32.xlu0 %v2809_v23  ;;  %vm1349_vm15 = vcmp.lt.s32.totalorder %v1348_v41, %v1201_v33  ;;  %v1202_v40 = vsel %vm1154_vm1, %v2606_v26, 1073741824  ;;  %vm1301_vm4 = vcmp.lt.s32.totalorder %v1300_v24, %v1189_v25  ;;  %vm1156_vm5 = vcmp.eq.f32.partialorder %v2523_v61, %v2676_v47 }
 0x1df   :  { %v1350_v21 = vsel %vm1349_vm15, %v1348_v41, %v1201_v33  ;;  %v1166_v62 = vsel %vm1118_vm14, %v2644_v52, 1073741824  ;;  %v1203_v22 = vsel %vm1155_vm3, %v2609_v12, 1073741824  ;;  %vm1142_vm9 = vcmp.eq.f32.partialorder %v2513_v54, %v2621_v42 }
 0x1e0   :  { %vm1351_vm6 = vcmp.lt.s32.totalorder %v1350_v21, %v1202_v40  ;;  %vm1219_vm8 = vcmp.lt.s32.totalorder %v1218_v43, %v1166_v62  ;;  %vm1157_vm10 = vcmp.eq.f32.partialorder %v2532_v56, %v2676_v47  ;;  %v1302_v50 = vsel %vm1301_vm4, %v1300_v24, %v1189_v25 }
 0x1e1   :  { %v1352_v8 = vsel %vm1351_vm6, %v1350_v21, %v1202_v40  ;;  %v1204_v17 = vsel %vm1156_vm5, %v2624_v3, 1073741824  ;;  %v2850_v2 = vsel %vm1219_vm8, %v1218_v43, %v1166_v62  ;;  %v1190_v33 = vsel %vm1142_vm9, %v2644_v52, 1073741824  ;;  %v3626_v21 = vld [vmem:[#allocation36_spill] sm:$0xff] }
 0x1e2   :  { %1337 = vmin.xlane.f32.xlu0 %v2826_v5  ;;  %vm1353_vm11 = vcmp.lt.s32.totalorder %v1352_v8, %v1203_v22  ;;  %v1205_v41 = vsel %vm1157_vm10, %v2635_v63, 1073741824  ;;  %vm1303_vm12 = vcmp.lt.s32.totalorder %v1302_v50, %v1190_v33  ;;  %vm1158_vm13 = vcmp.eq.f32.partialorder %v3626_v21, %v2676_v47 }
 0x1e3   :  { %v1354_v0 = vsel %vm1353_vm11, %v1352_v8, %v1203_v22  ;;  %v1222_v48 = vshra.s32 %v2850_v2, 16  ;;  %v2857_v24 = vsel %vm1303_vm12, %v1302_v50, %v1190_v33  ;;  %v1206_v25 = vsel %vm1158_vm13, %v2644_v52, 1073741824  ;;  %v3629_v8 = vld [vmem:[#allocation40_spill] sm:$0xff]  ;;  %v3631_v50 = vld [vmem:[#allocation46_spill] sm:$0xff]  ;;  %v3632_v33 = vld [vmem:[#allocation43_spill] sm:$0xff] }
 0x1e4   :  { %vm1355_vm7 = vcmp.lt.s32.totalorder %v1354_v0, %v1204_v17  ;;  %v1306_v62 = vshra.s32 %v2857_v24, 16  ;;  %vm1376_vm14 = vcmp.gt.f32.partialorder %v2564_v37, %v3629_v8  ;;  %vm1378_vm3 = vcmp.gt.f32.partialorder %v2621_v42, %v3631_v50 }
 0x1e5   :  { %v1356_v40 = vsel %vm1355_vm7, %v1354_v0, %v1204_v17  ;;  %v2860_v43 = vcvt.s32.f32 %v1222_v48  ;;  %vm1377_vm15 = vcmp.gt.f32.partialorder %v2587_v10, %v3632_v33  ;;  %vm1380_vm4 = vcmp.gt.f32.partialorder %v2676_v47, %v2658_v59 }
 0x1e6   :  { %vm1357_vm1 = vcmp.lt.s32.totalorder %v1356_v40, %v1205_v41  ;;  %v2868_v17 = vcvt.s32.f32 %v1306_v62 }
 0x1e7   :  { %v1358_v14 = vsel %vm1357_vm1, %v1356_v40, %v1205_v41  ;;  %3627 = vst [vmem:[#allocation58_spill] sm:$0xff] %v2860_v43 }
 0x1e8   :  { %vm1359_vm2 = vcmp.lt.s32.totalorder %v1358_v14, %v1206_v25  ;;  %3630 = vst [vmem:[#allocation60_spill] sm:$0xff] %v2868_v17 }
 0x1e9   :  { %v2863_v22 = vsel %vm1359_vm2, %v1358_v14, %v1206_v25  ;;  %v2881_v14 = vpop.permute.xlu1 %1412 }
 0x1ea   :  { %3628 = vst [vmem:[#allocation59_spill] sm:$0xff] %v2863_v22  ;;  %v1362_v0 = vshra.s32 %v2863_v22, 16  ;;  %vm1429_vm13 = vcmp.eq.s32.totalorder %v2557_v1, %v2881_v14  ;;  %vm1430_vm1 = vcmp.eq.s32.totalorder %v2580_v32, %v2881_v14  ;;  %vm1431_vm2 = vcmp.eq.s32.totalorder %v2601_v13, %v2881_v14 }
 0x1ec   :  { %v2878_v48 = vcvt.s32.f32 %v1362_v0 }
 0x1ed   :  { %v2883_v41 = vpop.permute.xlu1 %1415 }
 0x1ee   :  { %3633 = vst [vmem:[#allocation61_spill] sm:$0xff] %v2878_v48  ;;  %vm1437_vm5 = vcmp.eq.s32.totalorder %v2557_v1, %v2883_v41  ;;  %vm1438_vm6 = vcmp.eq.s32.totalorder %v2580_v32, %v2883_v41  ;;  %vm1439_vm8 = vcmp.eq.s32.totalorder %v2601_v13, %v2883_v41  ;;  %vm1440_vm9 = vcmp.eq.s32.totalorder %v2606_v26, %v2883_v41 }
 0x1ef   :  { %vm1441_vm10 = vcmp.eq.s32.totalorder %v2609_v12, %v2883_v41  ;;  %vm1442_vm11 = vcmp.eq.s32.totalorder %v2624_v3, %v2883_v41  ;;  %vm1443_vm7 = vcmp.eq.s32.totalorder %v2635_v63, %v2883_v41  ;;  %vm1444_vm12 = vcmp.eq.s32.totalorder %v2644_v52, %v2883_v41 }
 0x1f3   :  { %1225 = vmin.xlane.f32.xlu1 %v2860_v43 }
 0x1f7   :  { %1309 = vmin.xlane.f32.xlu1 %v2868_v17 }
 0x1fb   :  { %1365 = vmin.xlane.f32.xlu1 %v2878_v48 }
 0x232   :  { %v873_v40 = vpop.permute.xlu0 %872 }
 0x233   :  { %v900_v25 = vsub.f32 %v2291_v38, %v873_v40  ;;  %v901_v62 = vsub.f32 %v2294_v39, %v873_v40  ;;  %v902_v10 = vsub.f32 %v2307_v45, %v873_v40  ;;  %v903_v42 = vsub.f32 %v2324_v55, %v873_v40 }
 0x234   :  { %v904_v37 = vsub.f32 %v2348_v4, %v873_v40  ;;  %v905_v5 = vsub.f32 %v2357_v11, %v873_v40 }
 0x235   :  { %v948_v47 = vmul.f32 1.442695, %v900_v25  ;;  %v950_v59 = vmul.f32 1.442695, %v901_v62  ;;  %v952_v0 = vmul.f32 1.442695, %v902_v10  ;;  %v906_v10 = vsub.f32 %v2363_v16, %v873_v40 }
 0x236   :  { %v2889_v33 = vpop.permute.xlu1 %877  ;;  %v954_v50 = vmul.f32 1.442695, %v903_v42  ;;  %v956_v22 = vmul.f32 1.442695, %v904_v37  ;;  %v3635_v25 = vld [vmem:[#allocation7_spill] sm:$0xff]  ;;  %v3636_v42 = vld [vmem:[#allocation8_spill] sm:$0xff] }
 0x237   :  { %1889 = vpow2.f32 %v948_v47  ;;  %v908_v48 = vsub.f32 %v3634_v53, %v2889_v33  ;;  %v909_v62 = vsub.f32 %v3635_v25, %v2889_v33  ;;  %v958_v47 = vmul.f32 1.442695, %v905_v5 }
 0x238   :  { %1891 = vpow2.f32 %v950_v59  ;;  %v910_v59 = vsub.f32 %v3636_v42, %v2889_v33  ;;  %v960_v21 = vmul.f32 1.442695, %v906_v10 }
 0x239   :  { %1893 = vpow2.f32 %v952_v0  ;;  %v964_v17 = vmul.f32 1.442695, %v908_v48  ;;  %v966_v43 = vmul.f32 1.442695, %v909_v62  ;;  %v3637_v62 = vld [vmem:[#allocation13_spill] sm:$0xff] }
 0x23a   :  { %v2892_v8 = vpop.permute.xlu1 %882  ;;  %1895 = vpow2.f32 %v954_v50  ;;  %v907_v50 = vsub.f32 %v2397_v27, %v873_v40  ;;  %v968_v5 = vmul.f32 1.442695, %v910_v59  ;;  %v911_v56 = vsub.f32 %v3637_v62, %v2889_v33  ;;  %v3639_v59 = vld [vmem:[#allocation18_spill] sm:$0xff] }
 0x23b   :  { %1897 = vpow2.f32 %v956_v22 }
 0x23c   :  { %1899 = vpow2.f32 %v958_v47 }
 0x23d   :  { %1901 = vpow2.f32 %v964_v17  ;;  %v3638_v17 = vld [vmem:[#allocation16_spill] sm:$0xff] }
 0x23e   :  { %v2899_v23 = vpop.permute.xlu1 %887  ;;  %1903 = vpow2.f32 %v966_v43  ;;  %v912_v43 = vsub.f32 %v3638_v17, %v2889_v33 }
 0x23f   :  { %v924_v0 = vsub.f32 %v2329_v57, %v2899_v23  ;;  %v925_v37 = vsub.f32 %v2332_v58, %v2899_v23  ;;  %1905 = vpow2.f32 %v960_v21  ;;  %v962_v57 = vmul.f32 1.442695, %v907_v50 }
 0x240   :  { %1907 = vpow2.f32 %v968_v5  ;;  %v926_v40 = vsub.f32 %v2354_v9, %v2899_v23  ;;  %v913_v21 = vsub.f32 %v3639_v59, %v2889_v33 }
 0x241   :  { %v1890_v46 = vpop.eup %1889  ;;  %v996_v16 = vmul.f32 1.442695, %v924_v0  ;;  %v998_v22 = vmul.f32 1.442695, %v925_v37  ;;  %v1249_v37 = vand.u32 65535, %v2759_v30  ;;  %v1277_v30 = vand.u32 65535, %v2776_v18 }
 0x242   :  { %v1892_v60 = vpop.eup %1891  ;;  %v1000_v0 = vmul.f32 1.442695, %v926_v40  ;;  %v974_v40 = vmul.f32 1.442695, %v913_v21  ;;  %v929_v18 = vsub.f32 %v2441_v44, %v2899_v23 }
 0x243   :  { %v1044_v36 = vadd.f32 %v1892_v60, %v1890_v46  ;;  %v1894_v48 = vpop.eup %1893  ;;  %1909 = vpow2.f32 %v996_v16  ;;  %v970_v60 = vmul.f32 1.442695, %v911_v56  ;;  %v972_v16 = vmul.f32 1.442695, %v912_v43 }
 0x244   :  { %v1896_v6 = vpop.eup %1895  ;;  %1911 = vpow2.f32 %v998_v22  ;;  %v915_v22 = vsub.f32 %v2427_v15, %v2889_v33 }
 0x245   :  { %v1045_v11 = vadd.f32 %v1894_v48, %v1044_v36  ;;  %v1898_v47 = vpop.eup %1897  ;;  %1913 = vpow2.f32 %v962_v57  ;;  %v927_v36 = vsub.f32 %v2388_v20, %v2899_v23  ;;  %v928_v57 = vsub.f32 %v2433_v19, %v2899_v23 }
 0x246   :  { %v1900_v50 = vpop.eup %1899  ;;  %1915 = vpow2.f32 %v970_v60 }
 0x247   :  { %v1046_v10 = vadd.f32 %v1896_v6, %v1045_v11  ;;  %v914_v11 = vsub.f32 %v2400_v31, %v2889_v33  ;;  %v1221_v6 = vand.u32 65535, %v2850_v2  ;;  %v1902_v5 = vpop.eup %1901  ;;  %1917 = vpow2.f32 %v1000_v0 }
 0x248   :  { %v1904_v48 = vpop.eup %1903  ;;  %1919 = vpow2.f32 %v972_v16  ;;  %v1004_v21 = vmul.f32 1.442695, %v928_v57  ;;  %v978_v0 = vmul.f32 1.442695, %v915_v22  ;;  %v1305_v16 = vand.u32 65535, %v2857_v24 }
 0x249   :  { %v1047_v46 = vadd.f32 %v1898_v47, %v1046_v10  ;;  %v1002_v10 = vmul.f32 1.442695, %v927_v36  ;;  %v2928_v47 = vcvt.s32.f32 %v1249_v37  ;;  %v1906_v43 = vpop.eup %1905  ;;  %v976_v2 = vmul.f32 1.442695, %v914_v11 }
 0x24a   :  { %v2930_v27 = vcvt.s32.f32 %v1221_v6  ;;  %v1053_v60 = vadd.f32 %v1904_v48, %v1902_v5  ;;  %1921 = vpow2.f32 %v974_v40  ;;  %v2938_v37 = vcvt.s32.f32 %v1277_v30  ;;  %v3641_v5 = vld [vmem:[#allocation9_spill] sm:$0xff]  ;;  %v3642_v40 = vld [vmem:[#allocation10_spill] sm:$0xff] }
 0x24b   :  { %v1048_v56 = vadd.f32 %v1900_v50, %v1047_v46  ;;  %v1908_v46 = vpop.eup %1907  ;;  %v2934_v50 = vpop.permute.xlu1 %892  ;;  %1923 = vpow2.f32 %v1002_v10  ;;  %v930_v57 = vsub.f32 %v2456_v35, %v2899_v23  ;;  %v1006_v24 = vmul.f32 1.442695, %v929_v18 }
 0x24c   :  { %3640 = vst [vmem:[#allocation6_spill] sm:$0xff] %v2938_v37  ;;  %1925 = vpow2.f32 %v976_v2  ;;  %v1054_v22 = vadd.f32 %v1908_v46, %v1053_v60  ;;  %v917_v30 = vsub.f32 %v3642_v40, %v2892_v8  ;;  %v2959_v2 = vcvt.s32.f32 %v1305_v16 }
 0x24d   :  { %v1049_v33 = vadd.f32 %v1906_v43, %v1048_v56  ;;  %v1910_v36 = vpop.eup %1909  ;;  %v916_v56 = vsub.f32 %v3641_v5, %v2892_v8  ;;  %1927 = vpow2.f32 %v1004_v21  ;;  %v1485_v46 = vsel %vm1437_vm5, %v3634_v53, 0.0 }
 0x24e   :  { %v1912_v11 = vpop.eup %1911  ;;  %1929 = vpow2.f32 %v978_v0  ;;  %3643 = vst [vmem:[#allocation7_spill] sm:$0xff] %v2959_v2  ;;  %v1486_v18 = vsel %vm1438_vm6, %v3635_v25, 0.0  ;;  %v1487_v21 = vsel %vm1439_vm8, %v3636_v42, 0.0  ;;  %v1008_v16 = vmul.f32 1.442695, %v930_v57 }
 0x24f   :  { %v1914_v6 = vpop.eup %1913  ;;  %v1071_v10 = vadd.f32 %v1912_v11, %v1910_v36  ;;  %v2957_v43 = vpop.permute.xlu1 %897  ;;  %v980_v60 = vmul.f32 1.442695, %v916_v56  ;;  %v2981_v36 = vsel %vm1440_vm9, %v3637_v62, 0.0  ;;  %v931_v11 = vsub.f32 %v2513_v54, %v2899_v23 }
 0x250   :  { %v1050_v48 = vadd.f32 %v1914_v6, %v1049_v33  ;;  %v1916_v33 = vpop.eup %1915  ;;  %1931 = vpow2.f32 %v1006_v24  ;;  %v982_v25 = vmul.f32 1.442695, %v917_v30  ;;  %v940_v56 = vsub.f32 %v2391_v49, %v2957_v43 }
 0x251   :  { %v1918_v0 = vpop.eup %1917  ;;  %v1055_v53 = vadd.f32 %v1916_v33, %v1054_v22  ;;  %v2991_v42 = vsel %vm1441_vm10, %v3638_v17, 0.0  ;;  %v941_v62 = vsub.f32 %v2394_v51, %v2957_v43  ;;  %v2999_v23 = vsel %vm1442_vm11, %v3639_v59, 0.0  ;;  %v3644_v17 = vld [vmem:[#allocation12_spill] sm:$0xff] }
 0x252   :  { %1051 = vadd.xlane.f32.xlu0 %v1050_v48  ;;  %v1920_v6 = vpop.eup %1919  ;;  %v1072_v48 = vadd.f32 %v1918_v0, %v1071_v10  ;;  %v3005_v57 = vsel %vm1443_vm7, %v2400_v31, 0.0  ;;  %v918_v30 = vsub.f32 %v3644_v17, %v2892_v8  ;;  %1933 = vpow2.f32 %v980_v60  ;;  %v3015_v0 = vpop.permute.xlu0 %1421  ;;  %v3646_v60 = vld [vmem:[#allocation19_spill] sm:$0xff] }
 0x253   :  { %v1056_v22 = vadd.f32 %v1920_v6, %v1055_v53  ;;  %v3013_v10 = vsel %vm1444_vm12, %v2427_v15, 0.0  ;;  %v1534_v33 = vadd.f32 %v1486_v18, %v1485_v46  ;;  %1935 = vpow2.f32 %v1008_v16  ;;  %v3647_v15 = vld [vmem:[#allocation20_spill] sm:$0xff]  ;;  %v3648_v16 = vld [vmem:[#allocation17_spill] sm:$0xff] }
 0x254   :  { %v1922_v24 = vpop.eup %1921  ;;  %3645 = vst [vmem:[#allocation8_spill] sm:$0xff] %v3013_v10  ;;  %v1010_v6 = vmul.f32 1.442695, %v931_v11  ;;  %1937 = vpow2.f32 %v982_v25  ;;  %v932_v54 = vsub.f32 %v3646_v60, %v2934_v50  ;;  %v1028_v35 = vmul.f32 1.442695, %v940_v56 }
 0x255   :  { %v1924_v59 = vpop.eup %1923  ;;  %v1057_v53 = vadd.f32 %v1922_v24, %v1056_v22  ;;  %v933_v46 = vsub.f32 %v3647_v15, %v2934_v50  ;;  %v1030_v18 = vmul.f32 1.442695, %v941_v62  ;;  %v919_v22 = vsub.f32 %v3648_v16, %v2892_v8 }
 0x256   :  { %v1926_v31 = vpop.eup %1925  ;;  %v1073_v37 = vadd.f32 %v1924_v59, %v1072_v48  ;;  %v984_v24 = vmul.f32 1.442695, %v918_v30  ;;  %v942_v56 = vsub.f32 %v2421_v7, %v2957_v43  ;;  %1939 = vpow2.f32 %v1010_v6 }
 0x257   :  { %v1928_v41 = vpop.eup %1927  ;;  %v1058_v10 = vadd.f32 %v1926_v31, %v1057_v53  ;;  %v1535_v59 = vadd.f32 %v1534_v33, %v1487_v21  ;;  %v1012_v62 = vmul.f32 1.442695, %v932_v54  ;;  %1941 = vpow2.f32 %v1028_v35  ;;  %v3650_v21 = vld [vmem:[#allocation23_spill] sm:$0xff] }
 0x258   :  { %v1930_v11 = vpop.eup %1929  ;;  %v1074_v25 = vadd.f32 %v1928_v41, %v1073_v37  ;;  %v1477_v53 = vsel %vm1429_vm13, %v2291_v38, 0.0  ;;  %v1478_v31 = vsel %vm1430_vm1, %v2294_v39, 0.0  ;;  %v3036_v37 = vpop.permute.xlu0 %1427  ;;  %v3649_v41 = vld [vmem:[#allocation22_spill] sm:$0xff]  ;;  %v1014_v2 = vmul.f32 1.442695, %v933_v46 }
 0x259   :  { %v1059_v48 = vadd.f32 %v1930_v11, %v1058_v10  ;;  %v934_v44 = vsub.f32 %v3649_v41, %v2934_v50  ;;  %1943 = vpow2.f32 %v1030_v18  ;;  %v920_v54 = vsub.f32 %v3650_v21, %v2892_v8 }
 0x25a   :  { %v1932_v30 = vpop.eup %1931  ;;  %1945 = vpow2.f32 %v984_v24  ;;  %v986_v35 = vmul.f32 1.442695, %v919_v22  ;;  %vm1432_vm5 = vcmp.eq.s32.totalorder %v2606_v26, %v2881_v14  ;;  %v943_v38 = vsub.f32 %v2450_v28, %v2957_v43 }
 0x25b   :  { %1060 = vadd.xlane.f32.xlu1 %v1059_v48  ;;  %v1075_v10 = vadd.f32 %v1932_v30, %v1074_v25  ;;  %v1032_v39 = vmul.f32 1.442695, %v942_v56  ;;  %vm1433_vm6 = vcmp.eq.s32.totalorder %v2609_v12, %v2881_v14  ;;  %vm1434_vm8 = vcmp.eq.s32.totalorder %v2624_v3, %v2881_v14  ;;  %v3652_v25 = vld [vmem:[#allocation24_spill] sm:$0xff] }
 0x25c   :  { %v1934_v33 = vpop.eup %1933  ;;  %1947 = vpow2.f32 %v1012_v62  ;;  %v1536_v6 = vadd.f32 %v1535_v59, %v2981_v36  ;;  %v1479_v46 = vsel %vm1431_vm2, %v2307_v45, 0.0  ;;  %v1525_v18 = vadd.f32 %v1478_v31, %v1477_v53  ;;  %v3653_v45 = vld [vmem:[#allocation26_spill] sm:$0xff]  ;;  %v3654_v53 = vld [vmem:[#allocation25_spill] sm:$0xff] }
 0x25d   :  { %v1936_v11 = vpop.eup %1935  ;;  %1949 = vpow2.f32 %v1014_v2  ;;  %v1016_v22 = vmul.f32 1.442695, %v934_v44  ;;  %v921_v56 = vsub.f32 %v3652_v25, %v2892_v8  ;;  %v988_v48 = vmul.f32 1.442695, %v920_v54 }
 0x25e   :  { %v1938_v30 = vpop.eup %1937  ;;  %v1076_v36 = vadd.f32 %v1936_v11, %v1075_v10  ;;  %1951 = vpow2.f32 %v986_v35  ;;  %v944_v59 = vsub.f32 %v2519_v29, %v2957_v43  ;;  %v935_v62 = vsub.f32 %v3653_v45, %v2934_v50 }
 0x25f   :  { %1953 = vpow2.f32 %v1032_v39  ;;  %v1034_v44 = vmul.f32 1.442695, %v943_v38  ;;  %v922_v31 = vsub.f32 %v3654_v53, %v2892_v8  ;;  %vm1435_vm10 = vcmp.eq.s32.totalorder %v2635_v63, %v2881_v14 }
 0x260   :  { %v1526_v54 = vadd.f32 %v1525_v18, %v1479_v46  ;;  %v1940_v35 = vpop.eup %1939  ;;  %1955 = vpow2.f32 %v1016_v22  ;;  %v990_v10 = vmul.f32 1.442695, %v921_v56  ;;  %v1062_v39 = vadd.f32 %v1938_v30, %v1934_v33  ;;  %v3655_v46 = vld [vmem:[#allocation30_spill] sm:$0xff]  ;;  %v3656_v22 = vld [vmem:[#allocation28_spill] sm:$0xff] }
 0x261   :  { %v1942_v38 = vpop.eup %1941  ;;  %v1077_v11 = vadd.f32 %v1940_v35, %v1076_v36  ;;  %1957 = vpow2.f32 %v988_v48  ;;  %v1018_v45 = vmul.f32 1.442695, %v935_v62  ;;  %v936_v33 = vsub.f32 %v3655_v46, %v2934_v50  ;;  %v3657_v30 = vld [vmem:[#allocation14_spill] sm:$0xff]  ;;  %v3658_v62 = vld [vmem:[#allocation35_spill] sm:$0xff] }
 0x262   :  { %1959 = vpow2.f32 %v1034_v44  ;;  %v923_v56 = vsub.f32 %v3656_v22, %v2892_v8  ;;  %v992_v48 = vmul.f32 1.442695, %v922_v31  ;;  %v1482_v36 = vsel %vm1434_vm8, %v3657_v30, 0.0 }
 0x263   :  { %v1944_v53 = vpop.eup %1943  ;;  %1961 = vpow2.f32 %v990_v10  ;;  %vm1453_vm11 = vcmp.eq.s32.totalorder %v2557_v1, %v3015_v0  ;;  %vm1454_vm7 = vcmp.eq.s32.totalorder %v2580_v32, %v3015_v0  ;;  %v1020_v10 = vmul.f32 1.442695, %v936_v33 }
 0x264   :  { %v1946_v18 = vpop.eup %1945  ;;  %v1089_v35 = vadd.f32 %v1944_v53, %v1942_v38  ;;  %v3661_v53 = vld [vmem:[#allocation15_spill] sm:$0xff]  ;;  %vm1455_vm12 = vcmp.eq.s32.totalorder %v2601_v13, %v3015_v0  ;;  %vm1456_vm2 = vcmp.eq.s32.totalorder %v2606_v26, %v3015_v0  ;;  %vm1470_vm8 = vcmp.eq.s32.totalorder %v2580_v32, %v3036_v37 }
 0x265   :  { %v3104_v38 = vsel %vm1435_vm10, %v3661_v53, 0.0  ;;  %vm1458_vm10 = vcmp.eq.s32.totalorder %v2624_v3, %v3015_v0 }
 0x266   :  { %v1948_v44 = vpop.eup %1947 }
 0x267   :  { %v3055_v24 = vpop.xlane.xlu0 %1253  ;;  %v1950_v8 = vpop.eup %1949 }
 0x268   :  { %3651 = vst [vmem:[#allocation13_spill] sm:$0xff] %v3055_v24  ;;  %vm1255_vm9 = vcmp.eq.f32.partialorder %v2791_v34, %v3055_v24  ;;  %v1480_v34 = vsel %vm1432_vm5, %v2324_v55, 0.0  ;;  %v1481_v24 = vsel %vm1433_vm6, %v2348_v4, 0.0  ;;  %v1537_v55 = vadd.f32 %v1536_v6, %v2991_v42 }
 0x269   :  { %v1256_v2 = vsel %vm1255_vm9, %v2928_v47, inf  ;;  %v945_v47 = vsub.f32 %v2523_v61, %v2957_v43  ;;  %v1527_v4 = vadd.f32 %v1526_v54, %v1480_v34  ;;  %v946_v42 = vsub.f32 %v3658_v62, %v2957_v43  ;;  %v3659_v34 = vld [vmem:[#allocation31_spill] sm:$0xff]  ;;  %v3106_v62 = vpop.permute.xlu1 %1418 }
 0x26a   :  { %1257 = vmin.xlane.f32.xlu1 %v1256_v2  ;;  %v1036_v2 = vmul.f32 1.442695, %v944_v59  ;;  %v1063_v59 = vadd.f32 %v1946_v18, %v1062_v39  ;;  %v1538_v31 = vadd.f32 %v1537_v55, %v2999_v23  ;;  %v937_v54 = vsub.f32 %v3659_v34, %v2934_v50  ;;  %v1952_v39 = vpop.eup %1951  ;;  %v3662_v55 = vld [vmem:[#allocation11_spill] sm:$0xff] }
 0x26b   :  { %v1038_v6 = vmul.f32 1.442695, %v945_v47  ;;  %v3660_v47 = vld [vmem:[#allocation36_spill] sm:$0xff]  ;;  %v1528_v18 = vadd.f32 %v1527_v4, %v1481_v24  ;;  %v1954_v30 = vpop.eup %1953  ;;  %v1040_v33 = vmul.f32 1.442695, %v946_v42  ;;  %v1080_v53 = vadd.f32 %v1950_v8, %v1948_v44  ;;  %v3664_v42 = vld [vmem:[#allocation34_spill] sm:$0xff] }
 0x26c   :  { %1963 = vpow2.f32 %v1036_v2  ;;  %v947_v2 = vsub.f32 %v3660_v47, %v2957_v43  ;;  %v1064_v23 = vadd.f32 %v1952_v39, %v1063_v59  ;;  %v1502_v43 = vsel %vm1454_vm7, %v2332_v58, 0.0  ;;  %v1956_v24 = vpop.eup %1955 }
 0x26d   :  { %1965 = vpow2.f32 %v1018_v45  ;;  %v1501_v45 = vsel %vm1453_vm11, %v3662_v55, 0.0  ;;  %v3117_v4 = vadd.f32 %v1538_v31, %v3005_v57  ;;  %v1022_v39 = vmul.f32 1.442695, %v937_v54  ;;  %v1958_v47 = vpop.eup %1957 }
 0x26e   :  { %1078 = vadd.xlane.f32.xlu1 %v1077_v11  ;;  %v994_v11 = vmul.f32 1.442695, %v923_v56  ;;  %1967 = vpow2.f32 %v992_v48  ;;  %v1090_v56 = vadd.f32 %v1954_v30, %v1089_v35  ;;  %v3663_v48 = vld [vmem:[#allocation33_spill] sm:$0xff]  ;;  %v1552_v55 = vadd.f32 %v1502_v43, %v1501_v45  ;;  %v1960_v58 = vpop.eup %1959 }
 0x26f   :  { %1969 = vpow2.f32 %v1038_v6  ;;  %v938_v59 = vsub.f32 %v3663_v48, %v2934_v50  ;;  %vm1445_vm13 = vcmp.eq.s32.totalorder %v2557_v1, %v3106_v62  ;;  %vm1446_vm1 = vcmp.eq.s32.totalorder %v2580_v32, %v3106_v62  ;;  %v1962_v54 = vpop.eup %1961 }
 0x270   :  { %1971 = vpow2.f32 %v1020_v10  ;;  %v1065_v57 = vadd.f32 %v1958_v47, %v1064_v23  ;;  %v939_v6 = vsub.f32 %v3664_v42, %v2934_v50  ;;  %v3129_v44 = vadd.f32 %v1528_v18, %v1482_v36 }
 0x271   :  { %1973 = vpow2.f32 %v994_v11  ;;  %v1042_v35 = vmul.f32 1.442695, %v947_v2  ;;  %v1091_v8 = vadd.f32 %v1960_v58, %v1090_v56  ;;  %v1081_v31 = vadd.f32 %v1956_v24, %v1080_v53 }
 0x272   :  { %1975 = vpow2.f32 %v1040_v33  ;;  %v1503_v10 = vsel %vm1455_vm12, %v2354_v9, 0.0  ;;  %v1493_v30 = vsel %vm1445_vm13, %v3641_v5, 0.0  ;;  %v1494_v45 = vsel %vm1446_vm1, %v3642_v40, 0.0  ;;  %v3142_v9 = vpop.permute.xlu1 %1424 }
 0x273   :  { %1977 = vpow2.f32 %v1022_v39  ;;  %v1024_v11 = vmul.f32 1.442695, %v938_v59  ;;  %vm1457_vm5 = vcmp.eq.s32.totalorder %v2609_v12, %v3015_v0  ;;  %v1553_v50 = vadd.f32 %v1552_v55, %v1503_v10 }
 0x274   :  { %v1066_v47 = vadd.f32 %v1962_v54, %v1065_v57  ;;  %v1026_v2 = vmul.f32 1.442695, %v939_v6  ;;  %vm1469_vm6 = vcmp.eq.s32.totalorder %v2557_v1, %v3036_v37  ;;  %vm1447_vm9 = vcmp.eq.s32.totalorder %v2601_v13, %v3106_v62 }
 0x275   :  { %v1543_v18 = vadd.f32 %v1494_v45, %v1493_v30  ;;  %1979 = vpow2.f32 %v1042_v35  ;;  %v1504_v33 = vsel %vm1456_vm2, %v2388_v20, 0.0  ;;  %v1505_v56 = vsel %vm1457_vm5, %v2433_v19, 0.0 }
 0x276   :  { %v1964_v43 = vpop.eup %1963  ;;  %1981 = vpow2.f32 %v1024_v11  ;;  %v1554_v24 = vadd.f32 %v1553_v50, %v1504_v33  ;;  %v1517_v59 = vsel %vm1469_vm6, %v2391_v49, 0.0  ;;  %v1518_v39 = vsel %vm1470_vm8, %v2394_v51, 0.0  ;;  %v3665_v51 = vld [vmem:[#allocation58_spill] sm:$0xff]  ;;  %v3669_v33 = vld [vmem:[#allocation56_spill] sm:$0xff] }
 0x277   :  { %v1966_v36 = vpop.eup %1965  ;;  %v1092_v5 = vadd.f32 %v1964_v43, %v1091_v8  ;;  %v1495_v57 = vsel %vm1447_vm9, %v3644_v17, 0.0  ;;  %vm1461_vm11 = vcmp.eq.s32.totalorder %v2557_v1, %v3142_v9  ;;  %vm1462_vm7 = vcmp.eq.s32.totalorder %v2580_v32, %v3142_v9 }
 0x278   :  { %v1082_v40 = vadd.f32 %v1966_v36, %v1081_v31  ;;  %v1968_v23 = vpop.eup %1967  ;;  %vm1448_vm12 = vcmp.eq.s32.totalorder %v2606_v26, %v3106_v62  ;;  %v1544_v49 = vadd.f32 %v1543_v18, %v1495_v57  ;;  %vm1449_vm1 = vcmp.eq.s32.totalorder %v2609_v12, %v3106_v62  ;;  %v3668_v18 = vld [vmem:[#allocation27_spill] sm:$0xff] }
 0x279   :  { %v1970_v53 = vpop.eup %1969  ;;  %v1067_v58 = vadd.f32 %v1968_v23, %v1066_v47  ;;  %vm1471_vm2 = vcmp.eq.s32.totalorder %v2601_v13, %v3036_v37  ;;  %v1570_v17 = vadd.f32 %v1518_v39, %v1517_v59  ;;  %1983 = vpow2.f32 %v1026_v2  ;;  %v3666_v47 = vld [vmem:[#allocation60_spill] sm:$0xff] }
 0x27a   :  { %v1972_v55 = vpop.eup %1971  ;;  %v1093_v19 = vadd.f32 %v1970_v53, %v1092_v5  ;;  %v1509_v31 = vsel %vm1461_vm11, %v3646_v60, 0.0  ;;  %v1510_v54 = vsel %vm1462_vm7, %v3647_v15, 0.0  ;;  %v1555_v45 = vadd.f32 %v1554_v24, %v1505_v56  ;;  %v3667_v5 = vld [vmem:[#allocation7_spill] sm:$0xff] }
 0x27b   :  { %v1083_v6 = vadd.f32 %v1972_v55, %v1082_v40  ;;  %v1974_v35 = vpop.eup %1973  ;;  %vm1436_vm5 = vcmp.eq.s32.totalorder %v2644_v52, %v2881_v14  ;;  %v1496_v43 = vsel %vm1448_vm12, %v3648_v16, 0.0  ;;  %vm1472_vm6 = vcmp.eq.s32.totalorder %v2606_v26, %v3036_v37 }
 0x27c   :  { %v1976_v32 = vpop.eup %1975  ;;  %v1068_v30 = vadd.f32 %v1974_v35, %v1067_v58  ;;  %v1545_v50 = vadd.f32 %v1544_v49, %v1496_v43  ;;  %v1519_v36 = vsel %vm1471_vm2, %v2421_v7, 0.0  ;;  %vm1463_vm9 = vcmp.eq.s32.totalorder %v2601_v13, %v3142_v9  ;;  %v3671_v35 = vld [vmem:[#allocation8_spill] sm:$0xff]  ;;  %v3675_v43 = vld [vmem:[#allocation59_spill] sm:$0xff] }
 0x27d   :  { %v1978_v10 = vpop.eup %1977  ;;  %v1094_v15 = vadd.f32 %v1976_v32, %v1093_v19  ;;  %v1571_v2 = vadd.f32 %v1570_v17, %v1519_v36  ;;  %v1561_v16 = vadd.f32 %v1510_v54, %v1509_v31  ;;  %vm1459_vm11 = vcmp.eq.s32.totalorder %v2635_v63, %v3015_v0  ;;  %v3672_v17 = vld [vmem:[#allocation29_spill] sm:$0xff] }
 0x27e   :  { %v1084_v11 = vadd.f32 %v1978_v10, %v1083_v6  ;;  %v1506_v23 = vsel %vm1458_vm10, %v3668_v18, 0.0  ;;  %vm1450_vm7 = vcmp.eq.s32.totalorder %v2624_v3, %v3106_v62  ;;  %v1497_v53 = vsel %vm1449_vm1, %v3650_v21, 0.0  ;;  %v3670_v6 = vld [vmem:[#allocation6_spill] sm:$0xff]  ;;  %v3678_v18 = vld [vmem:[#allocation61_spill] sm:$0xff] }
 0x27f   :  { %v1980_v7 = vpop.eup %1979  ;;  %v1556_v56 = vadd.f32 %v1555_v45, %v1506_v23  ;;  %v1546_v39 = vadd.f32 %v1545_v50, %v1497_v53  ;;  %v1520_v55 = vsel %vm1472_vm6, %v2450_v28, 0.0  ;;  %v1511_v58 = vsel %vm1463_vm9, %v3649_v41, 0.0  ;;  %v3679_v23 = vld [vmem:[#allocation55_spill] sm:$0xff] }
 0x280   :  { %v3163_v20 = vpop.xlane.xlu1 %1225  ;;  %v1982_v24 = vpop.eup %1981  ;;  %v1095_v59 = vadd.f32 %v1980_v7, %v1094_v15  ;;  %v1572_v19 = vadd.f32 %v1571_v2, %v1520_v55  ;;  %vm1464_vm10 = vcmp.eq.s32.totalorder %v2606_v26, %v3142_v9  ;;  %v1562_v21 = vadd.f32 %v1561_v16, %v1511_v58  ;;  %v3681_v55 = vld [vmem:[#allocation57_spill] sm:$0xff] }
 0x281   :  { %vm1227_vm13 = vcmp.eq.f32.partialorder %v3665_v51, %v3163_v20  ;;  %v1085_v57 = vadd.f32 %v1982_v24, %v1084_v11  ;;  %v1540_v51 = vadd.f32 %v3117_v4, %v3671_v35  ;;  %v1507_v28 = vsel %vm1459_vm11, %v3672_v17, 0.0  ;;  %v3327_v35 = vld [vmem:[%s3483_s3 + $0x20] sm:$0xff] }
 0x282   :  { %v1228_v8 = vsel %vm1227_vm13, %v2930_v27, inf  ;;  %v3184_v27 = vpop.xlane.xlu0 %1281  ;;  %vm1473_vm13 = vcmp.eq.s32.totalorder %v2609_v12, %v3036_v37  ;;  %v1530_v13 = vadd.f32 %v3129_v44, %v3104_v38  ;;  %vm1460_vm1 = vcmp.eq.s32.totalorder %v2644_v52, %v3015_v0  ;;  %v3673_v44 = vld [vmem:[#allocation26_spill] sm:$0xff] }
 0x283   :  { %1229 = vmin.xlane.f32.xlu0 %v1228_v8  ;;  %vm1283_vm12 = vcmp.eq.f32.partialorder %v3669_v33, %v3184_v27  ;;  %v1557_v41 = vadd.f32 %v1556_v56, %v1507_v28  ;;  %vm1451_vm2 = vcmp.eq.s32.totalorder %v2635_v63, %v3106_v62  ;;  %v1498_v4 = vsel %vm1450_vm7, %v3652_v25, 0.0  ;;  %v1984_v32 = vpop.eup %1983 }
 0x284   :  { %v3186_v60 = vpop.xlane.xlu1 %1309  ;;  %v1284_v49 = vsel %vm1283_vm12, %v3670_v6, inf  ;;  %v1547_v8 = vadd.f32 %v1546_v39, %v1498_v4  ;;  %vm1474_vm6 = vcmp.eq.s32.totalorder %v2624_v3, %v3036_v37  ;;  %v1521_v38 = vsel %vm1473_vm13, %v2519_v29, 0.0  ;;  %v3676_v29 = vld [vmem:[#allocation32_spill] sm:$0xff]  ;;  %v3303_v6 = vld [vmem:[%s3483_s3 + $0x18] sm:$0xff] }
 0x285   :  { %vm1311_vm8 = vcmp.eq.f32.partialorder %v3666_v47, %v3186_v60  ;;  %v1512_v31 = vsel %vm1464_vm10, %v3673_v44, 0.0  ;;  %v1086_v54 = vadd.f32 %v1984_v32, %v1085_v57  ;;  %v1573_v10 = vadd.f32 %v1572_v19, %v1521_v38  ;;  %v3684_v44 = vld [vmem:[#allocation39_spill] sm:$0xff] }
 0x286   :  { %v1312_v40 = vsel %vm1311_vm8, %v3667_v5, inf  ;;  %vm1465_vm8 = vcmp.eq.s32.totalorder %v2609_v12, %v3142_v9  ;;  %v1563_v25 = vadd.f32 %v1562_v21, %v1512_v31  ;;  %v1361_v15 = vand.u32 65535, %v3675_v43  ;;  %v3677_v12 = vld [vmem:[#allocation25_spill] sm:$0xff]  ;;  %v3281_v33 = vpop.xlane.xlu0 %1337 }
 0x287   :  { %1069 = vadd.xlane.f32.xlu0 %v1068_v30  ;;  %1313 = vmin.xlane.f32.xlu1 %v1312_v40  ;;  %v3674_v30 = vld [vmem:[#allocation21_spill] sm:$0xff]  ;;  %v1508_v26 = vsel %vm1460_vm1, %v3676_v29, 0.0  ;;  %vm1452_vm9 = vcmp.eq.s32.totalorder %v2644_v52, %v3106_v62  ;;  %v1499_v50 = vsel %vm1451_vm2, %v3677_v12, 0.0  ;;  %v1522_v0 = vsel %vm1474_vm6, %v2523_v61, 0.0  ;;  %v840_v29 = vld [vmem:[#allocation3] sm:$0xff] }
 0x288   :  { %v1484_v45 = vsel %vm1436_vm5, %v3674_v30, 0.0  ;;  %v3267_v14 = vpop.xlane.xlu1 %1365  ;;  %v1558_v36 = vadd.f32 %v1557_v41, %v1508_v26  ;;  %vm1475_vm5 = vcmp.eq.s32.totalorder %v2635_v63, %v3036_v37  ;;  %v1513_v47 = vsel %vm1465_vm8, %v3655_v46, 0.0  ;;  %v3345_v41 = vld [vmem:[%s3483_s3 + $0x8] sm:$0xff]  ;;  %v3685_v31 = vld [vmem:[#allocation37_spill] sm:$0xff]  ;;  %v3687_v30 = vld [vmem:[#allocation42_spill] sm:$0xff] }
 0x289   :  { %v1531_v11 = vadd.f32 %v1530_v13, %v1484_v45  ;;  %v1548_v2 = vadd.f32 %v1547_v8, %v1499_v50  ;;  %v1574_v16 = vadd.f32 %v1573_v10, %v1522_v0  ;;  %vm1466_vm11 = vcmp.eq.s32.totalorder %v2624_v3, %v3142_v9  ;;  %v3680_v3 = vld [vmem:[#allocation35_spill] sm:$0xff]  ;;  %v3339_v13 = vld [vmem:[%s3483_s3] sm:$0xff] }
 0x28a   :  { %v1564_v5 = vadd.f32 %v1563_v25, %v1513_v47  ;;  %v1363_v40 = vcvt.s32.f32 %v1361_v15  ;;  %vm1367_vm7 = vcmp.eq.f32.partialorder %v3678_v18, %v3267_v14  ;;  %v1333_v7 = vand.u32 65535, %v3679_v23  ;;  %v3686_v25 = vld [vmem:[#allocation40_spill] sm:$0xff]  ;;  %v3689_v50 = vld [vmem:[#allocation46_spill] sm:$0xff]  ;;  %v3692_v23 = vld [vmem:[#allocation13_spill] sm:$0xff] }
 0x28b   :  { %1096 = vadd.xlane.f32.xlu1 %v1095_v59  ;;  %1285 = vmin.xlane.f32.xlu0 %v1284_v49  ;;  %v1500_v61 = vsel %vm1452_vm9, %v3656_v22, 0.0  ;;  %vm1476_vm12 = vcmp.eq.s32.totalorder %v2644_v52, %v3036_v37  ;;  %v1523_v46 = vsel %vm1475_vm5, %v3680_v3, 0.0  ;;  %v1514_v56 = vsel %vm1466_vm11, %v3659_v34, 0.0  ;;  %v3682_v22 = vld [vmem:[#allocation36_spill] sm:$0xff]  ;;  %v3321_v49 = vld [vmem:[%s3483_s3 + $0x28] sm:$0xff] }
 0x28c   :  { %v1549_v53 = vadd.f32 %v1548_v2, %v1500_v61  ;;  %v1575_v24 = vadd.f32 %v1574_v16, %v1523_v46  ;;  %vm1467_vm13 = vcmp.eq.s32.totalorder %v2635_v63, %v3142_v9  ;;  %v1565_v59 = vadd.f32 %v1564_v5, %v1514_v56  ;;  %v841_v16 = vld [vmem:[#allocation3 + $0x8] sm:$0xff]  ;;  %v843_v46 = vld [vmem:[#allocation3 + $0x18] sm:$0xff] }
 0x28d   :  { %v1368_v39 = vsel %vm1367_vm7, %v1363_v40, inf  ;;  %vm1339_vm10 = vcmp.eq.f32.partialorder %v3681_v55, %v3281_v33  ;;  %v1524_v62 = vsel %vm1476_vm12, %v3682_v22, 0.0  ;;  %v1335_v58 = vcvt.s32.f32 %v1333_v7 }
 0x28e   :  { %v1515_v37 = vsel %vm1467_vm13, %v3663_v48, 0.0  ;;  %v1576_v57 = vadd.f32 %v1575_v24, %v1524_v62  ;;  %vm1468_vm1 = vcmp.eq.s32.totalorder %v2644_v52, %v3142_v9  ;;  %vm1597_vm2 = vcmp.ne.s32.totalorder %v3303_v6, 4294967196  ;;  %v3309_v48 = vld [vmem:[%s3483_s3 + $0x10] sm:$0xff]  ;;  %v1382_v24 = vld [vmem:[#allocation5 + $0x8] sm:$0xff] }
 0x28f   :  { %1541 = vadd.xlane.f32.xlu1 %v1540_v51  ;;  %1087 = vadd.xlane.f32.xlu0 %v1086_v54  ;;  %v1566_v34 = vadd.f32 %v1565_v59, %v1515_v37  ;;  %v1340_v19 = vsel %vm1339_vm10, %v1335_v58, inf  ;;  %v1516_v63 = vsel %vm1468_vm1, %v3664_v42, 0.0  ;;  %vm1596_vm6 = vcmp.ne.s32.totalorder %v3309_v48, 4294967196  ;;  %v3694_v37 = vld [vmem:[#allocation43_spill] sm:$0xff] }
 0x290   :  { %v3683_v52 = vmov 0.0   ;;  %vm1599_vm8 = vcmp.ne.s32.totalorder %v3321_v49, 4294967196  ;;  %vm1598_vm9 = vcmp.ne.s32.totalorder %v3327_v35, 4294967196  ;;  %vm1594_vm5 = vcmp.ne.s32.totalorder %v3339_v13, 4294967196 }
 0x291   :  { %v1567_v21 = vadd.f32 %v1566_v34, %v1516_v63  ;;  %v1863_v42 = vsel %vm1597_vm2, 1.0, %v3683_v52  ;;  %v1862_v9 = vsel %vm1596_vm6, 1.0, %v3683_v52  ;;  %v1865_v17 = vsel %vm1599_vm8, 1.0, %v3683_v52 }
 0x292   :  { %v1876_v51 = vpack.i.bf16 %v1863_v42, %v1862_v9  ;;  %v1864_v28 = vsel %vm1598_vm9, 1.0, %v3683_v52  ;;  %vm1595_vm11 = vcmp.ne.s32.totalorder %v3345_v41, 4294967196  ;;  %v1860_v32 = vsel %vm1594_vm5, 1.0, %v3683_v52  ;;  %v3698_v42 = vld [vmem:[#allocation54_spill] sm:$0xff] }
 0x293   :  { %1559 = vadd.xlane.f32.xlu1 %v1558_v36  ;;  %1532 = vadd.xlane.f32.xlu0 %v1531_v11  ;;  %v1881_v4 = vpack.i.bf16 %v1865_v17, %v1864_v28  ;;  %v1861_v8 = vsel %vm1595_vm11, 1.0, %v3683_v52  ;;  %v846_v54 = vsub.f32 %v3685_v31, %v3684_v44  ;;  %v3688_v45 = vsub.f32 %v3686_v25, %v3687_v30  ;;  %v3690_v36 = vld [vmem:[#allocation48_spill] sm:$0xff]  ;;  %v3697_v52 = vld [vmem:[#allocation51_spill] sm:$0xff]  ;;  %v3700_v17 = vld [vmem:[#allocation49_spill] sm:$0xff] }
 0x294   :  { %v1871_v38 = vpack.i.bf16 %v1861_v8, %v1860_v32  ;;  %v3691_v0 = vsub.f32 %v3689_v50, %v3690_v36  ;;  %v1260_v7 = vcvt.f32.s32 %v3692_v23  ;;  %v3699_v9 = vsub.f32 %v3697_v52, %v3698_v42  ;;  %v3701_v28 = vld [vmem:[#allocation52_spill] sm:$0xff]  ;;  %v3707_v52 = vld [vmem:[#allocation50_spill] sm:$0xff] }
 0x295   :  { %v852_v10 = vmul.f32 1.442695, %v846_v54  ;;  %v854_v43 = vmul.f32 1.442695, %v3688_v45  ;;  %v1232_v8 = vcvt.f32.s32 %v3163_v20  ;;  %v842_v54 = vld [vmem:[#allocation3 + $0x10] sm:$0xff]  ;;  %v1316_v25 = vcvt.f32.s32 %v3186_v60 }
 0x296   :  { %v858_v47 = vmul.f32 1.442695, %v3691_v0  ;;  %v1261_v56 = vshll.u32 %v1260_v7, 16  ;;  %v845_v0 = vld [vmem:[#allocation3 + $0x28] sm:$0xff] }
 0x297   :  { %1369 = vmin.xlane.f32.xlu1 %v1368_v39  ;;  %1550 = vadd.xlane.f32.xlu0 %v1549_v53  ;;  %1985 = vpow2.f32 %v852_v10  ;;  %v1233_v10 = vshll.u32 %v1232_v8, 16 }
 0x298   :  { %1987 = vpow2.f32 %v854_v43  ;;  %v1381_v43 = vld [vmem:[#allocation5] sm:$0xff] }
 0x299   :  { %1989 = vpow2.f32 %v858_v47 }
 0x29b   :  { %1577 = vadd.xlane.f32.xlu1 %v1576_v57  ;;  %1341 = vmin.xlane.f32.xlu0 %v1340_v19  ;;  %v3695_v57 = vld [vmem:[#allocation45_spill] sm:$0xff] }
 0x29c   :  { %v3696_v34 = vsub.f32 %v3694_v37, %v3695_v57 }
 0x29e   :  { %v856_v19 = vmul.f32 1.442695, %v3696_v34 }
 0x29f   :  { %1568 = vadd.xlane.f32.xlu0 %v1567_v21 }
 0x2a0   :  { %1991 = vpow2.f32 %v856_v19 }
 0x2a1   :  { %v1986_v15 = vpop.eup %1985 }
 0x2a2   :  { %v864_v26 = vmul.f32 %v1986_v15, %v840_v29  ;;  %v1988_v2 = vpop.eup %1987 }
 0x2a3   :  { %v865_v5 = vmul.f32 %v1988_v2, %v841_v16  ;;  %v1990_v61 = vpop.eup %1989  ;;  %v1317_v2 = vshll.u32 %v1316_v25, 16 }
 0x2a4   :  { %v867_v39 = vmul.f32 %v1990_v61, %v843_v46  ;;  %v844_v61 = vld [vmem:[#allocation3 + $0x20] sm:$0xff] }
 0x2ac   :  { %1877 = vperm.xlu1 %1869, %v1876_v51   ;;  %v862_v51 = vmul.f32 1.442695, %v3699_v9  ;;  %v1408_v9 = vld [vmem:[#allocation4 + $0x18] sm:$0xff] }
 0x2ae   :  { %1993 = vpow2.f32 %v862_v51 }
 0x2b0   :  { %1882 = vperm.xlu1 %1869, %v1881_v4   ;;  %v3702_v4 = vsub.f32 %v3700_v17, %v3701_v28  ;;  %v1405_v28 = vld [vmem:[#allocation4] sm:$0xff] }
 0x2b2   :  { %v860_v32 = vmul.f32 1.442695, %v3702_v4 }
 0x2b4   :  { %1995 = vpow2.f32 %v860_v32 }
 0x2b5   :  { %1872 = vperm.xlu0 %1870, %v1871_v38   ;;  %v1992_v38 = vpop.eup %1991 }
 0x2b6   :  { %v866_v29 = vmul.f32 %v1992_v38, %v842_v54  ;;  %v1372_v38 = vcvt.f32.s32 %v3267_v14 }
 0x2df   :  { %v1052_v11 = vpop.xlane.xlu0 %1051 }
 0x2e0   :  { %v1098_v12 = vadd.f32 %v1052_v11, %v864_v26  ;;  %v1994_v26 = vpop.eup %1993  ;;  %v1288_v11 = vcvt.f32.s32 %v3184_v27 }
 0x2e1   :  { %v869_v23 = vmul.f32 %v1994_v26, %v845_v0  ;;  %v1996_v27 = vpop.eup %1995 }
 0x2e2   :  { %1105 = vst.msk [vmem:[#allocation3] sm:$0xff] %vm22_vm0, %v1098_v12  ;;  %v3703_v12 = vld [vmem:[#allocation38_spill] sm:$0xff]  ;;  %v868_v22 = vmul.f32 %v1996_v27, %v844_v61 }
 0x2e8   :  { %v1061_v40 = vpop.xlane.xlu1 %1060 }
 0x2e9   :  { %v1099_v18 = vadd.f32 %v1061_v40, %v865_v5  ;;  %v1606_v47 = vld [vmem:[#allocation3] sm:$0xff]  ;;  %v1384_v40 = vld [vmem:[#allocation5 + $0x18] sm:$0xff] }
 0x2eb   :  { %1106 = vst.msk [vmem:[#allocation3 + $0x8] sm:$0xff] %vm22_vm0, %v1099_v18 }
 0x2f2   :  { %v1607_v45 = vld [vmem:[#allocation3 + $0x8] sm:$0xff] }
 0x2f3   :  { %1997 = vlog2.f32 %v1607_v45  ;;  %v1407_v45 = vld [vmem:[#allocation4 + $0x10] sm:$0xff] }
 0x2f4   :  { %1999 = vlog2.f32 %v1606_v47 }
 0x2f7   :  { %v1258_v3 = vpop.xlane.xlu1 %1257 }
 0x2f8   :  { %v1259_v53 = vcvt.f32.s32 %v1258_v3  ;;  %v1289_v3 = vshll.u32 %v1288_v11, 16  ;;  %v1601_v11 = vld [vmem:[#allocation2 + $0x8] sm:$0xff] }
 0x2fa   :  { %v1262_v59 = vadd.s32 %v1261_v56, %v1259_v53 }
 0x2fb   :  { %v1079_v55 = vpop.xlane.xlu1 %1078 }
 0x2fc   :  { %v1388_v62 = vsel %vm1376_vm14, %v1262_v59, %v1382_v24  ;;  %v1101_v58 = vadd.f32 %v1079_v55, %v867_v39  ;;  %vm1375_vm14 = vcmp.gt.f32.partialorder %v3703_v12, %v3685_v31  ;;  %v1383_v59 = vld [vmem:[#allocation5 + $0x10] sm:$0xff]  ;;  %v1406_v39 = vld [vmem:[#allocation4 + $0x8] sm:$0xff]  ;;  %v1373_v12 = vshll.u32 %v1372_v38, 16  ;;  %v1602_v38 = vld [vmem:[#allocation2 + $0x10] sm:$0xff] }
 0x2fd   :  { %1394 = vst.msk [vmem:[#allocation5 + $0x8] sm:$0xff] %vm22_vm0, %v1388_v62  ;;  %v1998_v42 = vpop.eup %1997 }
 0x2fe   :  { %1108 = vst.msk [vmem:[#allocation3 + $0x18] sm:$0xff] %vm22_vm0, %v1101_v58  ;;  %v2000_v37 = vpop.eup %1999  ;;  %v1615_v25 = vmul.f32 0.6931472, %v1998_v42 }
 0x2ff   :  { %v1613_v14 = vmul.f32 0.6931472, %v2000_v37  ;;  %v1605_v37 = vld [vmem:[#allocation2 + $0x28] sm:$0xff] }
 0x304   :  { %v1651_v63 = vld [vmem:[#allocation5 + $0x8] sm:$0xff] }
 0x305   :  { %v1657_v21 = vcvt.s32.f32 %v1651_v63 }
 0x307   :  { %1718 = vperm.xlu1 %1869, %v1657_v21   ;;  %v1609_v21 = vld [vmem:[#allocation3 + $0x18] sm:$0xff] }
 0x308   :  { %2001 = vlog2.f32 %v1609_v21 }
 0x310   :  { %v1230_v44 = vpop.xlane.xlu0 %1229 }
 0x311   :  { %v1231_v30 = vcvt.f32.s32 %v1230_v44 }
 0x313   :  { %v1234_v15 = vadd.s32 %v1233_v10, %v1231_v30 }
 0x314   :  { %v1314_v36 = vpop.xlane.xlu1 %1313  ;;  %v1070_v20 = vpop.xlane.xlu0 %1069 }
 0x315   :  { %v1387_v16 = vsel %vm1375_vm14, %v1234_v15, %v1381_v43  ;;  %v1315_v5 = vcvt.f32.s32 %v1314_v36  ;;  %v1100_v60 = vadd.f32 %v1070_v20, %v866_v29  ;;  %v1344_v15 = vcvt.f32.s32 %v3281_v33  ;;  %v1386_v36 = vld [vmem:[#allocation5 + $0x28] sm:$0xff]  ;;  %v1600_v33 = vld [vmem:[#allocation2] sm:$0xff] }
 0x316   :  { %1393 = vst.msk [vmem:[#allocation5] sm:$0xff] %vm22_vm0, %v1387_v16  ;;  %v1410_v16 = vld [vmem:[#allocation4 + $0x28] sm:$0xff]  ;;  %v1624_v61 = vadd.f32 %v1613_v14, %v1600_v33 }
 0x317   :  { %v1318_v18 = vadd.s32 %v1317_v2, %v1315_v5  ;;  %1107 = vst.msk [vmem:[#allocation3 + $0x10] sm:$0xff] %vm22_vm0, %v1100_v60  ;;  %v1625_v2 = vadd.f32 %v1615_v25, %v1601_v11  ;;  %v1345_v27 = vshll.u32 %v1344_v15, 16  ;;  %v1604_v15 = vld [vmem:[#allocation2 + $0x20] sm:$0xff] }
 0x318   :  { %v1097_v7 = vpop.xlane.xlu1 %1096  ;;  %v1286_v31 = vpop.xlane.xlu0 %1285 }
 0x319   :  { %v1390_v56 = vsel %vm1378_vm3, %v1318_v18, %v1384_v40  ;;  %v1103_v53 = vadd.f32 %v1097_v7, %v869_v23  ;;  %v1287_v24 = vcvt.f32.s32 %v1286_v31  ;;  %vm1379_vm3 = vcmp.gt.f32.partialorder %v3707_v52, %v3700_v17 }
 0x31a   :  { %1396 = vst.msk [vmem:[#allocation5 + $0x18] sm:$0xff] %vm22_vm0, %v1390_v56 }
 0x31b   :  { %1110 = vst.msk [vmem:[#allocation3 + $0x28] sm:$0xff] %vm22_vm0, %v1103_v53  ;;  %v1290_v55 = vadd.s32 %v1289_v3, %v1287_v24 }
 0x31c   :  { %v1542_v62 = vpop.xlane.xlu1 %1541  ;;  %v1088_v58 = vpop.xlane.xlu0 %1087 }
 0x31d   :  { %v1389_v34 = vsel %vm1377_vm15, %v1290_v55, %v1383_v59  ;;  %v1580_v19 = vadd.f32 %v1542_v62, %v1406_v39  ;;  %v1102_v63 = vadd.f32 %v1088_v58, %v868_v22  ;;  %v1650_v50 = vld [vmem:[#allocation5] sm:$0xff]  ;;  %v2002_v59 = vpop.eup %2001  ;;  %v1409_v55 = vld [vmem:[#allocation4 + $0x20] sm:$0xff]  ;;  %vm1662_vm15 = vcmp.eq.s32.totalorder %v2557_v1, 2 }
 0x31e   :  { %1395 = vst.msk [vmem:[#allocation5 + $0x10] sm:$0xff] %vm22_vm0, %v1389_v34  ;;  %v1656_v51 = vcvt.s32.f32 %v1650_v50  ;;  %v1608_v4 = vld [vmem:[#allocation3 + $0x10] sm:$0xff]  ;;  %v1385_v39 = vld [vmem:[#allocation5 + $0x20] sm:$0xff]  ;;  %v1619_v50 = vmul.f32 0.6931472, %v2002_v59 }
 0x31f   :  { %1586 = vst.msk [vmem:[#allocation4 + $0x8] sm:$0xff] %vm22_vm0, %v1580_v19  ;;  %1109 = vst.msk [vmem:[#allocation3 + $0x20] sm:$0xff] %vm22_vm0, %v1102_v63  ;;  %2003 = vlog2.f32 %v1608_v4 }
 0x320   :  { %v1560_v32 = vpop.xlane.xlu1 %1559  ;;  %1713 = vperm.xlu0 %1870, %v1656_v51   ;;  %v1533_v8 = vpop.xlane.xlu0 %1532  ;;  %v1603_v51 = vld [vmem:[#allocation2 + $0x18] sm:$0xff] }
 0x321   :  { %v1582_v44 = vadd.f32 %v1560_v32, %v1408_v9  ;;  %v1579_v54 = vadd.f32 %v1533_v8, %v1405_v28  ;;  %v1653_v10 = vld [vmem:[#allocation5 + $0x18] sm:$0xff]  ;;  %v1627_v17 = vadd.f32 %v1619_v50, %v1603_v51 }
 0x322   :  { %v1659_v30 = vcvt.s32.f32 %v1653_v10  ;;  %v1611_v43 = vld [vmem:[#allocation3 + $0x28] sm:$0xff] }
 0x323   :  { %1588 = vst.msk [vmem:[#allocation4 + $0x18] sm:$0xff] %vm22_vm0, %v1582_v44  ;;  %1585 = vst.msk [vmem:[#allocation4] sm:$0xff] %vm22_vm0, %v1579_v54  ;;  %2005 = vlog2.f32 %v1611_v43 }
 0x324   :  { %1728 = vperm.xlu1 %1869, %v1659_v30   ;;  %v1370_v29 = vpop.xlane.xlu1 %1369  ;;  %v1551_v26 = vpop.xlane.xlu0 %1550 }
 0x325   :  { %v1371_v20 = vcvt.f32.s32 %v1370_v29  ;;  %v1581_v0 = vadd.f32 %v1551_v26, %v1407_v45  ;;  %v1652_v47 = vld [vmem:[#allocation5 + $0x10] sm:$0xff] }
 0x326   :  { %v1658_v5 = vcvt.s32.f32 %v1652_v47  ;;  %v1631_v60 = vld [vmem:[#allocation4 + $0x8] sm:$0xff]  ;;  %v1610_v40 = vld [vmem:[#allocation3 + $0x20] sm:$0xff] }
 0x327   :  { %v1374_v18 = vadd.s32 %v1373_v12, %v1371_v20  ;;  %1587 = vst.msk [vmem:[#allocation4 + $0x10] sm:$0xff] %vm22_vm0, %v1581_v0  ;;  %v1637_v23 = vsub.f32 %v1625_v2, %v1631_v60  ;;  %2007 = vlog2.f32 %v1610_v40 }
 0x328   :  { %v1578_v7 = vpop.xlane.xlu1 %1577  ;;  %1723 = vperm.xlu0 %1870, %v1658_v5   ;;  %v1342_v31 = vpop.xlane.xlu0 %1341 }
 0x329   :  { %v1392_v46 = vsel %vm1380_vm4, %v1374_v18, %v1386_v36  ;;  %v1584_v56 = vadd.f32 %v1578_v7, %v1410_v16  ;;  %v1343_v53 = vcvt.f32.s32 %v1342_v31  ;;  %v1643_v24 = vsel %vm1595_vm11, %v1637_v23, 0.0  ;;  %v2004_v57 = vpop.eup %2003 }
 0x32a   :  { %1398 = vst.msk [vmem:[#allocation5 + $0x28] sm:$0xff] %vm22_vm0, %v1392_v46  ;;  %1754 = vperm.xlu1 %1869, %v1643_v24   ;;  %v1630_v22 = vld [vmem:[#allocation4] sm:$0xff]  ;;  %v1617_v9 = vmul.f32 0.6931472, %v2004_v57  ;;  %v1633_v28 = vld [vmem:[#allocation4 + $0x18] sm:$0xff]  ;;  %vm1648_vm4 = vcmp.eq.s32.totalorder %v2557_v1, 0 }
 0x32b   :  { %1590 = vst.msk [vmem:[#allocation4 + $0x28] sm:$0xff] %vm22_vm0, %v1584_v56  ;;  %v1346_v62 = vadd.s32 %v1345_v27, %v1343_v53  ;;  %v1636_v58 = vsub.f32 %v1624_v61, %v1630_v22  ;;  %v1639_v44 = vsub.f32 %v1627_v17, %v1633_v28 }
 0x32c   :  { %v1569_v34 = vpop.xlane.xlu0 %1568  ;;  %v1626_v10 = vadd.f32 %v1617_v9, %v1602_v38  ;;  %v1878_v6 = vpop.permute.xlu1 %1877 }
 0x32d   :  { %v2006_v19 = vpop.eup %2005  ;;  %v1391_v63 = vsel %vm1379_vm3, %v1346_v62, %v1385_v39  ;;  %v1583_v41 = vadd.f32 %v1569_v34, %v1409_v55  ;;  %v1642_v21 = vsel %vm1594_vm5, %v1636_v58, 0.0  ;;  %v1645_v29 = vsel %vm1597_vm2, %v1639_v44, 0.0 }
 0x32e   :  { %1397 = vst.msk [vmem:[#allocation5 + $0x20] sm:$0xff] %vm22_vm0, %v1391_v63  ;;  %1749 = vperm.xlu0 %1870, %v1642_v21   ;;  %v1623_v42 = vmul.f32 0.6931472, %v2006_v19  ;;  %v1632_v30 = vld [vmem:[#allocation4 + $0x10] sm:$0xff]  ;;  %v1880_v46 = vunpack.i.h.bf16 %v1878_v6  ;;  %v1879_v24 = vunpack.i.l.bf16 %v1878_v6 }
 0x32f   :  { %1589 = vst.msk [vmem:[#allocation4 + $0x20] sm:$0xff] %vm22_vm0, %v1583_v41  ;;  %v1638_v11 = vsub.f32 %v1626_v10, %v1632_v30  ;;  %vm1649_vm0 = vcmp.eq.s32.totalorder %v2557_v1, 1 }
 0x330   :  { %v1629_v54 = vadd.f32 %v1623_v42, %v1605_v37  ;;  %v1883_v2 = vpop.permute.xlu1 %1882  ;;  %v1708_v53 = vsel %vm1662_vm15, %v1880_v46, 0.0  ;;  %v1707_v58 = vsel %vm1662_vm15, %v1879_v24, 0.0 }
 0x331   :  { %v2008_v4 = vpop.eup %2007  ;;  %v1655_v32 = vld [vmem:[#allocation5 + $0x28] sm:$0xff]  ;;  %v1644_v20 = vsel %vm1596_vm6, %v1638_v11, 0.0  ;;  %v1885_v59 = vunpack.i.h.bf16 %v1883_v2  ;;  %v1884_v52 = vunpack.i.l.bf16 %v1883_v2 }
 0x332   :  { %v1661_v8 = vcvt.s32.f32 %v1655_v32  ;;  %v1621_v25 = vmul.f32 0.6931472, %v2008_v4  ;;  %v1635_v13 = vld [vmem:[#allocation4 + $0x28] sm:$0xff] }
 0x333   :  { %v1641_v26 = vsub.f32 %v1629_v54, %v1635_v13  ;;  %v1710_v57 = vsel %vm1662_vm15, %v1885_v59, 0.0  ;;  %v1709_v42 = vsel %vm1662_vm15, %v1884_v52, 0.0 }
 0x334   :  { %1738 = vperm.xlu1 %1869, %v1661_v8   ;;  %v1628_v14 = vadd.f32 %v1621_v25, %v1604_v15  ;;  %v1873_v16 = vpop.permute.xlu0 %1872 }
 0x335   :  { %v1654_v45 = vld [vmem:[#allocation5 + $0x20] sm:$0xff]  ;;  %v1647_v36 = vsel %vm1599_vm8, %v1641_v26, 0.0  ;;  %v1875_v60 = vunpack.i.h.bf16 %v1873_v16  ;;  %v1874_v18 = vunpack.i.l.bf16 %v1873_v16 }
 0x336   :  { %v1660_v43 = vcvt.s32.f32 %v1654_v45  ;;  %v1634_v12 = vld [vmem:[#allocation4 + $0x20] sm:$0xff] }
 0x337   :  { %v1640_v0 = vsub.f32 %v1628_v14, %v1634_v12  ;;  %v1706_v48 = vsel %vm1662_vm15, %v1875_v60, 0.0  ;;  %v1705_v7 = vsel %vm1662_vm15, %v1874_v18, 0.0 }
 0x338   :  { %1764 = vperm.xlu1 %1869, %v1645_v29   ;;  %1733 = vperm.xlu0 %1870, %v1660_v43  }
 0x339   :  { %v1646_v47 = vsel %vm1598_vm9, %v1640_v0, 0.0 }
 0x33c   :  { %1774 = vperm.xlu1 %1869, %v1647_v36   ;;  %1759 = vperm.xlu0 %1870, %v1644_v20  }
 0x340   :  { %1769 = vperm.xlu0 %1870, %v1646_v47  }
 0x386   :  { %v1719_v5 = vpop.permute.xlu1 %1718 }
 0x387   :  { %v1742_v35 = vsel %vm1649_vm0, %v1719_v5, %v1706_v48 }
 0x39f   :  { %v1714_v49 = vpop.permute.xlu0 %1713 }
 0x3a0   :  { %v1741_v31 = vsel %vm1649_vm0, %v1714_v49, %v1705_v7 }
 0x3a3   :  { %v1729_v40 = vpop.permute.xlu1 %1728 }
 0x3a4   :  { %v1744_v39 = vsel %vm1649_vm0, %v1729_v40, %v1708_v53 }
 0x3a7   :  { %v1724_v33 = vpop.permute.xlu0 %1723 }
 0x3a8   :  { %v1743_v34 = vsel %vm1649_vm0, %v1724_v33, %v1707_v58 }
 0x3a9   :  { %v1755_v23 = vpop.permute.xlu1 %1754 }
 0x3aa   :  { %v1778_v27 = vsel %vm1648_vm4, %v1755_v23, %v1742_v35 }
 0x3ab   :  { %1784 = vst [vmem:[%s3484_s4 + $0x8] sm:$0xff] %v1778_v27 }
 0x3ad   :  { %v1750_v61 = vpop.permute.xlu0 %1749 }
 0x3ae   :  { %v1777_v3 = vsel %vm1648_vm4, %v1750_v61, %v1741_v31 }
 0x3af   :  { %1783 = vst [vmem:[%s3484_s4] sm:$0xff] %v1777_v3 }
 0x3b3   :  { %v1739_v56 = vpop.permute.xlu1 %1738 }
 0x3b4   :  { %v1746_v19 = vsel %vm1649_vm0, %v1739_v56, %v1710_v57 }
 0x3b7   :  { %v1765_v55 = vpop.permute.xlu1 %1764  ;;  %v1734_v22 = vpop.permute.xlu0 %1733 }
 0x3b8   :  { %v1780_v62 = vsel %vm1648_vm4, %v1765_v55, %v1744_v39  ;;  %v1745_v9 = vsel %vm1649_vm0, %v1734_v22, %v1709_v42 }
 0x3b9   :  { %1786 = vst [vmem:[%s3484_s4 + $0x18] sm:$0xff] %v1780_v62 }
 0x3bb   :  { %v1775_v63 = vpop.permute.xlu1 %1774  ;;  %v1760_v41 = vpop.permute.xlu0 %1759 }
 0x3bc   :  { %v1782_v50 = vsel %vm1648_vm4, %v1775_v63, %v1746_v19  ;;  %v1779_v21 = vsel %vm1648_vm4, %v1760_v41, %v1743_v34 }
 0x3bd   :  { %1788 = vst [vmem:[%s3484_s4 + $0x28] sm:$0xff] %v1782_v50  ;;  %1785 = vst [vmem:[%s3484_s4 + $0x10] sm:$0xff] %v1779_v21 }
 0x3bf   :  { %v1770_v51 = vpop.permute.xlu0 %1769 }
 0x3c0   :  { %v1781_v28 = vsel %vm1648_vm4, %v1770_v51, %v1745_v9 }
 0x3c1   :  { %1787 = vst [vmem:[%s3484_s4 + $0x20] sm:$0xff] %v1781_v28 }

</bundles_post_ra>
